<compile_context>
chip_gen: v5e
topology: v5e:2x2
jax: 0.10.0
libtpu: 0.0.40
codegen_flags: <defaults>
</compile_context>

<pallas_src>
import jax
import jax.numpy as jnp
from jax import lax
from jax.experimental import pallas as pl
from jax.experimental.pallas import tpu as pltpu


def _round_up(n, m):
    return ((n + m - 1) // m) * m


def _swap_leading(x3):
    """(A, B, D) -> (B, A, D) inside the kernel (lane dim unchanged)."""
    if hasattr(pltpu, "einshape"):
        return pltpu.einshape("abd->bad", x3)
    return jnp.transpose(x3, (1, 0, 2))


def _cc_kernel(x_ref, w_ref, b_ref, gamma_ref, o_ref, q_sc, m_sc, l_sc, acc_sc):
    i = pl.program_id(1)                 # query row-tile index
    j = pl.program_id(2)                 # position in the streamed column walk
    nj = pl.num_programs(2)
    jp = (i + j) % nj                    # row-tile actually held by x_ref this step

    x = x_ref[0]                         # (TH, W, C) bf16, rows [jp*TH, jp*TH+TH)
    w = w_ref[...]                       # (C, C + 2*Cqp) bf16, packed [v | k | q]
    bias = b_ref[...]                    # (1, C + 2*Cqp) f32
    TH, W, C = x.shape
    Cqp = (w.shape[1] - C) // 2
    vk = C + Cqp

    x_flat = x.reshape(TH * W, C)

    # Fused value+key projection of this tile (one bf16 MXU pass, f32 accumulate).
    kv = jnp.dot(x_flat, w[:, :vk], preferred_element_type=jnp.float32) + bias[:, :vk]
    # Cast to bf16 BEFORE any relayout (halves XLU bytes).
    v_col = kv[:, :C].astype(jnp.bfloat16).reshape(TH, W, C)
    k_col = kv[:, C:].astype(jnp.bfloat16).reshape(TH, W, Cqp)

    # ---- first kv step: this tile holds the query rows.  Project q, run the
    #      ROW ("W") branch, initialise the online-softmax state (W-major so
    #      the streamed column branch needs no per-step transpose back), and
    #      stash the residual x in the resident output buffer. ----
    @pl.when(j == 0)
    def _():
        q_row = (jnp.dot(x_flat, w[:, vk:], preferred_element_type=jnp.float32)
                 + bias[:, vk:]).astype(jnp.bfloat16).reshape(TH, W, Cqp)
        e_w = jnp.einsum('twd,tgd->twg', q_row, k_col,
                         preferred_element_type=jnp.float32)        # (TH, W, W)
        m0 = jnp.max(e_w, axis=-1)                                  # (TH, W)
        p_w = jnp.exp(e_w - m0[:, :, None])
        l0 = jnp.sum(p_w, axis=-1)
        out_w = jnp.einsum('twg,tgc->twc', p_w.astype(jnp.bfloat16), v_col,
                           preferred_element_type=jnp.float32)      # (TH, W, C)

        q_sc[...] = _swap_leading(q_row)                            # (W, TH, Cqp)
        m_sc[...] = m0.T                                            # (W, TH)
        l_sc[...] = l0.T
        acc_sc[...] = _swap_leading(out_w.astype(jnp.bfloat16)).astype(jnp.float32)
        o_ref[0] = x                                                # residual stash

    # ---- every step: merge this column ("H") block with the online softmax ----
    kt = _swap_leading(k_col)                                       # (W, TH, Cqp)
    vt = _swap_leading(v_col)                                       # (W, TH, C)
    e_h = jnp.einsum('wtd,wgd->wtg', q_sc[...], kt,
                     preferred_element_type=jnp.float32)            # (W, TH, TH)
    # Criss-cross diagonal mask: global column row jp*TH + g == query row i*TH + t.
    # (Only ever true on the jp == i block; the row branch keeps the running max
    #  finite, so exp(-inf - finite) = 0 and no NaNs appear.)
    t_idx = lax.broadcasted_iota(jnp.int32, (TH, TH), 0) + i * TH
    g_idx = lax.broadcasted_iota(jnp.int32, (TH, TH), 1) + jp * TH
    e_h = jnp.where((t_idx == g_idx)[None, :, :], -jnp.inf, e_h)

    m_prev = m_sc[...]
    m_new = jnp.maximum(m_prev, jnp.max(e_h, axis=-1))              # (W, TH)
    alpha = jnp.exp(m_prev - m_new)
    p_h = jnp.exp(e_h - m_new[:, :, None])                          # (W, TH, TH)
    l_sc[...] = alpha * l_sc[...] + jnp.sum(p_h, axis=-1)
    acc_sc[...] = (alpha[:, :, None] * acc_sc[...]
                   + jnp.einsum('wtg,wgc->wtc', p_h.astype(jnp.bfloat16), vt,
                                preferred_element_type=jnp.float32))
    m_sc[...] = m_new

    # ---- last step: shared normalisation with gamma folded in once, relayout
    #      back to H-major in bf16, residual add in f32. ----
    @pl.when(j == nj - 1)
    def _():
        scale = gamma_ref[0, 0] * pl.reciprocal(l_sc[...], approx=True)   # (W, TH)
        att_t = (acc_sc[...] * scale[:, :, None]).astype(jnp.bfloat16)    # (W, TH, C)
        att = _swap_leading(att_t)                                        # (TH, W, C)
        o_ref[0] = (att.astype(jnp.float32)
                    + o_ref[0].astype(jnp.float32)).astype(o_ref.dtype)


def _vmem_capacity_bytes():
    try:
        return int(pltpu.get_tpu_info().vmem_capacity_bytes)
    except Exception:
        return 64 << 20


def _vmem_limit_bytes(TH, W, C, Cqp):
    """Lane/sublane-padded VMEM estimate for one grid step, with headroom."""
    def padded(outer, sub, lane, bpe=4):
        return outer * _round_up(sub, 8) * _round_up(lane, 128) * bpe
    vk = C + Cqp
    est = (
        2 * 2 * padded(TH, W, C, 2)                                   # x in + out, dbl-buffered
        + 2 * (padded(1, C, vk + Cqp, 2) + padded(1, 8, vk + Cqp, 4)) # weights + bias
        + padded(1, TH * W, vk, 4) + padded(1, TH * W, Cqp, 4)        # f32 projections
        + 6 * padded(TH, W, C, 2)                                     # bf16 v/k/q + relayouts
        + 2 * padded(TH, W, W, 4) + 2 * padded(W, TH, TH, 4)          # energies / probs
        + 2 * padded(TH, W, C, 4)                                     # p@v partials
        + padded(W, TH, Cqp, 2) + 2 * padded(1, W, TH, 4)             # q / m / l scratch
        + padded(W, TH, C, 4)                                         # acc scratch
    )
    est = int(1.5 * est) + (2 << 20)
    cap = _vmem_capacity_bytes()
    ceiling = cap - (16 << 20)        # headroom for Mosaic scratch / semaphores
    floor = min(32 << 20, ceiling)
    return max(floor, min(est, ceiling))


def _pick_tile_h(H, W, C):
    """Whole-image tile when the working set comfortably fits VMEM, else tile H."""
    budget = (_vmem_capacity_bytes() - (16 << 20)) // 2
    c_pad = _round_up(C, 128)
    w_pad = _round_up(W, 128)

    def footprint(th):
        return th * W * (10 * c_pad + 8 * w_pad) + W * th * 4 * c_pad

    for th in (H, 64, 32, 16, 8):
        if th <= H and H % th == 0 and footprint(th) <= budget:
            return th
    return 8 if H % 8 == 0 else H     # TODO(synk): pad H for awkward spatial sizes.


def cc_module_forward_nhwc(x_nhwc, params, *, tile_h=None):
    """CC_module forward on NHWC activations: (B, H, W, C) -> (B, H, W, C) bf16."""
    wq, bq, wk, bk, wv, bv, gamma = params
    B, H, W, C = x_nhwc.shape
    Cq = wq.shape[1]

    # Lane-align the packed key/query segments when C is lane-aligned; the
    # zero-padded channels contribute exactly 0 to q.k^T, so results are unchanged.
    Cqp = _round_up(Cq, 128) if C % 128 == 0 else Cq
    pad = Cqp - Cq
    wk_p = jnp.pad(wk, ((0, 0), (0, pad))) if pad else wk
    wq_p = jnp.pad(wq, ((0, 0), (0, pad))) if pad else wq
    bk_p = jnp.pad(bk, ((0, 0), (0, pad))) if pad else bk
    bq_p = jnp.pad(bq, ((0, 0), (0, pad))) if pad else bq

    # Packed [value | key | query]; bf16 weights for the MXU, f32 biases.
    w_fused = jnp.concatenate([wv, wk_p, wq_p], axis=1).astype(jnp.bfloat16)
    b_fused = jnp.concatenate([bv, bk_p, bq_p], axis=1).astype(jnp.float32)
    gamma = gamma.reshape(1, 1).astype(jnp.float32)

    if tile_h is None:
        tile_h = _pick_tile_h(H, W, C)
    if H % tile_h:
        raise ValueError(f"tile_h={tile_h} must divide H={H}")
    n_th = H // tile_h
    ctot = C + 2 * Cqp

    x = x_nhwc.astype(jnp.bfloat16)     # bf16 at the HBM boundary

    return pl.pallas_call(
        _cc_kernel,
        out_shape=jax.ShapeDtypeStruct((B, H, W, C), jnp.bfloat16),
        grid_spec=pltpu.PrefetchScalarGridSpec(
            num_scalar_prefetch=0,
            grid=(B, n_th, n_th),
            in_specs=[
                # Streamed kv tile; starts at the query tile itself (modulo walk).
                pl.BlockSpec((1, tile_h, W, C),
                             lambda b, i, j: (b, (i + j) % n_th, 0, 0)),
                pl.BlockSpec((C, ctot), lambda b, i, j: (0, 0)),
                pl.BlockSpec((1, ctot), lambda b, i, j: (0, 0)),
                pl.BlockSpec(memory_space=pltpu.MemorySpace.SMEM),   # gamma scalar
            ],
            out_specs=pl.BlockSpec((1, tile_h, W, C), lambda b, i, j: (b, i, 0, 0)),
            scratch_shapes=[
                pltpu.VMEM((W, tile_h, Cqp), jnp.bfloat16),   # q (W-major)
                pltpu.VMEM((W, tile_h), jnp.float32),         # running max
                pltpu.VMEM((W, tile_h), jnp.float32),         # running denom
                pltpu.VMEM((W, tile_h, C), jnp.float32),      # running numerator
            ],
        ),
        compiler_params=pltpu.CompilerParams(
            dimension_semantics=("parallel", "parallel", "arbitrary"),
            vmem_limit_bytes=_vmem_limit_bytes(tile_h, W, C, Cqp)),
    )(x, w_fused, b_fused, gamma)


def cc_module_forward(x_nchw, params, *, tile_h=None):
    """PyTorch-layout entry point: (B, C, H, W) -> (B, C, H, W)."""
    x = jnp.transpose(x_nchw, (0, 2, 3, 1))            # NCHW -> NHWC
    out = cc_module_forward_nhwc(x, params, tile_h=tile_h)
    return jnp.transpose(out, (0, 3, 1, 2))            # NHWC -> NCHW


def cc_module_reference(x_nchw, params):
    """Pure-JAX f32 reference matching the PyTorch forward exactly."""
    wq, bq, wk, bk, wv, bv, gamma = params
    x = jnp.transpose(x_nchw, (0, 2, 3, 1)).astype(jnp.float32)     # (B, H, W, C)
    B, H, W, C = x.shape
    q = jnp.einsum('bhwc,cd->bhwd', x, wq) + bq[0]
    k = jnp.einsum('bhwc,cd->bhwd', x, wk) + bk[0]
    v = jnp.einsum('bhwc,cd->bhwd', x, wv) + bv[0]
    e_h = jnp.einsum('bhwd,bgwd->bhwg', q, k)            # attend over column (h')
    diag = jnp.eye(H, dtype=bool)
    e_h = jnp.where(diag[None, :, None, :], -jnp.inf, e_h)
    e_w = jnp.einsum('bhwd,bhgd->bhwg', q, k)            # attend over row (w')
    att = jax.nn.softmax(jnp.concatenate([e_h, e_w], axis=-1), axis=-1)
    a_h = att[..., :H]
    a_w = att[..., H:]
    out_h = jnp.einsum('bhwg,bgwc->bhwc', a_h, v)
    out_w = jnp.einsum('bhwg,bhgc->bhwc', a_w, v)
    out = gamma[0, 0] * (out_h + out_w) + x
    return jnp.transpose(out, (0, 3, 1, 2))


def init_params(key, in_dim, gamma_value=0.0):
    cq = in_dim // 8
    k1, k2, k3, k4, k5, k6 = jax.random.split(key, 6)
    wq = 0.1 * jax.random.normal(k1, (in_dim, cq), jnp.float32)
    bq = 0.1 * jax.random.normal(k2, (1, cq), jnp.float32)
    wk = 0.1 * jax.random.normal(k3, (in_dim, cq), jnp.float32)
    bk = 0.1 * jax.random.normal(k4, (1, cq), jnp.float32)
    wv = 0.1 * jax.random.normal(k5, (in_dim, in_dim), jnp.float32)
    bv = 0.1 * jax.random.normal(k6, (1, in_dim), jnp.float32)
    gamma = jnp.full((1, 1), gamma_value, jnp.float32)
    return (wq, bq, wk, bk, wv, bv, gamma)


if __name__ == "__main__":
    B, C, H, W = 2, 16, 16, 16   # in_dim=16 -> query/key channels = 2
    key = jax.random.PRNGKey(0)
    kx, kp = jax.random.split(key)
    x = jax.random.normal(kx, (B, C, H, W), jnp.float32)

    # Module default: gamma initialised to zero (output == x, up to bf16 I/O).
    params0 = init_params(kp, C, gamma_value=0.0)
    out0 = jax.block_until_ready(cc_module_forward(x, params0, tile_h=8))
    ref0 = cc_module_reference(x, params0)
    assert jnp.allclose(out0.astype(jnp.float32), ref0, rtol=1e-2, atol=1e-2)
    assert jnp.allclose(out0.astype(jnp.float32), x, rtol=1e-2, atol=1e-2)

    # Full attention path with non-zero gamma: exercise both the streamed
    # (online-softmax, tile_h=8 -> 2x2 H-tiles) and single-tile paths.
    params1 = init_params(kp, C, gamma_value=0.5)
    ref1 = cc_module_reference(x, params1)
    for th in (8, 16):
        out1 = jax.block_until_ready(cc_module_forward(x, params1, tile_h=th))
        max_err = float(jnp.max(jnp.abs(out1.astype(jnp.float32) - ref1)))
        assert jnp.allclose(out1.astype(jnp.float32), ref1, rtol=1e-2, atol=1e-2), \
            f"tile_h={th}: max abs err {max_err}"

    print("KERNEL_OK")
</pallas_src>

<mosaic_0001>
module attributes {stable_mosaic.version = 11 : i64} {
  func.func @_cc_kernel(%arg0: i32, %arg1: i32, %arg2: i32, %arg3: memref<1x8x16x16xbf16, #tpu.memory_space<vmem>>, %arg4: memref<16x20xbf16, #tpu.memory_space<vmem>>, %arg5: memref<1x20xf32, #tpu.memory_space<vmem>>, %arg6: memref<1x1xf32, #tpu.memory_space<smem>>, %arg7: memref<1x8x16x16xbf16, #tpu.memory_space<vmem>>, %arg8: memref<16x8x2xbf16, #tpu.memory_space<vmem>>, %arg9: memref<16x8xf32, #tpu.memory_space<vmem>>, %arg10: memref<16x8xf32, #tpu.memory_space<vmem>>, %arg11: memref<16x8x16xf32, #tpu.memory_space<vmem>>) attributes {dimension_semantics = [#tpu.dimension_semantics<parallel>, #tpu.dimension_semantics<parallel>, #tpu.dimension_semantics<arbitrary>], iteration_bounds = array<i64: 2, 2, 2>, scalar_prefetch = 0 : i64, scratch_operands = 4 : i64, tpu.core_type = #tpu.core_type<tc>, window_params = [{transform_indices = @transform_0, window_bounds = array<i64: 1, 8, 16, 16>}, {pipeline_mode = #tpu.pipeline_mode<synchronous>, transform_indices = @transform_1, window_bounds = array<i64: 16, 20>}, {pipeline_mode = #tpu.pipeline_mode<synchronous>, transform_indices = @transform_2, window_bounds = array<i64: 1, 20>}, {transform_indices = @transform_3, window_bounds = array<i64: 1, 1>}, {transform_indices = @transform_4, window_bounds = array<i64: 1, 8, 16, 16>}]} {
    %0 = arith.addi %arg1, %arg2 : i32
    %c2_i32 = arith.constant 2 : i32
    %c0_i32 = arith.constant 0 : i32
    %1 = arith.cmpi eq, %c2_i32, %c0_i32 : i32
    %c1_i32 = arith.constant 1 : i32
    %2 = arith.select %1, %c1_i32, %c2_i32 : i32
    %3 = arith.remsi %0, %2 : i32
    %c0_i32_0 = arith.constant 0 : i32
    %4 = arith.cmpi ne, %3, %c0_i32_0 : i32
    %c0_i32_1 = arith.constant 0 : i32
    %5 = arith.cmpi slt, %3, %c0_i32_1 : i32
    %c0_i32_2 = arith.constant 0 : i32
    %6 = arith.cmpi slt, %2, %c0_i32_2 : i32
    %7 = arith.xori %5, %6 : i1
    %8 = arith.andi %7, %4 : i1
    %9 = arith.addi %3, %2 : i32
    %10 = arith.select %8, %9, %3 : i32
    %c0 = arith.constant 0 : index
    %c0_3 = arith.constant 0 : index
    %c0_4 = arith.constant 0 : index
    %c0_5 = arith.constant 0 : index
    %11 = vector.load %arg3[%c0, %c0_3, %c0_4, %c0_5] : memref<1x8x16x16xbf16, #tpu.memory_space<vmem>>, vector<1x8x16x16xbf16>
    %12 = vector.shape_cast %11 : vector<1x8x16x16xbf16> to vector<8x16x16xbf16>
    %c0_6 = arith.constant 0 : index
    %c0_7 = arith.constant 0 : index
    %13 = vector.load %arg4[%c0_6, %c0_7] : memref<16x20xbf16, #tpu.memory_space<vmem>>, vector<16x20xbf16>
    %c0_8 = arith.constant 0 : index
    %c0_9 = arith.constant 0 : index
    %14 = vector.load %arg5[%c0_8, %c0_9] : memref<1x20xf32, #tpu.memory_space<vmem>>, vector<1x20xf32>
    %15 = vector.shape_cast %12 : vector<8x16x16xbf16> to vector<128x16xbf16>
    %16 = vector.extract_strided_slice %13 {offsets = [0, 0], sizes = [16, 18], strides = [1, 1]} : vector<16x20xbf16> to vector<16x18xbf16>
    %cst = arith.constant dense<0.000000e+00> : vector<128x18xf32>
    %17 = tpu.matmul %15, %16, %cst {dimension_numbers = #tpu.dot_dimension_numbers<[1], [0], [0], [1], [0, 0, 1, 1], [], []>} : vector<128x16xbf16>, vector<16x18xbf16>, vector<128x18xf32> -> vector<128x18xf32>
    %18 = vector.extract_strided_slice %14 {offsets = [0, 0], sizes = [1, 18], strides = [1, 1]} : vector<1x20xf32> to vector<1x18xf32>
    %19 = vector.broadcast %18 : vector<1x18xf32> to vector<128x18xf32>
    %20 = arith.addf %17, %19 : vector<128x18xf32>
    %21 = vector.extract_strided_slice %20 {offsets = [0, 0], sizes = [128, 16], strides = [1, 1]} : vector<128x18xf32> to vector<128x16xf32>
    %22 = arith.truncf %21 : vector<128x16xf32> to vector<128x16xbf16>
    %23 = vector.shape_cast %22 : vector<128x16xbf16> to vector<8x16x16xbf16>
    %24 = vector.extract_strided_slice %20 {offsets = [0, 16], sizes = [128, 2], strides = [1, 1]} : vector<128x18xf32> to vector<128x2xf32>
    %25 = arith.truncf %24 : vector<128x2xf32> to vector<128x2xbf16>
    %26 = vector.shape_cast %25 : vector<128x2xbf16> to vector<8x16x2xbf16>
    %c0_i32_10 = arith.constant 0 : i32
    %27 = arith.cmpi eq, %arg2, %c0_i32_10 : i32
    %28 = arith.extui %27 : i1 to i32
    %c0_i32_11 = arith.constant 0 : i32
    %29 = arith.cmpi ne, %28, %c0_i32_11 : i32
    scf.if %29 {
      %74 = vector.extract_strided_slice %13 {offsets = [0, 18], sizes = [16, 2], strides = [1, 1]} : vector<16x20xbf16> to vector<16x2xbf16>
      %cst_37 = arith.constant dense<0.000000e+00> : vector<128x2xf32>
      %75 = tpu.matmul %15, %74, %cst_37 {dimension_numbers = #tpu.dot_dimension_numbers<[1], [0], [0], [1], [0, 0, 1, 1], [], []>} : vector<128x16xbf16>, vector<16x2xbf16>, vector<128x2xf32> -> vector<128x2xf32>
      %76 = vector.extract_strided_slice %14 {offsets = [0, 18], sizes = [1, 2], strides = [1, 1]} : vector<1x20xf32> to vector<1x2xf32>
      %77 = vector.broadcast %76 : vector<1x2xf32> to vector<128x2xf32>
      %78 = arith.addf %75, %77 : vector<128x2xf32>
      %79 = arith.truncf %78 : vector<128x2xf32> to vector<128x2xbf16>
      %80 = vector.shape_cast %79 : vector<128x2xbf16> to vector<8x16x2xbf16>
      "tpu.trace_start"() <{level = 10 : i32, message = "twd,tgd->twg"}> : () -> ()
      %cst_38 = arith.constant dense<0.000000e+00> : vector<8x16x16xf32>
      %81 = tpu.matmul %80, %26, %cst_38 {dimension_numbers = #tpu.dot_dimension_numbers<[2], [2], [1], [1], [0, 0, 0, 1, 1, 1], [0], [0]>} : vector<8x16x2xbf16>, vector<8x16x2xbf16>, vector<8x16x16xf32> -> vector<8x16x16xf32>
      "tpu.trace_stop"() : () -> ()
      %cst_39 = arith.constant dense<0xFF800000> : vector<8x16xf32>
      %82 = vector.multi_reduction <maximumf>, %81, %cst_39 [2] : vector<8x16x16xf32> to vector<8x16xf32>
      %83 = vector.shape_cast %82 : vector<8x16xf32> to vector<8x16x1xf32>
      %84 = vector.broadcast %83 : vector<8x16x1xf32> to vector<8x16x16xf32>
      %85 = arith.subf %81, %84 : vector<8x16x16xf32>
      %86 = math.exp %85 : vector<8x16x16xf32>
      %cst_40 = arith.constant dense<0.000000e+00> : vector<8x16xf32>
      %87 = vector.multi_reduction <add>, %86, %cst_40 [2] : vector<8x16x16xf32> to vector<8x16xf32>
      %88 = arith.truncf %86 : vector<8x16x16xf32> to vector<8x16x16xbf16>
      "tpu.trace_start"() <{level = 10 : i32, message = "twg,tgc->twc"}> : () -> ()
      %cst_41 = arith.constant dense<0.000000e+00> : vector<8x16x16xf32>
      %89 = tpu.matmul %88, %23, %cst_41 {dimension_numbers = #tpu.dot_dimension_numbers<[2], [1], [1], [2], [0, 0, 0, 1, 1, 2], [0], [0]>} : vector<8x16x16xbf16>, vector<8x16x16xbf16>, vector<8x16x16xf32> -> vector<8x16x16xf32>
      "tpu.trace_stop"() : () -> ()
      %90 = tpu.transpose %80, [1, 0, 2] : vector<8x16x2xbf16> -> vector<16x8x2xbf16>
      %c0_42 = arith.constant 0 : index
      %c0_43 = arith.constant 0 : index
      %c0_44 = arith.constant 0 : index
      %91 = vector.load %arg8[%c0_42, %c0_43, %c0_44] : memref<16x8x2xbf16, #tpu.memory_space<vmem>>, vector<16x8x2xbf16>
      tpu.vector_store %arg8[%c0_42, %c0_43, %c0_44], %90 {strides = array<i32>} : memref<16x8x2xbf16, #tpu.memory_space<vmem>>, vector<16x8x2xbf16>,
      %92 = tpu.transpose %82, [1, 0] : vector<8x16xf32> -> vector<16x8xf32>
      %c0_45 = arith.constant 0 : index
      %c0_46 = arith.constant 0 : index
      %93 = vector.load %arg9[%c0_45, %c0_46] : memref<16x8xf32, #tpu.memory_space<vmem>>, vector<16x8xf32>
      tpu.vector_store %arg9[%c0_45, %c0_46], %92 {strides = array<i32>} : memref<16x8xf32, #tpu.memory_space<vmem>>, vector<16x8xf32>,
      %94 = tpu.transpose %87, [1, 0] : vector<8x16xf32> -> vector<16x8xf32>
      %c0_47 = arith.constant 0 : index
      %c0_48 = arith.constant 0 : index
      %95 = vector.load %arg10[%c0_47, %c0_48] : memref<16x8xf32, #tpu.memory_space<vmem>>, vector<16x8xf32>
      tpu.vector_store %arg10[%c0_47, %c0_48], %94 {strides = array<i32>} : memref<16x8xf32, #tpu.memory_space<vmem>>, vector<16x8xf32>,
      %96 = arith.truncf %89 : vector<8x16x16xf32> to vector<8x16x16xbf16>
      %97 = tpu.transpose %96, [1, 0, 2] : vector<8x16x16xbf16> -> vector<16x8x16xbf16>
      %98 = arith.extf %97 : vector<16x8x16xbf16> to vector<16x8x16xf32>
      %c0_49 = arith.constant 0 : index
      %c0_50 = arith.constant 0 : index
      %c0_51 = arith.constant 0 : index
      %99 = vector.load %arg11[%c0_49, %c0_50, %c0_51] : memref<16x8x16xf32, #tpu.memory_space<vmem>>, vector<16x8x16xf32>
      tpu.vector_store %arg11[%c0_49, %c0_50, %c0_51], %98 {strides = array<i32>} : memref<16x8x16xf32, #tpu.memory_space<vmem>>, vector<16x8x16xf32>,
      %c0_52 = arith.constant 0 : index
      %c0_53 = arith.constant 0 : index
      %c0_54 = arith.constant 0 : index
      %c0_55 = arith.constant 0 : index
      %100 = vector.load %arg7[%c0_52, %c0_53, %c0_54, %c0_55] : memref<1x8x16x16xbf16, #tpu.memory_space<vmem>>, vector<1x8x16x16xbf16>
      %101 = vector.shape_cast %100 : vector<1x8x16x16xbf16> to vector<8x16x16xbf16>
      %102 = vector.shape_cast %12 : vector<8x16x16xbf16> to vector<1x8x16x16xbf16>
      tpu.vector_store %arg7[%c0_52, %c0_53, %c0_54, %c0_55], %102 {strides = array<i32>} : memref<1x8x16x16xbf16, #tpu.memory_space<vmem>>, vector<1x8x16x16xbf16>,
    } else {
    }
    %30 = tpu.transpose %26, [1, 0, 2] : vector<8x16x2xbf16> -> vector<16x8x2xbf16>
    %31 = tpu.transpose %23, [1, 0, 2] : vector<8x16x16xbf16> -> vector<16x8x16xbf16>
    %c0_12 = arith.constant 0 : index
    %c0_13 = arith.constant 0 : index
    %c0_14 = arith.constant 0 : index
    %32 = vector.load %arg8[%c0_12, %c0_13, %c0_14] : memref<16x8x2xbf16, #tpu.memory_space<vmem>>, vector<16x8x2xbf16>
    "tpu.trace_start"() <{level = 10 : i32, message = "wtd,wgd->wtg"}> : () -> ()
    %cst_15 = arith.constant dense<0.000000e+00> : vector<16x8x8xf32>
    %33 = tpu.matmul %32, %30, %cst_15 {dimension_numbers = #tpu.dot_dimension_numbers<[2], [2], [1], [1], [0, 0, 0, 1, 1, 1], [0], [0]>} : vector<16x8x2xbf16>, vector<16x8x2xbf16>, vector<16x8x8xf32> -> vector<16x8x8xf32>
    "tpu.trace_stop"() : () -> ()
    %34 = tpu.iota {dimensions = array<i32: 0>} : vector<8x8xi32>
    %c8_i32 = arith.constant 8 : i32
    %35 = arith.muli %arg1, %c8_i32 : i32
    %36 = vector.broadcast %35 : i32 to vector<8x8xi32>
    %37 = arith.addi %34, %36 : vector<8x8xi32>
    %38 = tpu.iota {dimensions = array<i32: 1>} : vector<8x8xi32>
    %c8_i32_16 = arith.constant 8 : i32
    %39 = arith.muli %10, %c8_i32_16 : i32
    %40 = vector.broadcast %39 : i32 to vector<8x8xi32>
    %41 = arith.addi %38, %40 : vector<8x8xi32>
    %42 = arith.cmpi eq, %37, %41 : vector<8x8xi32>
    %43 = vector.shape_cast %42 : vector<8x8xi1> to vector<1x8x8xi1>
    %cst_17 = arith.constant 0xFF800000 : f32
    %44 = vector.shape_cast %43 : vector<1x8x8xi1> to vector<1x8x8xi1>
    %45 = vector.broadcast %44 : vector<1x8x8xi1> to vector<16x8x8xi1>
    %46 = vector.broadcast %cst_17 : f32 to vector<16x8x8xf32>
    %47 = arith.select %45, %46, %33 : vector<16x8x8xi1>, vector<16x8x8xf32>
    %c0_18 = arith.constant 0 : index
    %c0_19 = arith.constant 0 : index
    %48 = vector.load %arg9[%c0_18, %c0_19] : memref<16x8xf32, #tpu.memory_space<vmem>>, vector<16x8xf32>
    %cst_20 = arith.constant dense<0xFF800000> : vector<16x8xf32>
    %49 = vector.multi_reduction <maximumf>, %47, %cst_20 [2] : vector<16x8x8xf32> to vector<16x8xf32>
    %50 = arith.maximumf %48, %49 : vector<16x8xf32>
    %51 = arith.subf %48, %50 : vector<16x8xf32>
    %52 = math.exp %51 : vector<16x8xf32>
    %53 = vector.shape_cast %50 : vector<16x8xf32> to vector<16x8x1xf32>
    %54 = vector.broadcast %53 : vector<16x8x1xf32> to vector<16x8x8xf32>
    %55 = arith.subf %47, %54 : vector<16x8x8xf32>
    %56 = math.exp %55 : vector<16x8x8xf32>
    %c0_21 = arith.constant 0 : index
    %c0_22 = arith.constant 0 : index
    %57 = vector.load %arg10[%c0_21, %c0_22] : memref<16x8xf32, #tpu.memory_space<vmem>>, vector<16x8xf32>
    %58 = arith.mulf %52, %57 : vector<16x8xf32>
    %cst_23 = arith.constant dense<0.000000e+00> : vector<16x8xf32>
    %59 = vector.multi_reduction <add>, %56, %cst_23 [2] : vector<16x8x8xf32> to vector<16x8xf32>
    %60 = arith.addf %58, %59 : vector<16x8xf32>
    %c0_24 = arith.constant 0 : index
    %c0_25 = arith.constant 0 : index
    %61 = vector.load %arg10[%c0_24, %c0_25] : memref<16x8xf32, #tpu.memory_space<vmem>>, vector<16x8xf32>
    tpu.vector_store %arg10[%c0_24, %c0_25], %60 {strides = array<i32>} : memref<16x8xf32, #tpu.memory_space<vmem>>, vector<16x8xf32>,
    %62 = vector.shape_cast %52 : vector<16x8xf32> to vector<16x8x1xf32>
    %c0_26 = arith.constant 0 : index
    %c0_27 = arith.constant 0 : index
    %c0_28 = arith.constant 0 : index
    %63 = vector.load %arg11[%c0_26, %c0_27, %c0_28] : memref<16x8x16xf32, #tpu.memory_space<vmem>>, vector<16x8x16xf32>
    %64 = vector.broadcast %62 : vector<16x8x1xf32> to vector<16x8x16xf32>
    %65 = arith.mulf %64, %63 : vector<16x8x16xf32>
    %66 = arith.truncf %56 : vector<16x8x8xf32> to vector<16x8x8xbf16>
    "tpu.trace_start"() <{level = 10 : i32, message = "wtg,wgc->wtc"}> : () -> ()
    %cst_29 = arith.constant dense<0.000000e+00> : vector<16x8x16xf32>
    %67 = tpu.matmul %66, %31, %cst_29 {dimension_numbers = #tpu.dot_dimension_numbers<[2], [1], [1], [2], [0, 0, 0, 1, 1, 2], [0], [0]>} : vector<16x8x8xbf16>, vector<16x8x16xbf16>, vector<16x8x16xf32> -> vector<16x8x16xf32>
    "tpu.trace_stop"() : () -> ()
    %68 = arith.addf %65, %67 : vector<16x8x16xf32>
    %c0_30 = arith.constant 0 : index
    %c0_31 = arith.constant 0 : index
    %c0_32 = arith.constant 0 : index
    %69 = vector.load %arg11[%c0_30, %c0_31, %c0_32] : memref<16x8x16xf32, #tpu.memory_space<vmem>>, vector<16x8x16xf32>
    tpu.vector_store %arg11[%c0_30, %c0_31, %c0_32], %68 {strides = array<i32>} : memref<16x8x16xf32, #tpu.memory_space<vmem>>, vector<16x8x16xf32>,
    %c0_33 = arith.constant 0 : index
    %c0_34 = arith.constant 0 : index
    %70 = vector.load %arg9[%c0_33, %c0_34] : memref<16x8xf32, #tpu.memory_space<vmem>>, vector<16x8xf32>
    tpu.vector_store %arg9[%c0_33, %c0_34], %50 {strides = array<i32>} : memref<16x8xf32, #tpu.memory_space<vmem>>, vector<16x8xf32>,
    %c1_i32_35 = arith.constant 1 : i32
    %71 = arith.cmpi eq, %arg2, %c1_i32_35 : i32
    %72 = arith.extui %71 : i1 to i32
    %c0_i32_36 = arith.constant 0 : i32
    %73 = arith.cmpi ne, %72, %c0_i32_36 : i32
    scf.if %73 {
      %c0_37 = arith.constant 0 : index
      %c0_38 = arith.constant 0 : index
      %74 = memref.load %arg6[%c0_37, %c0_38] : memref<1x1xf32, #tpu.memory_space<smem>>
      %c0_39 = arith.constant 0 : index
      %c0_40 = arith.constant 0 : index
      %75 = vector.load %arg10[%c0_39, %c0_40] : memref<16x8xf32, #tpu.memory_space<vmem>>, vector<16x8xf32>
      %76 = tpu.reciprocal %75 {approx = true} : vector<16x8xf32> -> vector<16x8xf32>
      %77 = vector.broadcast %74 : f32 to vector<16x8xf32>
      %78 = arith.mulf %77, %76 : vector<16x8xf32>
      %c0_41 = arith.constant 0 : index
      %c0_42 = arith.constant 0 : index
      %c0_43 = arith.constant 0 : index
      %79 = vector.load %arg11[%c0_41, %c0_42, %c0_43] : memref<16x8x16xf32, #tpu.memory_space<vmem>>, vector<16x8x16xf32>
      %80 = vector.shape_cast %78 : vector<16x8xf32> to vector<16x8x1xf32>
      %81 = vector.broadcast %80 : vector<16x8x1xf32> to vector<16x8x16xf32>
      %82 = arith.mulf %79, %81 : vector<16x8x16xf32>
      %83 = arith.truncf %82 : vector<16x8x16xf32> to vector<16x8x16xbf16>
      %84 = tpu.transpose %83, [1, 0, 2] : vector<16x8x16xbf16> -> vector<8x16x16xbf16>
      %85 = arith.extf %84 : vector<8x16x16xbf16> to vector<8x16x16xf32>
      %c0_44 = arith.constant 0 : index
      %c0_45 = arith.constant 0 : index
      %c0_46 = arith.constant 0 : index
      %c0_47 = arith.constant 0 : index
      %86 = vector.load %arg7[%c0_44, %c0_45, %c0_46, %c0_47] : memref<1x8x16x16xbf16, #tpu.memory_space<vmem>>, vector<1x8x16x16xbf16>
      %87 = vector.shape_cast %86 : vector<1x8x16x16xbf16> to vector<8x16x16xbf16>
      %88 = arith.extf %87 : vector<8x16x16xbf16> to vector<8x16x16xf32>
      %89 = arith.addf %85, %88 : vector<8x16x16xf32>
      %90 = arith.truncf %89 : vector<8x16x16xf32> to vector<8x16x16xbf16>
      %c0_48 = arith.constant 0 : index
      %c0_49 = arith.constant 0 : index
      %c0_50 = arith.constant 0 : index
      %c0_51 = arith.constant 0 : index
      %91 = vector.load %arg7[%c0_48, %c0_49, %c0_50, %c0_51] : memref<1x8x16x16xbf16, #tpu.memory_space<vmem>>, vector<1x8x16x16xbf16>
      %92 = vector.shape_cast %91 : vector<1x8x16x16xbf16> to vector<8x16x16xbf16>
      %93 = vector.shape_cast %90 : vector<8x16x16xbf16> to vector<1x8x16x16xbf16>
      tpu.vector_store %arg7[%c0_48, %c0_49, %c0_50, %c0_51], %93 {strides = array<i32>} : memref<1x8x16x16xbf16, #tpu.memory_space<vmem>>, vector<1x8x16x16xbf16>,
    } else {
    }
    return
  }
  func.func @transform_0(%arg0: i32, %arg1: i32, %arg2: i32) -> (i32, i32, i32, i32) {
    %0 = arith.addi %arg1, %arg2 : i32
    %c2_i32 = arith.constant 2 : i32
    %c0_i32 = arith.constant 0 : i32
    %1 = arith.cmpi eq, %c2_i32, %c0_i32 : i32
    %c1_i32 = arith.constant 1 : i32
    %2 = arith.select %1, %c1_i32, %c2_i32 : i32
    %3 = arith.remsi %0, %2 : i32
    %c0_i32_0 = arith.constant 0 : i32
    %4 = arith.cmpi ne, %3, %c0_i32_0 : i32
    %c0_i32_1 = arith.constant 0 : i32
    %5 = arith.cmpi slt, %3, %c0_i32_1 : i32
    %c0_i32_2 = arith.constant 0 : i32
    %6 = arith.cmpi slt, %2, %c0_i32_2 : i32
    %7 = arith.xori %5, %6 : i1
    %8 = arith.andi %7, %4 : i1
    %9 = arith.addi %3, %2 : i32
    %10 = arith.select %8, %9, %3 : i32
    %c0_i32_3 = arith.constant 0 : i32
    %c0_i32_4 = arith.constant 0 : i32
    %c0_i32_5 = arith.constant 0 : i32
    return %arg0, %10, %c0_i32_3, %c0_i32_4 : i32, i32, i32, i32
  }
  func.func @transform_1(%arg0: i32, %arg1: i32, %arg2: i32) -> (i32, i32) {
    %c0_i32 = arith.constant 0 : i32
    %c0_i32_0 = arith.constant 0 : i32
    %c0_i32_1 = arith.constant 0 : i32
    return %c0_i32, %c0_i32_0 : i32, i32
  }
  func.func @transform_2(%arg0: i32, %arg1: i32, %arg2: i32) -> (i32, i32) {
    %c0_i32 = arith.constant 0 : i32
    %c0_i32_0 = arith.constant 0 : i32
    %c0_i32_1 = arith.constant 0 : i32
    return %c0_i32, %c0_i32_0 : i32, i32
  }
  func.func @transform_3(%arg0: i32, %arg1: i32, %arg2: i32) -> (i32, i32) {
    %c0_i32 = arith.constant 0 : i32
    %c0_i32_0 = arith.constant 0 : i32
    %c0_i32_1 = arith.constant 0 : i32
    return %c0_i32, %c0_i32_0 : i32, i32
  }
  func.func @transform_4(%arg0: i32, %arg1: i32, %arg2: i32) -> (i32, i32, i32, i32) {
    %c0_i32 = arith.constant 0 : i32
    %c0_i32_0 = arith.constant 0 : i32
    %c0_i32_1 = arith.constant 0 : i32
    return %arg0, %arg1, %c0_i32, %c0_i32_0 : i32, i32, i32, i32
  }
}

</mosaic_0001>

<bundles_post_ra>
// kernel: tpu_custom_call.1
= control target key start
LH: loop header
LB: loop body
LE: loop exit
PB: predicated region body
PF: predicated region fallthrough
CT: control target
= control target key end

     0   :  { %s6110_s0 = inlined_call_operand.hbm [shape: bf16[2,16,16,16], index: 0, kind: input, shape index: {}]   ;;  %s6111_s1 = inlined_call_operand.hbm [shape: bf16[16,20], index: 1, kind: input, shape index: {}]   ;;  %s6112_s2 = inlined_call_operand.vmem [shape: f32[1,20], index: 2, kind: input, shape index: {}]   ;;  %s6113_s3 = inlined_call_operand.<no memory space> [shape: f32[1,1], index: 3, kind: input, shape index: {}]   ;;  %s6114_s4 = inlined_call_operand.hbm [shape: bf16[2,16,16,16], index: 4, kind: output, shape index: {}]  }
   0x1   :  { %6142 = sst [smem:[#allocation33_spill]] %s6111_s1 }
   0x2   :  { %6143 = sst [smem:[#allocation34_spill]] %s6112_s2 }
   0x3   :  { %6144 = sst [smem:[#allocation35_spill]] %s6114_s4 }
   0x4   :  { %9 = sst [smem:[#allocation6]] %s6113_s3 }
   0x5   :  { %10 = vsyncpa [#allocation8], 0 }
   0x6   :  { %12 = vsyncpa [#allocation8 + $0x1], 0 }
   0x7   :  { %13 = vsyncpa [#allocation11], 0 }
   0x8   :  { %14 = vsyncpa [#allocation9], 0 }
   0x9   :  { %16 = vsyncpa [#allocation9 + $0x1], 0  ;;  %s4612_s17 = smov 0   ;;  %s4614_s18 = smov 0  }
   0xa   :  { %s4616_s19 = smov 0   ;;  %s4618_s20 = smov 0  }
   0xb   :  { %s4620_s21 = smov 0   ;;  %s4622_s22 = smov 0  }
   0xc   :  { %s4624_s23 = smov 0   ;;  %s4626_s3 = smov 0  }
   0xd   :  { %s4628_s24 = smov 0   ;;  %s4630_s25 = smov 0  }
   0xe   :  { %s4632_s26 = smov 0   ;;  %s4634_s27 = smov 0  }
   0xf   :  { %s4636_s28 = smov 0  }
  0x10 LB: > { %6145 = sst [smem:[#allocation16_spill]] %s4522_s17  ;;  %s3957_s29 = sadd.s32 4294967295, %s4570_s28   ;;  %s4570_s28 = sphi %s4636_s28, %s22_s28   ;;  %s4566_s27 = sphi %s4634_s27, %s6204_s27   ;;  %s4562_s26 = sphi %s4632_s26, %s6203_s26   ;;  %s4558_s25 = sphi %s4630_s25, %s6193_s25   ;;  %s4554_s24 = sphi %s4628_s24, %s6202_s24   ;;  %s4550_s3 = sphi %s4626_s3, %s6192_s3   ;;  %s4546_s23 = sphi %s4624_s23, %s6191_s23   ;;  %s4542_s22 = sphi %s4622_s22, %s6201_s22   ;;  %s4538_s21 = sphi %s4620_s21, %s6200_s21   ;;  %s4534_s20 = sphi %s4618_s20, %s6199_s20   ;;  %s4530_s19 = sphi %s4616_s19, %s6198_s19   ;;  %s4526_s18 = sphi %s4614_s18, %s6197_s18   ;;  %s4522_s17 = sphi %s4612_s17, %s6196_s17  }
  0x11   : > { %6146 = sst [smem:[#allocation17_spill]] %s4546_s23  ;;  %s3958_s30 = sadd.s32 4294967294, %s4570_s28  }
  0x12   : > { %6147 = sst [smem:[#allocation18_spill]] %s4554_s24  ;;  %p89_p0 = scmp.ne.s32.totalorder %s4538_s21, %s4534_s20 }
  0x13   : > { %6148 = sst [smem:[#allocation19_spill]] %s4558_s25  ;;  %p4678_p1 = scmp.eq.s32.totalorder %s3957_s29, 0 }
  0x14   : > { %6149 = sst [smem:[#allocation20_spill]] %s4562_s26  ;;  %p177_p2 = scmp.ne.s32.totalorder %s4530_s19, %s4526_s18 }
  0x15   : > { %p178_p3 = scmp.eq.s32.totalorder %s3957_s29, 7  ;;  %p4686_p4 = por %p4678_p1, %p89_p0 }
  0x16   : > { %p183_p5 = scmp.ne.s32.totalorder %s4526_s18, %s4522_s17  ;;  %p184_p7 = scmp.eq.s32.totalorder %s3958_s30, 7 }
  0x17   : > { %p4692_p6 = por %p178_p3, %p177_p2  ;;  %p3965_p8 = scmp.ge.s32.totalorder %s4570_s28, 1 }
  0x18   : > { %p191_p9 = scmp.lt.s32.totalorder %s4570_s28, 9  ;;  %p4698_p10 = por %p184_p7, %p183_p5 }
  0x19   : > { %s6152_s7 = scalar_select %p4692_p6, 1, 0 }
  0x1a   : > { %s6154_s8 = scalar_select %p4698_p10, 1, 0 }
  0x1b   : > { %6153 = sst [smem:[#allocation21_spill]] %s6152_s7  ;;  %p4702_p11 = pnand %p3965_p8, %p191_p9 }
  0x1c   : > { %6155 = sst [smem:[#allocation22_spill]] %s6154_s8  ;;  %s4572_s13 = smov [#allocation10]  }
  0x1d   : > { %s6157_s1 = sld [smem:[#allocation33_spill]]  ;;  %p4156_p12 = pneg %p4702_p11 }
  0x1e   : > { %s204_s14 = sshll.u32 %s4572_s13, 4  ;;  %s6116_s15 = smov 64   ;;  %s205_s14 = int_to_ptr.vmem [resolvable:$true] %s204_s14 }
  0x1f   : > { %p4157_p13 = pnand %p4156_p12, %p4678_p1  ;;  %s6117_s16 = smov 4  }
  0x20   : > { %s34_s20 = sadd.s32 1, %s4558_s25  ;;  %s37_s29 = sadd.s32 1, %s4562_s26 }
  0x21   : > { %p35_p0 = scmp.ge.s32.totalorder %s34_s20, 2  ;;  %s41_s30 = sadd.s32 1, %s4566_s27 }
  0x22   : > { %s45_s10 = sadd.s32 %s4558_s25, %s4562_s26  ;;  %p83_p3 = scmp.ne.s32.totalorder %s4542_s22, %s4538_s21 }
  0x23   : > { %s202_s12 = sshll.u32 %s6157_s1, 4  ;;  %s6206_s20 = smov (%p35_p0, %s34_s20), 0  ;;  %s203_s12 = int_to_ptr.hbm [resolvable:$true] %s202_s12 }
  0x24   : > { %4159 = dma.hbm_to_vmem [thread:$0]  (!%p4157_p13), %s203_s12, 128, %s205_s14, [#allocation11], %s6116_s15, %s6116_s15, %s6117_s16  }
  0x25   : > { %6158 = sst [smem:[#allocation23_spill]] %s6206_s20  ;;  %s6208_s29 = smov (!%p35_p0, %s37_s29), %s4562_s26 }
  0x26   : > { %s47_s11 = ssub.s32 0, %s45_s10  ;;  %p39_p2 = scmp.ge.s32.totalorder %s6208_s29, 2 }
  0x27   : > { %s3959_s1 = smin.u32 %s47_s11, %s45_s10  ;;  %p84_p8 = scmp.eq.s32.totalorder %s4570_s28, 0 }
  0x28   : > { %s49_s8 = sand.u32 1, %s3959_s1   ;;  %s6210_s29 = smov (%p39_p2, %s6208_s29), 0 }
  0x29   : > { %6159 = sst [smem:[#allocation24_spill]] %s6210_s29  ;;  %s6212_s30 = smov (!%p39_p2, %s41_s30), %s4566_s27 }
  0x2a   : > { %p43_p5 = scmp.ge.s32.totalorder %s6212_s30, 2  ;;  %s58_s12 = sadd.s32 %s6210_s29, %s6206_s20 }
  0x2b   : > { %p3961_p7 = scmp.lt.s32.totalorder %s49_s8, 0  ;;  %s56_s14 = sadd.s32 2, %s49_s8 }
  0x2c   : > { %s6214_s30 = smov (%p43_p5, %s6212_s30), 0  ;;  %s60_s10 = ssub.s32 0, %s58_s12 }
  0x2d   : > { %6160 = sst [smem:[#allocation25_spill]] %s6214_s30  ;;  %s6216_s14 = smov (!%p3961_p7, %s56_s14), %s49_s8 }
  0x2e   : > { %s3962_s1 = smin.u32 %s60_s10, %s58_s12  ;;  %s71_s11 = ssub.s32 %s4566_s27, %s6214_s30 }
  0x2f   : > { %s62_s15 = sand.u32 1, %s3962_s1   ;;  %s163_s16 = ssub.s32 %s4562_s26, %s6210_s29 }
  0x30   : > { %s164_s13 = sor.u32 %s163_s16, %s71_s11  ;;  %s167_s20 = sadd.s32 1, %s4530_s19 }
  0x31   : > { %p3964_p9 = scmp.lt.s32.totalorder %s62_s15, 0  ;;  %s69_s25 = sadd.s32 2, %s62_s15 }
  0x32   : > { %p4743_p12 = por %p84_p8, %p83_p3  ;;  %p165_p13 = scmp.eq.s32.totalorder %s164_s13, 0 }
  0x33   : > { %s6218_s25 = smov (!%p3964_p9, %s69_s25), %s62_s15  ;;  %s224_s10 = sand.u32 1, %s4542_s22  }
  0x34   : > { %s4748_s8 = scalar_select %p165_p13, %s4530_s19, %s167_s20  }
  0x35   : > { %s72_s12 = ssub.s32 %s6216_s14, %s6218_s25  ;;  %p4169_p0 = scmp.lt.s32.totalorder %s4570_s28, 8 }
  0x36   : > { %s73_s1 = sor.u32 %s72_s12, %s71_s11  ;;  %s3968_s16 = sshll.u32 %s224_s10, 6 }
  0x37   : > { %p74_p2 = scmp.eq.s32.totalorder %s73_s1, 0  ;;  %s4094_s30 = sshll.u32 %s6216_s14, 4 }
  0x38   : > { %s6162_s29 = sadd.s32 1, %s4542_s22  ;;  %s3974_s4 = sshll.u32 %s4566_s27, 5 }
  0x39   : > { %s4755_s26 = scalar_select %p74_p2, %s4542_s22, %s6162_s29  }
  0x3a   : > { %s228_s7 = scalar_lea.vmem [#allocation7], %s3968_s16  ;;  %s247_s2 = sadd.s32 %s4094_s30, %s3974_s4 }
  0x3b   : > { %s252_s24 = sshll.u32 %s228_s7, 4  ;;  %s3975_s23 = sshll.u32 %s247_s2, 2  ;;  %s253_s24 = int_to_ptr.vmem [resolvable:$true] %s252_s24 }
  0x3c   : > { %p4760_p3 = pnand %p4169_p0, %p4743_p12  ;;  %s249_s13 = scalar_lea.hbm %s6110_s0, %s3975_s23 }
  0x3d   : > { %s250_s14 = sshll.u32 %s249_s13, 4  ;;  %s225_s29 = scalar_lea.sflag [#allocation8], %s224_s10  ;;  %s251_s14 = int_to_ptr.hbm [resolvable:$true] %s250_s14 }
  0x3e   : > { %s4398_s11 = sshra.s32 %s251_s14, 4  ;;  %p4402_p7 = pneg %p4760_p3  ;;  %s4399_s11 = int_to_ptr.hbm [resolvable:$true] %s4398_s11 }
  0x3f   : > { %s4400_s12 = scalar_lea.hbm %s4399_s11, 64  ;;  %s4405_s17 = scalar_lea.hbm %s6110_s0, 256 }
  0x40   : > { %p4401_p5 = scmp.ne.s32.totalorder %s4399_s11, %s4400_s12  ;;  %p4406_p12 = scmp.lt.s32.totalorder %s4399_s11, %s6110_s0 }
  0x41   : > { %p4407_p13 = scmp.lt.s32.totalorder %s4405_s17, %s4400_s12 }
  0x42   : > { %p4403_p8 = pnand %p4402_p7, %p4401_p5 }
  0x43   : > { %p4408_p0 = por %p4407_p13, %p4406_p12 }
  0x44   : > { %p4404_p9 = pneg %p4403_p8 }
  0x46   : > { %p4409_p2 = pnand %p4408_p0, %p4404_p9 }
  0x48   : > { %4412 = shalt.err (!%p4409_p2)
}
  0x49   : > { %s6164_s23 = smov 4   ;;  %s6165_s10 = smov 64  }
  0x4a   : > { %4163 = dma.hbm_to_vmem [thread:$0]  (!%p4760_p3), %s251_s14, 1024, %s253_s24, %s225_s29, %s6165_s10, %s6165_s10, %s6164_s23  }
  0x4b   : > { %264 = sbr.rel (%p4702_p11) target bundleno = 2150 (0x866), region = 36 }
  0x50   : > { %s266_s1 = sand.u32 1, %s4538_s21  }
  0x51   : > { %s3977_s16 = sshll.u32 %s266_s1, 6  ;;  %s267_s25 = scalar_lea.sflag [#allocation8], %s266_s1 }
  0x52   : > { %s4783_s20 = scalar_lea.vmem [#allocation7], %s3977_s16 }
  0x53   : > { %4509 = dma.done.wait (%p4686_p4), %s267_s25, 1024  }
  0x54   : > { %4511 = vsyncadd (%p4686_p4), %s267_s25, 4294966272 }
  0x55   : > { %4513 = dma.done.wait (%p4678_p1), [#allocation11], 128  }
  0x56   : > { %4515 = vsyncadd (%p4678_p1), [#allocation11], 4294967168  ;;  %s6166_s24 = sld [smem:[#allocation17_spill]]  ;;  %s298_s9 = sand.u32 1, %s4526_s18   ;;  %v4801_v0 = vld [vmem:[%s4783_s20] sm:$0xf] }
  0x57   : > { %s4798_s15 = sshll.u32 %s298_s9, 6  ;;  %v4804_v1 = vld [vmem:[%s4783_s20 + $0x4] sm:$0xf]  ;;  %v4807_v2 = vld [vmem:[%s4783_s20 + $0x8] sm:$0xf]  ;;  %v4854_v18 = vld [vmem:[%s4783_s20 + $0x10] sm:$0xff] }
  0x58   : > { %v4810_v3 = vld [vmem:[%s4783_s20 + $0xc] sm:$0xf]  ;;  %v4813_v4 = vld [vmem:[%s4783_s20 + $0x10] sm:$0xf]  ;;  %v4816_v5 = vld [vmem:[%s4783_s20 + $0x14] sm:$0xf] }
  0x59   : > { %v4819_v6 = vld [vmem:[%s4783_s20 + $0x18] sm:$0xf]  ;;  %v4822_v7 = vld [vmem:[%s4783_s20 + $0x1c] sm:$0xf]  ;;  %v4825_v8 = vld [vmem:[%s4783_s20 + $0x20] sm:$0xf] }
  0x5a   : > { %v4828_v9 = vld [vmem:[%s4783_s20 + $0x24] sm:$0xf]  ;;  %v4831_v10 = vld [vmem:[%s4783_s20 + $0x28] sm:$0xf]  ;;  %v4834_v11 = vld [vmem:[%s4783_s20 + $0x2c] sm:$0xf] }
  0x5b   : > { %v4837_v12 = vld [vmem:[%s4783_s20 + $0x30] sm:$0xf]  ;;  %v4840_v13 = vld [vmem:[%s4783_s20 + $0x34] sm:$0xf]  ;;  %v4843_v14 = vld [vmem:[%s4783_s20 + $0x38] sm:$0xf] }
  0x5c   : > { %s317_s6 = sadd.s32 %s6166_s24, %s4550_s3  ;;  %v4846_v15 = vld [vmem:[%s4783_s20 + $0x3c] sm:$0xf]  ;;  %v4848_v16 = vld [vmem:[#allocation10] sm:$0xff]  ;;  %vm398_vm0 = vcmask 130048   ;;  %v4864_v20 = vld [vmem:[%s4783_s20 + $0x30] sm:$0xff]  ;;  %s6167_s4 = sld [smem:[#allocation34_spill]] }
  0x5d   : > { %s319_s5 = ssub.s32 0, %s317_s6  ;;  %p318_p1 = scmp.lt.s32.totalorder %s317_s6, 0  ;;  %v4851_v17 = vld [vmem:[%s4783_s20] sm:$0xff]  ;;  %430 = vmatpush.bf16.msra.mxu0 %v4848_v16  ;;  %4144 = vmatpush.bf16.msra.mxu1 %v4848_v16  ;;  %v4877_v21 = vld [vmem:[%s4783_s20 + $0x8] sm:$0xff]  ;;  %v4880_v22 = vld [vmem:[%s4783_s20 + $0x18] sm:$0xff] }
  0x5e   : > { %s3980_s13 = smin.u32 %s319_s5, %s317_s6  ;;  %v4861_v19 = vld [vmem:[%s4783_s20 + $0x20] sm:$0xff]  ;;  %4145 = vmatpush.bf16.msra.mxu2 %v4848_v16  ;;  %4146 = vmatpush.bf16.msra.mxu3 %v4848_v16  ;;  %v4883_v23 = vld [vmem:[%s4783_s20 + $0x28] sm:$0xff]  ;;  %v4886_v24 = vld [vmem:[%s4783_s20 + $0x38] sm:$0xff]  ;;  %s4932_s17 = scalar_lea.vmem [#allocation12], %s4798_s15 }
  0x5f   : > { %s321_s14 = sand.u32 1, %s3980_s13   ;;  %p4027_p11 = scmp.ne.s32.totalorder %s6166_s24, 0 }
  0x60   : > { %s322_s29 = ssub.s32 0, %s321_s14  ;;  %4019 = vmatmul.msk.bf16.vlgmr.msra.gmra.mxu0 %vm398_vm0, %v4851_v17  ;;  %4021 = vmatmul.msk.bf16.vlgmr.msra.gmra.mxu1 %vm398_vm0, %v4854_v18  ;;  %s4575_s7 = smov (!%p4027_p11), 110  }
  0x61   : > { %s6220_s29 = smov (!%p318_p1, %s322_s29), %s321_s14  ;;  %4023 = vmatmul.msk.bf16.vlgmr.msra.gmra.mxu2 %vm398_vm0, %v4861_v19  ;;  %4025 = vmatmul.msk.bf16.vlgmr.msra.gmra.mxu3 %vm398_vm0, %v4864_v20  ;;  %s4576_s30 = smov (!%p4027_p11), 112  }
  0x62   : > { %p3982_p4 = scmp.lt.s32.totalorder %s6220_s29, 0  ;;  %s328_s11 = sadd.s32 2, %s6220_s29  ;;  %v4289_v25 = vld [vmem:[%s6167_s4] ss:$0 sm:$0xff] }
  0x64   : > { %s6222_s11 = smov (!%p3982_p4, %s328_s11), %s6220_s29 }
  0x70   : > { %4020 = vmatmul.msk.bf16.gmra.mxu0 %vm398_vm0, %v4877_v21  ;;  %4022 = vmatmul.msk.bf16.gmra.mxu1 %vm398_vm0, %v4880_v22 }
  0x71   : > { %4024 = vmatmul.msk.bf16.gmra.mxu2 %vm398_vm0, %v4883_v23  ;;  %4026 = vmatmul.msk.bf16.gmra.mxu3 %vm398_vm0, %v4886_v24 }
  0xdd   : > { %v432_v26 = vpop.f32.mrf.mxu0  ;;  %v442_v27 = vpop.f32.mrf.mxu1 }
  0xde   : > { %v433_v28 = vadd.f32 %v4289_v25, %v432_v26  ;;  %v443_v29 = vadd.f32 %v4289_v25, %v442_v27 }
  0xe0   : > { %v4899_v30 = vpack.c.bf16 %v433_v28, %v433_v28  ;;  %v4901_v31 = vpack.c.bf16 %v443_v29, %v443_v29 }
  0xe4   : > { %v452_v32 = vpop.f32.mrf.mxu2  ;;  %v462_v33 = vpop.f32.mrf.mxu3 }
  0xe5   : > { %v453_v34 = vadd.f32 %v4289_v25, %v452_v32  ;;  %v463_v35 = vadd.f32 %v4289_v25, %v462_v33  ;;  %v434_v36 = vpop.f32.mrf.mxu0  ;;  %v444_v37 = vpop.f32.mrf.mxu1 }
  0xe6   : > { %v435_v38 = vadd.f32 %v4289_v25, %v434_v36  ;;  %v445_v39 = vadd.f32 %v4289_v25, %v444_v37 }
  0xe7   : > { %v4903_v40 = vpack.c.bf16 %v453_v34, %v453_v34  ;;  %v4905_v41 = vpack.c.bf16 %v463_v35, %v463_v35 }
  0xe8   : > { %v4907_v42 = vpack.c.bf16 %v435_v38, %v435_v38  ;;  %v4909_v43 = vpack.c.bf16 %v445_v39, %v445_v39 }
  0xea   : > { %6168 = vst [vmem:[#allocation26_spill] sm:$0xff] %v4907_v42 }
  0xeb   : > { %6169 = vst [vmem:[#allocation27_spill] sm:$0xff] %v4909_v43 }
  0xec   : > { %v454_v44 = vpop.f32.mrf.mxu2  ;;  %v464_v45 = vpop.f32.mrf.mxu3 }
  0xed   : > { %v455_v46 = vadd.f32 %v4289_v25, %v454_v44  ;;  %v465_v47 = vadd.f32 %v4289_v25, %v464_v45  ;;  %v437_v48 = vpop.f32.mrf.mxu0  ;;  %v447_v49 = vpop.f32.mrf.mxu1 }
  0xee   : > { %v438_v50 = vadd.f32 %v4289_v25, %v437_v48  ;;  %v448_v51 = vadd.f32 %v4289_v25, %v447_v49 }
  0xef   : > { %v4911_v52 = vpack.c.bf16 %v455_v46, %v455_v46  ;;  %v4913_v53 = vpack.c.bf16 %v465_v47, %v465_v47 }
  0xf0   : > { %v4915_v54 = vpack.c.bf16 %v438_v50, %v438_v50  ;;  %v4917_v55 = vpack.c.bf16 %v448_v51, %v448_v51 }
  0xf1   : > { %6170 = vst [vmem:[#allocation28_spill] sm:$0xff] %v4911_v52 }
  0xf4   : > { %v457_v56 = vpop.f32.mrf.mxu2  ;;  %v467_v57 = vpop.f32.mrf.mxu3 }
  0xf5   : > { %v458_v58 = vadd.f32 %v4289_v25, %v457_v56  ;;  %v468_v59 = vadd.f32 %v4289_v25, %v467_v57  ;;  %v439_v60 = vpop.f32.mrf.mxu0  ;;  %v449_v61 = vpop.f32.mrf.mxu1 }
  0xf6   : > { %v440_v62 = vadd.f32 %v4289_v25, %v439_v60  ;;  %v450_v63 = vadd.f32 %v4289_v25, %v449_v61 }
  0xf7   : > { %v4919_v26 = vpack.c.bf16 %v458_v58, %v458_v58  ;;  %v4921_v27 = vpack.c.bf16 %v468_v59, %v468_v59 }
  0xf8   : > { %v4923_v28 = vpack.c.bf16 %v440_v62, %v440_v62  ;;  %v4925_v29 = vpack.c.bf16 %v450_v63, %v450_v63 }
  0xfa   : > { %6171 = vst [vmem:[#allocation29_spill] sm:$0xff] %v4923_v28 }
  0xfb   : > { %6172 = vst [vmem:[#allocation30_spill] sm:$0xff] %v4925_v29 }
  0xfc   : > { %v459_v32 = vpop.f32.mrf.mxu2  ;;  %v469_v33 = vpop.f32.mrf.mxu3 }
  0xfd   : > { %v460_v34 = vadd.f32 %v4289_v25, %v459_v32  ;;  %v470_v35 = vadd.f32 %v4289_v25, %v469_v33 }
  0xfe   : > { %491 = sbr.rel (%p4027_p11) target bundleno = 1174 (0x496), region = 48 }
  0xff   : > { %v4927_v36 = vpack.c.bf16 %v460_v34, %v460_v34  ;;  %v4929_v37 = vpack.c.bf16 %v470_v35, %v470_v35 }
 0x101   : > { %6173 = vst [vmem:[#allocation31_spill] sm:$0xff] %v4927_v36 }
 0x102   : > { %6174 = vst [vmem:[#allocation32_spill] sm:$0xff] %v4929_v37 }
 0x103   : > { %492 = vrot.lane.b32.xlu0 %v4848_v16, %s4575_s7  ;;  %v570_v38 = vunpack.c.l.b16 %v4899_v30  ;;  %v571_v39 = vunpack.c.l.b16 %v4907_v42  ;;  %v603_v46 = vunpack.c.l.b16 %v4915_v54  ;;  %v604_v47 = vunpack.c.l.b16 %v4923_v28 }
 0x104   : > { %v636_v48 = vunpack.c.l.b16 %v4909_v43  ;;  %v731_v50 = vunpack.c.l.b16 %v4919_v26  ;;  %v732_v51 = vunpack.c.l.b16 %v4927_v36  ;;  %v796_v59 = vunpack.c.l.b16 %v4929_v37 }
 0x105   : > { %v4938_v44 = vpack.c.b16 %v571_v39, %v570_v38  ;;  %v4948_v16 = vpack.c.b16 %v604_v47, %v603_v46  ;;  %v763_v61 = vunpack.c.l.b16 %v4905_v41  ;;  %v764_v62 = vunpack.c.l.b16 %v4913_v53 }
 0x106   : > { %v4974_v58 = vpack.c.b16 %v732_v51, %v731_v50  ;;  %vm575_vm1 = vcmask 15360   ;;  %vm1165_vm2 = vcmask 1047556   ;;  %vm1341_vm3 = vcmask 11264  }
 0x107   : > { %573 = vrot.lane.b32.xlu1 %v4938_v44, %s4576_s30  ;;  %v4994_v63 = vpack.c.b16 %v764_v62, %v763_v61  ;;  %vm1379_vm4 = vcmask 130112   ;;  %vm1402_vm5 = vcmask 1041409   ;;  %vm1404_vm6 = vcmask 1042434  }
 0x108   : > { %vm1406_vm7 = vcmask 1043459   ;;  %vm1408_vm8 = vcmask 1044484   ;;  %vm1410_vm9 = vcmask 1045509   ;;  %vm1412_vm10 = vcmask 1046534  }
 0x109   : > { %vm1414_vm11 = vcmask 1047559   ;;  %vm1449_vm12 = vcmask 64512   ;;  %vm1758_vm13 = vcmask 125952  }
 0x10a   : > { %1759 = vst.msk [vmem:[%s4932_s17] sm:$0xf] %vm1758_vm13, %v4801_v0 }
 0x10b   : > { %495 = vrot.lane.b32.xlu0 %v4289_v25, %s4575_s7  ;;  %v635_v25 = vunpack.c.l.b16 %v4901_v31  ;;  %1760 = vst.msk [vmem:[%s4932_s17 + $0x4] sm:$0xf] %vm1758_vm13, %v4804_v1 }
 0x10c   : > { %1761 = vst.msk [vmem:[%s4932_s17 + $0x8] sm:$0xf] %vm1758_vm13, %v4807_v2 }
 0x10d   : > { %v4958_v49 = vpack.c.b16 %v636_v48, %v635_v25  ;;  %1762 = vst.msk [vmem:[%s4932_s17 + $0xc] sm:$0xf] %vm1758_vm13, %v4810_v3 }
 0x10e   : > { %1763 = vst.msk [vmem:[%s4932_s17 + $0x10] sm:$0xf] %vm1758_vm13, %v4813_v4 }
 0x10f   : > { %606 = vrot.lane.b32.xlu1 %v4948_v16, %s4576_s30  ;;  %638 = vrot.lane.b32.xlu2 %v4958_v49, %s4576_s30  ;;  %1764 = vst.msk [vmem:[%s4932_s17 + $0x14] sm:$0xf] %vm1758_vm13, %v4816_v5 }
 0x110   : > { %1765 = vst.msk [vmem:[%s4932_s17 + $0x18] sm:$0xf] %vm1758_vm13, %v4819_v6 }
 0x111   : > { %1766 = vst.msk [vmem:[%s4932_s17 + $0x1c] sm:$0xf] %vm1758_vm13, %v4822_v7 }
 0x112   : > { %1767 = vst.msk [vmem:[%s4932_s17 + $0x20] sm:$0xf] %vm1758_vm13, %v4825_v8 }
 0x113   : > { %1768 = vst.msk [vmem:[%s4932_s17 + $0x24] sm:$0xf] %vm1758_vm13, %v4828_v9 }
 0x114   : > { %1769 = vst.msk [vmem:[%s4932_s17 + $0x28] sm:$0xf] %vm1758_vm13, %v4831_v10 }
 0x115   : > { %1770 = vst.msk [vmem:[%s4932_s17 + $0x2c] sm:$0xf] %vm1758_vm13, %v4834_v11 }
 0x116   : > { %1771 = vst.msk [vmem:[%s4932_s17 + $0x30] sm:$0xf] %vm1758_vm13, %v4837_v12 }
 0x117   : > { %734 = vrot.lane.b32.xlu1 %v4974_v58, %s4576_s30  ;;  %1772 = vst.msk [vmem:[%s4932_s17 + $0x34] sm:$0xf] %vm1758_vm13, %v4840_v13 }
 0x118   : > { %1773 = vst.msk [vmem:[%s4932_s17 + $0x38] sm:$0xf] %vm1758_vm13, %v4843_v14 }
 0x119   : > { %1774 = vst.msk [vmem:[%s4932_s17 + $0x3c] sm:$0xf] %vm1758_vm13, %v4846_v15 }
 0x169   : > { %v639_v39 = vpop.permute.xlu2 %638 }
 0x16a   : > { %v644_v47 = vsel %vm575_vm1, %v639_v39, 0 }
 0x16b   : > { %653 = vmatpush.bf16.xpose.msra.mxu3 %v644_v47 }
 0x175   : > { %v493_v45 = vpop.permute.xlu0 %492 }
 0x176   : > { %505 = vmatpush.bf16.msra.mxu0 %v493_v45  ;;  %4147 = vmatpush.bf16.msra.mxu2 %v493_v45 }
 0x179   : > { %4028 = vmatmul.msk.bf16.vlgmr.msra.gmra.mxu0 %vm398_vm0, %v4851_v17  ;;  %4035 = vmatmul.msk.bf16.vlgmr.msra.gmra.mxu2 %vm398_vm0, %v4886_v24  ;;  %v699_v17 = vunpack.c.l.b16 %v4903_v40  ;;  %v700_v24 = vunpack.c.l.b16 %v4911_v52 }
 0x17b   : > { %v4970_v56 = vpack.c.b16 %v700_v24, %v699_v17 }
 0x17d   : > { %702 = vrot.lane.b32.xlu0 %v4970_v56, %s4576_s30  ;;  %v5002_v35 = vpop.permute.xlu0 %495 }
 0x189   : > { %4029 = vmatmul.msk.bf16.gmra.mxu0 %vm398_vm0, %v4877_v21  ;;  %v667_v21 = vunpack.c.l.b16 %v4917_v55 }
 0x199   : > { %4030 = vmatmul.msk.bf16.gmra.mxu0 %vm398_vm0, %v4854_v18  ;;  %v668_v18 = vunpack.c.l.b16 %v4925_v29 }
 0x19b   : > { %v4972_v57 = vpack.c.b16 %v668_v18, %v667_v21 }
 0x19d   : > { %670 = vrot.lane.b32.xlu2 %v4972_v57, %s4576_s30 }
 0x1a5   : > { %766 = vrot.lane.b32.xlu2 %v4994_v63, %s4576_s30 }
 0x1a9   : > { %4031 = vmatmul.msk.bf16.gmra.mxu0 %vm398_vm0, %v4880_v22  ;;  %v795_v22 = vunpack.c.l.b16 %v4921_v27 }
 0x1ab   : > { %v4986_v60 = vpack.c.b16 %v796_v59, %v795_v22 }
 0x1ad   : > { %798 = vrot.lane.b32.xlu0 %v4986_v60, %s4576_s30 }
 0x1b9   : > { %4032 = vmatmul.msk.bf16.gmra.mxu0 %vm398_vm0, %v4861_v19  ;;  %v574_v19 = vpop.permute.xlu1 %573 }
 0x1ba   : > { %v580_v32 = vsel %vm575_vm1, %v574_v19, 0 }
 0x1bb   : > { %589 = vmatpush.bf16.xpose.msra.mxu1 %v580_v32 }
 0x1c1   : > { %v607_v33 = vpop.permute.xlu1 %606 }
 0x1c9   : > { %4033 = vmatmul.msk.bf16.gmra.mxu0 %vm398_vm0, %v4883_v23  ;;  %v612_v23 = vsel %vm575_vm1, %v607_v33, 0 }
 0x1ca   : > { %621 = vmatpush.bf16.xpose.msrb.mxu2 %v612_v23 }
 0x1d9   : > { %4034 = vmatmul.msk.bf16.gmra.mxu0 %vm398_vm0, %v4864_v20 }
 0x1ef   : > { %v703_v39 = vpop.permute.xlu0 %702 }
 0x1f0   : > { %v708_v47 = vsel %vm575_vm1, %v703_v39, 0 }
 0x1f1   : > { %717 = vmatpush.bf16.xpose.msra.mxu2 %v708_v47 }
 0x1f6   : > { %v507_v34 = vpop.f32.mrf.mxu0 }
 0x1f7   : > { %v508_v38 = vadd.f32 %v507_v34, %v5002_v35  ;;  %v671_v51 = vpop.permute.xlu2 %670 }
 0x1f8   : > { %v676_v61 = vsel %vm575_vm1, %v671_v51, 0 }
 0x1f9   : > { %v5006_v46 = vpack.c.bf16 %v508_v38, %v508_v38  ;;  %685 = vmatpush.bf16.xpose.msrb.mxu1 %v676_v61 }
 0x1fb   : > { %v565_v17 = vunpack.c.l.b16 %v5006_v46 }
 0x1fe   : > { %v509_v45 = vpop.f32.mrf.mxu0 }
 0x1ff   : > { %v510_v20 = vadd.f32 %v509_v45, %v5002_v35 }
 0x201   : > { %v5009_v25 = vpack.c.bf16 %v510_v20, %v510_v20 }
 0x203   : > { %v566_v48 = vunpack.c.l.b16 %v5009_v25 }
 0x205   : > { %v567_v24 = vpack.c.b16 %v566_v48, %v565_v17 }
 0x206   : > { %v512_v21 = vpop.f32.mrf.mxu0 }
 0x207   : > { %4036 = vmatmul.msk.bf16.vlgmr.msra.gmra.mxu1 %vm575_vm1, %v567_v24  ;;  %v513_v18 = vadd.f32 %v512_v21, %v5002_v35 }
 0x209   : > { %v5015_v22 = vpack.c.bf16 %v513_v18, %v513_v18 }
 0x20b   : > { %v598_v19 = vunpack.c.l.b16 %v5015_v22 }
 0x20e   : > { %v514_v50 = vpop.f32.mrf.mxu0 }
 0x20f   : > { %v515_v59 = vadd.f32 %v514_v50, %v5002_v35 }
 0x211   : > { %v5019_v62 = vpack.c.bf16 %v515_v59, %v515_v59  ;;  %v735_v59 = vpop.permute.xlu1 %734 }
 0x213   : > { %v599_v32 = vunpack.c.l.b16 %v5019_v62 }
 0x215   : > { %v600_v33 = vpack.c.b16 %v599_v32, %v598_v19  ;;  %v740_v32 = vsel %vm575_vm1, %v735_v59, 0 }
 0x216   : > { %v517_v23 = vpop.f32.mrf.mxu0  ;;  %749 = vmatpush.bf16.xpose.msrb.mxu3 %v740_v32 }
 0x217   : > { %4037 = vmatmul.msk.bf16.vlgmr.msrb.gmra.mxu2 %vm575_vm1, %v600_v33  ;;  %v518_v34 = vadd.f32 %v517_v23, %v5002_v35 }
 0x219   : > { %v5025_v45 = vpack.c.bf16 %v518_v34, %v518_v34 }
 0x21b   : > { %v630_v17 = vunpack.c.l.b16 %v5025_v45 }
 0x21e   : > { %v519_v38 = vpop.f32.mrf.mxu0 }
 0x21f   : > { %v520_v20 = vadd.f32 %v519_v38, %v5002_v35  ;;  %v799_v33 = vpop.permute.xlu0 %798 }
 0x220   : > { %v804_v23 = vsel %vm575_vm1, %v799_v33, 0 }
 0x221   : > { %v5029_v48 = vpack.c.bf16 %v520_v20, %v520_v20  ;;  %813 = vmatpush.bf16.xpose.msrb.mxu2 %v804_v23 }
 0x223   : > { %v631_v24 = vunpack.c.l.b16 %v5029_v48 }
 0x225   : > { %v632_v21 = vpack.c.b16 %v631_v24, %v630_v17  ;;  %v542_v24 = vpop.f32.mrf.mxu2 }
 0x226   : > { %v522_v18 = vpop.f32.mrf.mxu0 }
 0x227   : > { %4038 = vmatmul.msk.bf16.vlgmr.msra.gmra.mxu3 %vm575_vm1, %v632_v21  ;;  %v523_v50 = vadd.f32 %v522_v18, %v5002_v35 }
 0x228   : > { %996 = vmatpush.bf16.msra.mxu3 %v4938_v44 }
 0x229   : > { %v553_v61 = vpack.c.bf16 %v523_v50, %v523_v50 }
 0x22b   : > { %v662_v38 = vunpack.c.l.b16 %v553_v61 }
 0x22e   : > { %v524_v51 = vpop.f32.mrf.mxu0 }
 0x22f   : > { %v525_v19 = vadd.f32 %v524_v51, %v5002_v35  ;;  %v767_v51 = vpop.permute.xlu2 %766 }
 0x230   : > { %v772_v59 = vsel %vm575_vm1, %v767_v51, 0 }
 0x231   : > { %v5038_v34 = vpack.c.bf16 %v525_v19, %v525_v19  ;;  %v543_v19 = vadd.f32 %v542_v24, %v5002_v35  ;;  %781 = vmatpush.bf16.xpose.msra.mxu1 %v772_v59 }
 0x233   : > { %v663_v39 = vunpack.c.l.b16 %v5038_v34  ;;  %v561_v23 = vpack.c.bf16 %v543_v19, %v543_v19 }
 0x235   : > { %v664_v20 = vpack.c.b16 %v663_v39, %v662_v38  ;;  %v1199_v51 = vrot.slane %v561_v23, 4  ;;  %v790_v28 = vunpack.c.l.b16 %v561_v23 }
 0x236   : > { %v527_v47 = vpop.f32.mrf.mxu0 }
 0x237   : > { %4039 = vmatmul.msk.bf16.vlgmr.msrb.gmra.mxu1 %vm575_vm1, %v664_v20  ;;  %v528_v17 = vadd.f32 %v527_v47, %v5002_v35  ;;  %v4577_v47 = vmov 1983009808   ;;  %v1200_v19 = vsel %vm1165_vm2, %v1199_v51, %v553_v61 }
 0x239   : > { %v555_v18 = vpack.c.bf16 %v528_v17, %v528_v17  ;;  %1019 = vmatpush.bf16.msrb.mxu1 %v4948_v16  ;;  %v1168_v17 = vunpack.c.l.s4 %v4577_v47 }
 0x23b   : > { %v694_v32 = vunpack.c.l.b16 %v555_v18  ;;  %v5052_v59 = vunpack.c.0.s8 %v1168_v17  ;;  %v1164_v52 = vrot.slane %v555_v18, 4 }
 0x23d   : > { %v1166_v23 = vsel %vm1165_vm2, %v1164_v52, %v5006_v46 }
 0x23e   : > { %v529_v21 = vpop.f32.mrf.mxu0 }
 0x23f   : > { %v530_v50 = vadd.f32 %v529_v21, %v5002_v35  ;;  %v544_v21 = vpop.f32.mrf.mxu2 }
 0x241   : > { %v556_v44 = vpack.c.bf16 %v530_v50, %v530_v50  ;;  %v545_v50 = vadd.f32 %v544_v21, %v5002_v35  ;;  %v4578_v21 = vmov 1934713408  }
 0x242   : > { %v1182_v36 = vunpack.c.l.s4 %v4578_v21 }
 0x243   : > { %v695_v33 = vunpack.c.l.b16 %v556_v44 }
 0x244   : > { %v5061_v37 = vunpack.c.0.s8 %v1182_v36  ;;  %v1170_v36 = vperm.slane %v1166_v23, %v5052_v59 }
 0x245   : > { %v696_v38 = vpack.c.b16 %v695_v33, %v694_v32 }
 0x246   : > { %v532_v39 = vpop.f32.mrf.mxu0 }
 0x247   : > { %v533_v20 = vadd.f32 %v532_v39, %v5002_v35  ;;  %4040 = vmatmul.msk.bf16.vlgmr.msra.gmra.mxu2 %vm575_vm1, %v696_v38  ;;  %v562_v39 = vpack.c.bf16 %v545_v50, %v545_v50  ;;  %v1221_v50 = vrot.slane %v556_v44, 4 }
 0x248   : > { %1042 = vmatpush.bf16.msra.mxu2 %v4958_v49  ;;  %v1204_v49 = vperm.slane %v1200_v19, %v5052_v59 }
 0x249   : > { %v557_v24 = vpack.c.bf16 %v533_v20, %v533_v20  ;;  %v791_v42 = vunpack.c.l.b16 %v562_v39  ;;  %v1255_v43 = vrot.slane %v562_v39, 4  ;;  %v1222_v52 = vsel %vm1165_vm2, %v1221_v50, %v5009_v25 }
 0x24a   : > { %v1205_v51 = vrot.slane %v1204_v49, 4 }
 0x24b   : > { %v1193_v16 = vrot.slane %v557_v24, 4  ;;  %v726_v29 = vunpack.c.l.b16 %v557_v24 }
 0x24d   : > { %v1194_v32 = vsel %vm1165_vm2, %v1193_v16, %v5015_v22 }
 0x24e   : > { %v1198_v33 = vperm.slane %v1194_v32, %v5052_v59  ;;  %v534_v38 = vpop.f32.mrf.mxu0  ;;  %v792_v32 = vpack.c.b16 %v791_v42, %v790_v28  ;;  %v1256_v42 = vsel %vm1165_vm2, %v1255_v43, %v5038_v34  ;;  %v5083_v43 = vperm.slane %v1222_v52, %v5052_v59 }
 0x24f   : > { %v535_v47 = vadd.f32 %v534_v38, %v5002_v35  ;;  %v1179_v34 = vrot.slane %v1170_v36, 4 }
 0x250   : > { %v1207_v20 = vrot.slane %v1198_v33, 4  ;;  %v1206_v19 = vsel %vm1165_vm2, %v1205_v51, %v1198_v33  ;;  %v1235_v51 = vrot.slane %v5083_v43, 4 }
 0x251   : > { %v558_v17 = vpack.c.bf16 %v535_v47, %v535_v47  ;;  %v1212_v28 = vperm.slane %v1206_v19, %v5061_v37 }
 0x252   : > { %v1208_v22 = vsel %vm1165_vm2, %v1204_v49, %v1207_v20 }
 0x253   : > { %v727_v61 = vunpack.c.l.b16 %v558_v17  ;;  %v1249_v16 = vrot.slane %v558_v17, 4  ;;  %v1216_v18 = vperm.slane %v1208_v22, %v5061_v37  ;;  %v1282_v22 = vshrl.u32 %v1212_v28, 16 }
 0x255   : > { %v728_v38 = vpack.c.b16 %v727_v61, %v726_v29  ;;  %v1250_v24 = vsel %vm1165_vm2, %v1249_v16, %v5019_v62  ;;  %v1260_v62 = vperm.slane %v1256_v42, %v5052_v59  ;;  %v1219_v44 = vrot.slane %v1216_v18, 4 }
 0x256   : > { %v537_v21 = vpop.f32.mrf.mxu0  ;;  %v1254_v46 = vperm.slane %v1250_v24, %v5052_v59  ;;  %v1298_v19 = vshrl.u32 %v1216_v18, 16 }
 0x257   : > { %v538_v39 = vadd.f32 %v537_v21, %v5002_v35  ;;  %4041 = vmatmul.msk.bf16.vlgmr.msrb.gmra.mxu3 %vm575_vm1, %v728_v38  ;;  %4043 = vmatmul.msk.bf16.vlgmr.msrb.gmra.mxu2 %vm575_vm1, %v792_v32  ;;  %v1261_v20 = vrot.slane %v1260_v62, 4  ;;  %v1220_v17 = vsel %vm1165_vm2, 0, %v1219_v44 }
 0x258   : > { %1065 = vmatpush.bf16.msrb.mxu3 %v4972_v57  ;;  %1111 = vmatpush.bf16.msrb.mxu2 %v4974_v58  ;;  %v1217_v57 = vrot.slane %v1212_v28, 4  ;;  %v1263_v25 = vrot.slane %v1254_v46, 4 }
 0x259   : > { %v559_v29 = vpack.c.bf16 %v538_v39, %v538_v39  ;;  %v1306_v39 = vshrl.u32 %v1220_v17, 16 }
 0x25a   : > { %v1218_v50 = vsel %vm1165_vm2, 0, %v1217_v57  ;;  %v1264_v21 = vsel %vm1165_vm2, %v1260_v62, %v1263_v25 }
 0x25b   : > { %v1171_v33 = vrot.slane %v559_v29, 4 }
 0x25d   : > { %v1172_v58 = vsel %vm1165_vm2, %v1171_v33, %v5025_v45  ;;  %v1262_v45 = vsel %vm1165_vm2, %v1261_v20, %v1254_v46 }
 0x25e   : > { %v1176_v47 = vperm.slane %v1172_v58, %v5052_v59  ;;  %v539_v49 = vpop.f32.mrf.mxu0  ;;  %v1268_v33 = vperm.slane %v1262_v45, %v5061_v37  ;;  %v758_v58 = vunpack.c.l.b16 %v559_v29  ;;  %v1290_v45 = vshrl.u32 %v1218_v50, 16 }
 0x25f   : > { %v540_v61 = vadd.f32 %v539_v49, %v5002_v35 }
 0x260   : > { %v1177_v16 = vrot.slane %v1176_v47, 4  ;;  %v1180_v32 = vsel %vm1165_vm2, %v1176_v47, %v1179_v34 }
 0x261   : > { %v1188_v38 = vperm.slane %v1180_v32, %v5061_v37  ;;  %v560_v23 = vpack.c.bf16 %v540_v61, %v540_v61 }
 0x262   : > { %v1178_v24 = vsel %vm1165_vm2, %v1177_v16, %v1170_v36  ;;  %v1272_v36 = vperm.slane %v1264_v21, %v5061_v37 }
 0x263   : > { %v1184_v35 = vperm.slane %v1178_v24, %v5061_v37  ;;  %v1191_v42 = vrot.slane %v1188_v38, 4  ;;  %v1295_v52 = vpack.i.b16 %v1216_v18, %v1188_v38  ;;  %v1297_v44 = vshrl.u32 %v1188_v38, 16 }
 0x264   : > { %v759_v57 = vunpack.c.l.b16 %v560_v23  ;;  %v1227_v34 = vrot.slane %v560_v23, 4 }
 0x265   : > { %v1189_v46 = vrot.slane %v1184_v35, 4  ;;  %v1192_v47 = vsel %vm1165_vm2, 0, %v1191_v42  ;;  %v1279_v49 = vpack.i.b16 %v1212_v28, %v1184_v35  ;;  %v1281_v20 = vshrl.u32 %v1184_v35, 16  ;;  %1346 = vst.msk [vmem:[#allocation2 + $0x10] sm:$0xf] %vm1341_vm3, %v1295_v52 }
 0x266   : > { %v1299_v62 = vpack.i.b16 %v1298_v19, %v1297_v44  ;;  %v1305_v25 = vshrl.u32 %v1192_v47, 16  ;;  %v760_v61 = vpack.c.b16 %v759_v57, %v758_v58  ;;  %v1303_v32 = vpack.i.b16 %v1220_v17, %v1192_v47 }
 0x267   : > { %v1190_v18 = vsel %vm1165_vm2, 0, %v1189_v46  ;;  %v1283_v16 = vpack.i.b16 %v1282_v22, %v1281_v20  ;;  %1342 = vst.msk [vmem:[#allocation2] sm:$0xf] %vm1341_vm3, %v1279_v49  ;;  %v1228_v29 = vsel %vm1165_vm2, %v1227_v34, %v5029_v48  ;;  %v1273_v19 = vrot.slane %v1268_v33, 4 }
 0x268   : > { %v1287_v38 = vpack.i.b16 %v1218_v50, %v1190_v18  ;;  %v1289_v28 = vshrl.u32 %v1190_v18, 16  ;;  %1347 = vst.msk [vmem:[#allocation2 + $0x14] sm:$0xf] %vm1341_vm3, %v1299_v62  ;;  %v1232_v23 = vperm.slane %v1228_v29, %v5052_v59  ;;  %4042 = vmatmul.msk.bf16.vlgmr.msra.gmra.mxu1 %vm575_vm1, %v760_v61  ;;  %v1307_v21 = vpack.i.b16 %v1306_v39, %v1305_v25 }
 0x269   : > { %1343 = vst.msk [vmem:[#allocation2 + $0x4] sm:$0xf] %vm1341_vm3, %v1283_v16  ;;  %1088 = vmatpush.bf16.msra.mxu1 %v4970_v56  ;;  %v1275_v17 = vrot.slane %v1272_v36, 4  ;;  %v1274_v44 = vsel %vm1165_vm2, 0, %v1273_v19  ;;  %v1314_v58 = vshrl.u32 %v1268_v33, 16 }
 0x26a   : > { %v1291_v22 = vpack.i.b16 %v1290_v45, %v1289_v28  ;;  %1344 = vst.msk [vmem:[#allocation2 + $0x8] sm:$0xf] %vm1341_vm3, %v1287_v38  ;;  %v1233_v48 = vrot.slane %v1232_v23, 4  ;;  %v1236_v50 = vsel %vm1165_vm2, %v1232_v23, %v1235_v51  ;;  %v1330_v51 = vshrl.u32 %v1272_v36, 16 }
 0x26b   : > { %1348 = vst.msk [vmem:[#allocation2 + $0x18] sm:$0xf] %vm1341_vm3, %v1303_v32  ;;  %v1244_v24 = vperm.slane %v1236_v50, %v5061_v37  ;;  %v1276_v57 = vsel %vm1165_vm2, 0, %v1275_v17  ;;  %v1322_v16 = vshrl.u32 %v1274_v44, 16 }
 0x26c   : > { %1345 = vst.msk [vmem:[#allocation2 + $0xc] sm:$0xf] %vm1341_vm3, %v1291_v22  ;;  %v1234_v39 = vsel %vm1165_vm2, %v1233_v48, %v5083_v43  ;;  %v1338_v18 = vshrl.u32 %v1276_v57, 16 }
 0x26d   : > { %1349 = vst.msk [vmem:[#allocation2 + $0x1c] sm:$0xf] %vm1341_vm3, %v1307_v21  ;;  %v1240_v56 = vperm.slane %v1234_v39, %v5061_v37  ;;  %v1247_v35 = vrot.slane %v1244_v24, 4  ;;  %v1327_v42 = vpack.i.b16 %v1272_v36, %v1244_v24  ;;  %v1329_v52 = vshrl.u32 %v1244_v24, 16 }
 0x26f   : > { %v1245_v34 = vrot.slane %v1240_v56, 4  ;;  %v1248_v46 = vsel %vm1165_vm2, 0, %v1247_v35  ;;  %v1311_v47 = vpack.i.b16 %v1268_v33, %v1240_v56  ;;  %v1313_v49 = vshrl.u32 %v1240_v56, 16  ;;  %1354 = vst.msk [vmem:[#allocation2 + $0x30] sm:$0xf] %vm1341_vm3, %v1327_v42 }
 0x270   : > { %v1331_v43 = vpack.i.b16 %v1330_v51, %v1329_v52  ;;  %v1337_v20 = vshrl.u32 %v1248_v46, 16  ;;  %v1335_v61 = vpack.i.b16 %v1276_v57, %v1248_v46 }
 0x271   : > { %v1246_v62 = vsel %vm1165_vm2, 0, %v1245_v34  ;;  %v1315_v25 = vpack.i.b16 %v1314_v58, %v1313_v49  ;;  %1350 = vst.msk [vmem:[#allocation2 + $0x20] sm:$0xf] %vm1341_vm3, %v1311_v47 }
 0x272   : > { %v1319_v36 = vpack.i.b16 %v1274_v44, %v1246_v62  ;;  %v1321_v32 = vshrl.u32 %v1246_v62, 16  ;;  %1355 = vst.msk [vmem:[#allocation2 + $0x34] sm:$0xf] %vm1341_vm3, %v1331_v43  ;;  %v1339_v29 = vpack.i.b16 %v1338_v18, %v1337_v20 }
 0x273   : > { %1351 = vst.msk [vmem:[#allocation2 + $0x24] sm:$0xf] %vm1341_vm3, %v1315_v25 }
 0x274   : > { %v1323_v33 = vpack.i.b16 %v1322_v16, %v1321_v32  ;;  %1352 = vst.msk [vmem:[#allocation2 + $0x28] sm:$0xf] %vm1341_vm3, %v1319_v36  ;;  %v1374_v32 = vlaneseq }
 0x275   : > { %1356 = vst.msk [vmem:[#allocation2 + $0x38] sm:$0xf] %vm1341_vm3, %v1335_v61 }
 0x276   : > { %1353 = vst.msk [vmem:[#allocation2 + $0x2c] sm:$0xf] %vm1341_vm3, %v1323_v33 }
 0x277   : > { %1357 = vst.msk [vmem:[#allocation2 + $0x3c] sm:$0xf] %vm1341_vm3, %v1339_v29 }
 0x284   : > { %v591_v45 = vpop.f32.mrf.mxu1 }
 0x285   : > { %v820_v38 = vsel %vm398_vm0, %v591_v45, -inf }
 0x286   : > { %821 = vmax.xlane.f32.xlu1 %v820_v38  ;;  %v5190_v38 = vand.u32 127, %v1374_v32 }
 0x28c   : > { %v593_v28 = vpop.f32.mrf.mxu1 }
 0x28d   : > { %v823_v23 = vsel %vm398_vm0, %v593_v28, -inf }
 0x28e   : > { %824 = vmax.xlane.f32.xlu2 %v823_v23 }
 0x29a   : > { %v5134_v19 = vpop.f32.mrf.mxu2 }
 0x29b   : > { %v826_v21 = vsel %vm398_vm0, %v5134_v19, -inf }
 0x29c   : > { %827 = vmax.xlane.f32.xlu0 %v826_v21  ;;  %v5193_v21 = vadd.s32 4294967288, %v5190_v38 }
 0x2a2   : > { %v5138_v17 = vpop.f32.mrf.mxu2 }
 0x2a3   : > { %v829_v22 = vsel %vm398_vm0, %v5138_v17, -inf }
 0x2a4   : > { %830 = vmax.xlane.f32.xlu2 %v829_v22 }
 0x2aa   : > { %v5142_v48 = vpop.f32.mrf.mxu3 }
 0x2ab   : > { %v832_v50 = vsel %vm398_vm0, %v5142_v48, -inf }
 0x2ac   : > { %833 = vmax.xlane.f32.xlu1 %v832_v50 }
 0x2b2   : > { %v5146_v24 = vpop.f32.mrf.mxu3 }
 0x2b3   : > { %v835_v39 = vsel %vm398_vm0, %v5146_v24, -inf }
 0x2b4   : > { %836 = vmax.xlane.f32.xlu2 %v835_v39  ;;  %v5150_v56 = vpop.f32.mrf.mxu1 }
 0x2b5   : > { %v838_v35 = vsel %vm398_vm0, %v5150_v56, -inf }
 0x2b6   : > { %839 = vmax.xlane.f32.xlu0 %v838_v35 }
 0x2bc   : > { %v5154_v42 = vpop.f32.mrf.mxu1 }
 0x2bd   : > { %v841_v52 = vsel %vm398_vm0, %v5154_v42, -inf }
 0x2be   : > { %842 = vmax.xlane.f32.xlu1 %v841_v52 }
 0x2ca   : > { %v5158_v44 = vpop.f32.mrf.mxu2 }
 0x2cb   : > { %v844_v58 = vsel %vm398_vm0, %v5158_v44, -inf }
 0x2cc   : > { %845 = vmax.xlane.f32.xlu2 %v844_v58 }
 0x2d2   : > { %v5162_v51 = vpop.f32.mrf.mxu2 }
 0x2d3   : > { %v847_v57 = vsel %vm398_vm0, %v5162_v51, -inf }
 0x2d4   : > { %848 = vmax.xlane.f32.xlu0 %v847_v57 }
 0x2da   : > { %v5166_v34 = vpop.f32.mrf.mxu3  ;;  %v5170_v47 = vpop.f32.mrf.mxu2 }
 0x2db   : > { %v850_v46 = vsel %vm398_vm0, %v5166_v34, -inf  ;;  %v862_v61 = vsel %vm398_vm0, %v5170_v47, -inf }
 0x2dc   : > { %851 = vmax.xlane.f32.xlu1 %v850_v46 }
 0x2e2   : > { %v5172_v49 = vpop.f32.mrf.mxu3  ;;  %v5180_v25 = vpop.f32.mrf.mxu2 }
 0x2e3   : > { %v853_v43 = vsel %vm398_vm0, %v5172_v49, -inf  ;;  %v865_v36 = vsel %vm398_vm0, %v5180_v25, -inf }
 0x2e4   : > { %854 = vmax.xlane.f32.xlu2 %v853_v43 }
 0x2e5   : > { %v5176_v20 = vpop.f32.mrf.mxu1 }
 0x2e6   : > { %v856_v62 = vsel %vm398_vm0, %v5176_v20, -inf }
 0x2e7   : > { %857 = vmax.xlane.f32.xlu0 %v856_v62 }
 0x2ec   : > { %863 = vmax.xlane.f32.xlu2 %v862_v61 }
 0x2ed   : > { %v5184_v18 = vpop.f32.mrf.mxu1 }
 0x2ee   : > { %v859_v16 = vsel %vm398_vm0, %v5184_v18, -inf }
 0x2ef   : > { %860 = vmax.xlane.f32.xlu1 %v859_v16  ;;  %866 = vmax.xlane.f32.xlu0 %v865_v36 }
 0x2f9   : > { %v822_v29 = vpop.xlane.xlu1 %821 }
 0x2fa   : > { %v868_v33 = vsub.f32 %v591_v45, %v822_v29  ;;  %v1376_v50 = vperm.slane %v822_v29, %v5190_v38 }
 0x2fc   : > { %v884_v23 = vmul.f32 1.442695, %v868_v33 }
 0x2fe   : > { %4290 = vpow2.f32 %v884_v23 }
 0x301   : > { %v825_v22 = vpop.xlane.xlu2 %824 }
 0x302   : > { %v869_v39 = vsub.f32 %v593_v28, %v825_v22  ;;  %v1378_v35 = vperm.slane %v825_v22, %v5193_v21 }
 0x304   : > { %v4291_v52 = vpop.eup %4290  ;;  %v886_v58 = vmul.f32 1.442695, %v869_v39  ;;  %v1380_v57 = vsel %vm1379_vm4, %v1378_v35, %v1376_v50 }
 0x305   : > { %v916_v45 = vsel %vm398_vm0, %v4291_v52, 0.0  ;;  %v964_v46 = vpack.c.bf16 %v4291_v52, %v4291_v52 }
 0x306   : > { %4292 = vpow2.f32 %v886_v58  ;;  %917 = vadd.xlane.f32.xlu1 %v916_v45 }
 0x307   : > { %v982_v36 = vunpack.c.l.b16 %v964_v46 }
 0x30c   : > { %v4293_v43 = vpop.eup %4292 }
 0x30d   : > { %v965_v62 = vpack.c.bf16 %v4293_v43, %v4293_v43  ;;  %v919_v61 = vsel %vm398_vm0, %v4293_v43, 0.0 }
 0x30e   : > { %920 = vadd.xlane.f32.xlu2 %v919_v61 }
 0x30f   : > { %v828_v16 = vpop.xlane.xlu0 %827  ;;  %v983_v32 = vunpack.c.l.b16 %v965_v62 }
 0x310   : > { %v870_v28 = vsub.f32 %v5134_v19, %v828_v16  ;;  %v1381_v22 = vperm.slane %v828_v16, %v5190_v38 }
 0x311   : > { %v984_v29 = vpack.c.b16 %v983_v32, %v982_v36 }
 0x312   : > { %v888_v33 = vmul.f32 1.442695, %v870_v28 }
 0x313   : > { %4044 = vmatmul.msk.bf16.vlgmr.msra.gmra.mxu3 %vm398_vm0, %v984_v29 }
 0x314   : > { %4294 = vpow2.f32 %v888_v33  ;;  %1134 = vmatpush.bf16.msra.mxu3 %v4994_v63 }
 0x317   : > { %v831_v23 = vpop.xlane.xlu2 %830 }
 0x318   : > { %v871_v50 = vsub.f32 %v5138_v17, %v831_v23  ;;  %v1382_v39 = vperm.slane %v831_v23, %v5193_v21 }
 0x31a   : > { %v4295_v35 = vpop.eup %4294  ;;  %v890_v52 = vmul.f32 1.442695, %v871_v50  ;;  %v1383_v58 = vsel %vm1379_vm4, %v1382_v39, %v1381_v22 }
 0x31b   : > { %v1403_v19 = vsel %vm1402_vm5, %v1383_v58, %v1380_v57  ;;  %v922_v45 = vsel %vm398_vm0, %v4295_v35, 0.0  ;;  %v966_v43 = vpack.c.bf16 %v4295_v35, %v4295_v35 }
 0x31c   : > { %4296 = vpow2.f32 %v890_v52  ;;  %923 = vadd.xlane.f32.xlu0 %v922_v45 }
 0x31d   : > { %v1005_v36 = vunpack.c.l.b16 %v966_v43 }
 0x31f   : > { %v834_v46 = vpop.xlane.xlu1 %833 }
 0x320   : > { %v872_v63 = vsub.f32 %v5142_v48, %v834_v46  ;;  %v1384_v57 = vperm.slane %v834_v46, %v5190_v38 }
 0x322   : > { %v4297_v62 = vpop.eup %4296  ;;  %v892_v61 = vmul.f32 1.442695, %v872_v63 }
 0x323   : > { %v967_v16 = vpack.c.bf16 %v4297_v62, %v4297_v62  ;;  %v925_v17 = vsel %vm398_vm0, %v4297_v62, 0.0 }
 0x324   : > { %4298 = vpow2.f32 %v892_v61  ;;  %926 = vadd.xlane.f32.xlu1 %v925_v17 }
 0x325   : > { %v1006_v32 = vunpack.c.l.b16 %v967_v16 }
 0x327   : > { %v837_v28 = vpop.xlane.xlu2 %836  ;;  %v1007_v29 = vpack.c.b16 %v1006_v32, %v1005_v36 }
 0x328   : > { %v873_v33 = vsub.f32 %v5146_v24, %v837_v28  ;;  %v1385_v23 = vperm.slane %v837_v28, %v5193_v21 }
 0x329   : > { %4045 = vmatmul.msk.bf16.vlgmr.msrb.gmra.mxu1 %vm398_vm0, %v1007_v29  ;;  %v840_v48 = vpop.xlane.xlu0 %839 }
 0x32a   : > { %v4299_v22 = vpop.eup %4298  ;;  %v894_v50 = vmul.f32 1.442695, %v873_v33  ;;  %v1386_v39 = vsel %vm1379_vm4, %v1385_v23, %v1384_v57  ;;  %v874_v35 = vsub.f32 %v5150_v56, %v840_v48  ;;  %1157 = vmatpush.bf16.msrb.mxu1 %v4986_v60  ;;  %v1387_v43 = vperm.slane %v840_v48, %v5190_v38 }
 0x32b   : > { %v1405_v52 = vsel %vm1404_vm6, %v1386_v39, %v1403_v19  ;;  %v928_v58 = vsel %vm398_vm0, %v4299_v22, 0.0  ;;  %v968_v24 = vpack.c.bf16 %v4299_v22, %v4299_v22 }
 0x32c   : > { %4300 = vpow2.f32 %v894_v50  ;;  %v896_v45 = vmul.f32 1.442695, %v874_v35  ;;  %929 = vadd.xlane.f32.xlu2 %v928_v58 }
 0x32d   : > { %v1028_v28 = vunpack.c.l.b16 %v968_v24 }
 0x32e   : > { %4302 = vpow2.f32 %v896_v45 }
 0x331   : > { %v843_v46 = vpop.xlane.xlu1 %842 }
 0x332   : > { %v4301_v63 = vpop.eup %4300  ;;  %v875_v62 = vsub.f32 %v5154_v42, %v843_v46  ;;  %v1388_v56 = vperm.slane %v843_v46, %v5193_v21 }
 0x333   : > { %v969_v61 = vpack.c.bf16 %v4301_v63, %v4301_v63  ;;  %v931_v60 = vsel %vm398_vm0, %v4301_v63, 0.0 }
 0x334   : > { %v4303_v19 = vpop.eup %4302  ;;  %v898_v16 = vmul.f32 1.442695, %v875_v62  ;;  %v1389_v17 = vsel %vm1379_vm4, %v1388_v56, %v1387_v43  ;;  %932 = vadd.xlane.f32.xlu0 %v931_v60 }
 0x335   : > { %v1407_v36 = vsel %vm1406_vm7, %v1389_v17, %v1405_v52  ;;  %v934_v32 = vsel %vm398_vm0, %v4303_v19, 0.0  ;;  %v1029_v29 = vunpack.c.l.b16 %v969_v61  ;;  %v970_v42 = vpack.c.bf16 %v4303_v19, %v4303_v19 }
 0x336   : > { %4304 = vpow2.f32 %v898_v16  ;;  %935 = vadd.xlane.f32.xlu1 %v934_v32 }
 0x337   : > { %v1030_v57 = vpack.c.b16 %v1029_v29, %v1028_v28  ;;  %v1051_v50 = vunpack.c.l.b16 %v970_v42 }
 0x339   : > { %4046 = vmatmul.msk.bf16.vlgmr.msra.gmra.mxu2 %vm398_vm0, %v1030_v57 }
 0x33c   : > { %v4305_v33 = vpop.eup %4304 }
 0x33d   : > { %v971_v23 = vpack.c.bf16 %v4305_v33, %v4305_v33  ;;  %v937_v48 = vsel %vm398_vm0, %v4305_v33, 0.0 }
 0x33e   : > { %938 = vadd.xlane.f32.xlu2 %v937_v48 }
 0x33f   : > { %v846_v22 = vpop.xlane.xlu2 %845  ;;  %v1052_v39 = vunpack.c.l.b16 %v971_v23 }
 0x340   : > { %v876_v35 = vsub.f32 %v5158_v44, %v846_v22  ;;  %v1390_v24 = vperm.slane %v846_v22, %v5190_v38 }
 0x341   : > { %v1053_v52 = vpack.c.b16 %v1052_v39, %v1051_v50 }
 0x342   : > { %v900_v58 = vmul.f32 1.442695, %v876_v35 }
 0x343   : > { %4047 = vmatmul.msk.bf16.vlgmr.msrb.gmra.mxu3 %vm398_vm0, %v1053_v52 }
 0x344   : > { %4306 = vpow2.f32 %v900_v58 }
 0x347   : > { %v849_v45 = vpop.xlane.xlu0 %848 }
 0x348   : > { %v877_v46 = vsub.f32 %v5162_v51, %v849_v45  ;;  %v1391_v63 = vperm.slane %v849_v45, %v5193_v21 }
 0x34a   : > { %v4307_v43 = vpop.eup %4306  ;;  %v902_v62 = vmul.f32 1.442695, %v877_v46  ;;  %v1392_v56 = vsel %vm1379_vm4, %v1391_v63, %v1390_v24 }
 0x34b   : > { %v940_v61 = vsel %vm398_vm0, %v4307_v43, 0.0  ;;  %v1409_v44 = vsel %vm1408_vm8, %v1392_v56, %v1407_v36  ;;  %v972_v16 = vpack.c.bf16 %v4307_v43, %v4307_v43 }
 0x34c   : > { %4308 = vpow2.f32 %v902_v62  ;;  %941 = vadd.xlane.f32.xlu0 %v940_v61 }
 0x34d   : > { %v1074_v29 = vunpack.c.l.b16 %v972_v16 }
 0x34f   : > { %v852_v60 = vpop.xlane.xlu1 %851 }
 0x350   : > { %v878_v19 = vsub.f32 %v5166_v34, %v852_v60  ;;  %v1393_v23 = vperm.slane %v852_v60, %v5190_v38 }
 0x352   : > { %v4309_v17 = vpop.eup %4308  ;;  %v904_v32 = vmul.f32 1.442695, %v878_v19 }
 0x353   : > { %v973_v51 = vpack.c.bf16 %v4309_v17, %v4309_v17  ;;  %v943_v28 = vsel %vm398_vm0, %v4309_v17, 0.0 }
 0x354   : > { %4310 = vpow2.f32 %v904_v32  ;;  %944 = vadd.xlane.f32.xlu1 %v943_v28 }
 0x355   : > { %v1075_v57 = vunpack.c.l.b16 %v973_v51 }
 0x357   : > { %v855_v42 = vpop.xlane.xlu2 %854  ;;  %v1076_v33 = vpack.c.b16 %v1075_v57, %v1074_v29 }
 0x358   : > { %v879_v36 = vsub.f32 %v5172_v49, %v855_v42  ;;  %v1394_v48 = vperm.slane %v855_v42, %v5193_v21 }
 0x359   : > { %4048 = vmatmul.msk.bf16.vlgmr.msra.gmra.mxu1 %vm398_vm0, %v1076_v33 }
 0x35a   : > { %v4311_v34 = vpop.eup %4310  ;;  %v906_v22 = vmul.f32 1.442695, %v879_v36  ;;  %v1395_v50 = vsel %vm1379_vm4, %v1394_v48, %v1393_v23  ;;  %v858_v39 = vpop.xlane.xlu0 %857 }
 0x35b   : > { %v880_v35 = vsub.f32 %v5176_v20, %v858_v39  ;;  %v946_v52 = vsel %vm398_vm0, %v4311_v34, 0.0  ;;  %v1411_v58 = vsel %vm1410_vm9, %v1395_v50, %v1409_v44  ;;  %v974_v46 = vpack.c.bf16 %v4311_v34, %v4311_v34 }
 0x35c   : > { %4312 = vpow2.f32 %v906_v22  ;;  %947 = vadd.xlane.f32.xlu2 %v946_v52 }
 0x35d   : > { %v908_v45 = vmul.f32 1.442695, %v880_v35  ;;  %v1097_v32 = vunpack.c.l.b16 %v974_v46 }
 0x35f   : > { %4314 = vpow2.f32 %v908_v45  ;;  %v864_v49 = vpop.xlane.xlu2 %863 }
 0x360   : > { %v882_v24 = vsub.f32 %v5170_v47, %v864_v49 }
 0x362   : > { %v4313_v63 = vpop.eup %4312  ;;  %v912_v43 = vmul.f32 1.442695, %v882_v24  ;;  %v861_v62 = vpop.xlane.xlu1 %860 }
 0x363   : > { %v867_v56 = vpop.xlane.xlu0 %866  ;;  %v975_v61 = vpack.c.bf16 %v4313_v63, %v4313_v63  ;;  %v881_v60 = vsub.f32 %v5184_v18, %v861_v62  ;;  %v949_v19 = vsel %vm398_vm0, %v4313_v63, 0.0  ;;  %v1397_v46 = vperm.slane %v861_v62, %v5193_v21 }
 0x364   : > { %v883_v20 = vsub.f32 %v5180_v25, %v867_v56  ;;  %4316 = vpow2.f32 %v912_v43  ;;  %950 = vadd.xlane.f32.xlu0 %v949_v19  ;;  %v1396_v63 = vperm.slane %v858_v39, %v5190_v38  ;;  %v1400_v43 = vperm.slane %v867_v56, %v5193_v21 }
 0x365   : > { %v4315_v16 = vpop.eup %4314  ;;  %v910_v44 = vmul.f32 1.442695, %v881_v60  ;;  %v1098_v51 = vunpack.c.l.b16 %v975_v61  ;;  %v1399_v60 = vperm.slane %v864_v49, %v5190_v38 }
 0x366   : > { %v914_v17 = vmul.f32 1.442695, %v883_v20  ;;  %v952_v47 = vsel %vm398_vm0, %v4315_v16, 0.0  ;;  %v976_v29 = vpack.c.bf16 %v4315_v16, %v4315_v16  ;;  %v1398_v61 = vsel %vm1379_vm4, %v1397_v46, %v1396_v63 }
 0x367   : > { %4318 = vpow2.f32 %v910_v44  ;;  %953 = vadd.xlane.f32.xlu1 %v952_v47  ;;  %v1099_v28 = vpack.c.b16 %v1098_v51, %v1097_v32  ;;  %v1401_v20 = vsel %vm1379_vm4, %v1400_v43, %v1399_v60  ;;  %v1413_v19 = vsel %vm1412_vm10, %v1398_v61, %v1411_v58 }
 0x368   : > { %4320 = vpow2.f32 %v914_v17  ;;  %v1120_v22 = vunpack.c.l.b16 %v976_v29  ;;  %v1415_v16 = vsel %vm1414_vm11, %v1401_v20, %v1413_v19 }
 0x369   : > { %4049 = vmatmul.msk.bf16.vlgmr.msrb.gmra.mxu2 %vm398_vm0, %v1099_v28 }
 0x36a   : > { %v4317_v18 = vpop.eup %4316 }
 0x36b   : > { %v958_v25 = vsel %vm398_vm0, %v4317_v18, 0.0  ;;  %v978_v42 = vpack.c.bf16 %v4317_v18, %v4317_v18 }
 0x36c   : > { %959 = vadd.xlane.f32.xlu0 %v958_v25 }
 0x36d   : > { %v4319_v57 = vpop.eup %4318  ;;  %v1143_v35 = vunpack.c.l.b16 %v978_v42 }
 0x36e   : > { %v4321_v33 = vpop.eup %4320  ;;  %v977_v23 = vpack.c.bf16 %v4319_v57, %v4319_v57  ;;  %v955_v36 = vsel %vm398_vm0, %v4319_v57, 0.0 }
 0x36f   : > { %v979_v48 = vpack.c.bf16 %v4321_v33, %v4321_v33  ;;  %956 = vadd.xlane.f32.xlu2 %v955_v36  ;;  %v961_v34 = vsel %vm398_vm0, %v4321_v33, 0.0 }
 0x370   : > { %962 = vadd.xlane.f32.xlu1 %v961_v34  ;;  %v1121_v50 = vunpack.c.l.b16 %v977_v23 }
 0x371   : > { %v1144_v52 = vunpack.c.l.b16 %v979_v48 }
 0x372   : > { %v1122_v45 = vpack.c.b16 %v1121_v50, %v1120_v22 }
 0x373   : > { %v1145_v24 = vpack.c.b16 %v1144_v52, %v1143_v35 }
 0x374   : > { %4050 = vmatmul.msk.bf16.vlgmr.msra.gmra.mxu3 %vm398_vm0, %v1122_v45 }
 0x375   : > { %4051 = vmatmul.msk.bf16.vlgmr.msrb.gmra.mxu1 %vm398_vm0, %v1145_v24 }
 0x379   : > { %v918_v44 = vpop.xlane.xlu1 %917 }
 0x37a   : > { %v1468_v45 = vperm.slane %v918_v44, %v5190_v38 }
 0x381   : > { %v921_v62 = vpop.xlane.xlu2 %920 }
 0x382   : > { %v1469_v48 = vperm.slane %v921_v62, %v5193_v21 }
 0x384   : > { %v1470_v60 = vsel %vm1379_vm4, %v1469_v48, %v1468_v45 }
 0x38f   : > { %v924_v17 = vpop.xlane.xlu0 %923 }
 0x390   : > { %v1471_v34 = vperm.slane %v924_v17, %v5190_v38 }
 0x396   : > { %v5266_v49 = vpop.f32.mrf.mxu3 }
 0x397   : > { %v927_v32 = vpop.xlane.xlu1 %926 }
 0x398   : > { %1417 = vxpose.xlu2.b32.start.end [1/1] (short) (narrow) %v1415_v16, 16  ;;  %v1472_v42 = vperm.slane %v927_v32, %v5193_v21 }
 0x39a   : > { %v1473_v24 = vsel %vm1379_vm4, %v1472_v42, %v1471_v34 }
 0x39b   : > { %v1492_v17 = vsel %vm1402_vm5, %v1473_v24, %v1470_v60 }
 0x39e   : > { %v5277_v50 = vpop.f32.mrf.mxu3 }
 0x39f   : > { %v930_v51 = vpop.xlane.xlu2 %929 }
 0x3a0   : > { %v1474_v35 = vperm.slane %v930_v51, %v5190_v38 }
 0x3a6   : > { %v1021_v47 = vpop.f32.mrf.mxu1 }
 0x3a7   : > { %v933_v39 = vpop.xlane.xlu0 %932 }
 0x3a8   : > { %v1475_v36 = vperm.slane %v933_v39, %v5193_v21 }
 0x3a9   : > { %v936_v56 = vpop.xlane.xlu1 %935 }
 0x3aa   : > { %v1477_v46 = vperm.slane %v936_v56, %v5190_v38  ;;  %v1476_v43 = vsel %vm1379_vm4, %v1475_v36, %v1474_v35 }
 0x3ab   : > { %v1493_v32 = vsel %vm1404_vm6, %v1476_v43, %v1492_v17 }
 0x3ae   : > { %v5268_v29 = vpop.f32.mrf.mxu1 }
 0x3b1   : > { %v939_v18 = vpop.xlane.xlu2 %938 }
 0x3b2   : > { %v1478_v22 = vperm.slane %v939_v18, %v5193_v21 }
 0x3b4   : > { %v1479_v20 = vsel %vm1379_vm4, %v1478_v22, %v1477_v46 }
 0x3b5   : > { %v1494_v56 = vsel %vm1406_vm7, %v1479_v20, %v1493_v32  ;;  %v1534_v32 = vpack.c.bf16 %v5266_v49, %v5266_v49  ;;  %v1535_v49 = vpack.c.bf16 %v5277_v50, %v5277_v50 }
 0x3bc   : > { %v5270_v57 = vpop.f32.mrf.mxu2 }
 0x3bf   : > { %v942_v28 = vpop.xlane.xlu0 %941 }
 0x3c0   : > { %v1480_v61 = vperm.slane %v942_v28, %v5190_v38 }
 0x3c6   : > { %v1067_v48 = vpop.f32.mrf.mxu3 }
 0x3c7   : > { %v945_v25 = vpop.xlane.xlu1 %944 }
 0x3c8   : > { %v1481_v52 = vperm.slane %v945_v25, %v5193_v21 }
 0x3ca   : > { %v1482_v44 = vsel %vm1379_vm4, %v1481_v52, %v1480_v61 }
 0x3cb   : > { %v1495_v36 = vsel %vm1408_vm8, %v1482_v44, %v1494_v56 }
 0x3cf   : > { %v948_v33 = vpop.xlane.xlu2 %947 }
 0x3d0   : > { %v1483_v19 = vperm.slane %v948_v33, %v5190_v38 }
 0x3d6   : > { %v1090_v16 = vpop.f32.mrf.mxu1 }
 0x3d7   : > { %v951_v58 = vpop.xlane.xlu0 %950 }
 0x3d8   : > { %v1484_v63 = vperm.slane %v951_v58, %v5193_v21  ;;  %v5297_v58 = vpop.f32.mrf.mxu2 }
 0x3da   : > { %v954_v23 = vpop.xlane.xlu1 %953  ;;  %v1485_v39 = vsel %vm1379_vm4, %v1484_v63, %v1483_v19  ;;  %v1069_v63 = vpop.f32.mrf.mxu3 }
 0x3db   : > { %v1486_v28 = vperm.slane %v954_v23, %v5190_v38  ;;  %v1496_v22 = vsel %vm1410_vm9, %v1485_v39, %v1495_v36  ;;  %v1540_v39 = vpack.c.bf16 %v1067_v48, %v1067_v48  ;;  %v1538_v48 = vpack.c.bf16 %v5270_v57, %v5270_v57 }
 0x3de   : > { %v1092_v45 = vpop.f32.mrf.mxu1 }
 0x3df   : > { %v960_v62 = vpop.xlane.xlu0 %959  ;;  %v1543_v19 = vpack.c.bf16 %v1092_v45, %v1092_v45 }
 0x3e0   : > { %v1489_v42 = vperm.slane %v960_v62, %v5190_v38  ;;  %v1536_v38 = vpack.c.bf16 %v1021_v47, %v1021_v47  ;;  %v1537_v47 = vpack.c.bf16 %v5268_v29, %v5268_v29 }
 0x3e2   : > { %v957_v51 = vpop.xlane.xlu2 %956 }
 0x3e3   : > { %v1487_v18 = vperm.slane %v957_v51, %v5193_v21  ;;  %v963_v25 = vpop.xlane.xlu1 %962 }
 0x3e4   : > { %v1490_v33 = vperm.slane %v963_v25, %v5193_v21  ;;  %v1542_v21 = vpack.c.bf16 %v1090_v16, %v1090_v16 }
 0x3e5   : > { %v1488_v34 = vsel %vm1379_vm4, %v1487_v18, %v1486_v28  ;;  %v1606_v28 = vrot.slane %v1543_v19, 4  ;;  %v1541_v19 = vpack.c.bf16 %v1069_v63, %v1069_v63 }
 0x3e6   : > { %v1491_v35 = vsel %vm1379_vm4, %v1490_v33, %v1489_v42  ;;  %v1497_v23 = vsel %vm1412_vm10, %v1488_v34, %v1496_v22  ;;  %v1550_v20 = vrot.slane %v1542_v21, 4 }
 0x3e7   : > { %v1498_v52 = vsel %vm1414_vm11, %v1491_v35, %v1497_v23 }
 0x3e8   : > { %1500 = vxpose.xlu0.b32.start.end [1/1] (short) (narrow) %v1498_v52, 16  ;;  %v1551_v16 = vsel %vm1165_vm2, %v1550_v20, %v1534_v32 }
 0x3e9   : > { %v1555_v29 = vperm.slane %v1551_v16, %v5052_v59 }
 0x3ec   : > { %v1113_v24 = vpop.f32.mrf.mxu2 }
 0x3ed   : > { %v1544_v46 = vpack.c.bf16 %v1113_v24, %v1113_v24  ;;  %v1607_v24 = vsel %vm1165_vm2, %v1606_v28, %v1535_v49 }
 0x3ef   : > { %v1578_v43 = vrot.slane %v1544_v46, 4 }
 0x3f1   : > { %v1579_v61 = vsel %vm1165_vm2, %v1578_v43, %v1536_v38  ;;  %v1539_v43 = vpack.c.bf16 %v5297_v58, %v5297_v58 }
 0x3f2   : > { %v1159_v60 = vpop.f32.mrf.mxu1  ;;  %v1583_v44 = vperm.slane %v1579_v61, %v5052_v59 }
 0x3f3   : > { %v1548_v17 = vpack.c.bf16 %v1159_v60, %v1159_v60 }
 0x3f4   : > { %v1115_v62 = vpop.f32.mrf.mxu2  ;;  %v1592_v33 = vrot.slane %v1583_v44, 4 }
 0x3f5   : > { %v1584_v51 = vrot.slane %v1548_v17, 4  ;;  %v1545_v56 = vpack.c.bf16 %v1115_v62, %v1115_v62  ;;  %v1564_v17 = vrot.slane %v1555_v29, 4  ;;  %v5333_v62 = vperm.slane %v1607_v24, %v5052_v59 }
 0x3f7   : > { %v1585_v18 = vsel %vm1165_vm2, %v1584_v51, %v1540_v39  ;;  %v1634_v25 = vrot.slane %v1545_v56, 4  ;;  %v1136_v42 = vpop.f32.mrf.mxu3 }
 0x3f8   : > { %v1589_v36 = vperm.slane %v1585_v18, %v5052_v59  ;;  %v1546_v34 = vpack.c.bf16 %v1136_v42, %v1136_v42 }
 0x3f9   : > { %v1635_v22 = vsel %vm1165_vm2, %v1634_v25, %v1537_v47 }
 0x3fa   : > { %v1590_v35 = vrot.slane %v1589_v36, 4  ;;  %v1593_v23 = vsel %vm1165_vm2, %v1589_v36, %v1592_v33  ;;  %v1556_v52 = vrot.slane %v1546_v34, 4  ;;  %v1161_v45 = vpop.f32.mrf.mxu1  ;;  %v1639_v38 = vperm.slane %v1635_v22, %v5052_v59 }
 0x3fb   : > { %v1601_v46 = vperm.slane %v1593_v23, %v5061_v37  ;;  %v1549_v21 = vpack.c.bf16 %v1161_v45, %v1161_v45 }
 0x3fc   : > { %v1591_v50 = vsel %vm1165_vm2, %v1590_v35, %v1583_v44  ;;  %v1557_v57 = vsel %vm1165_vm2, %v1556_v52, %v1538_v48  ;;  %v1648_v44 = vrot.slane %v1639_v38, 4 }
 0x3fd   : > { %v1597_v61 = vperm.slane %v1591_v50, %v5061_v37  ;;  %v1604_v60 = vrot.slane %v1601_v46, 4  ;;  %v1561_v20 = vperm.slane %v1557_v57, %v5052_v59  ;;  %v1640_v32 = vrot.slane %v1549_v21, 4 }
 0x3fe   : > { %v1683_v16 = vshrl.u32 %v1601_v46, 16 }
 0x3ff   : > { %v1602_v39 = vrot.slane %v1597_v61, 4  ;;  %v1605_v51 = vsel %vm1165_vm2, 0, %v1604_v60  ;;  %v1562_v56 = vrot.slane %v1561_v20, 4  ;;  %v1138_v47 = vpop.f32.mrf.mxu3  ;;  %v1565_v58 = vsel %vm1165_vm2, %v1561_v20, %v1564_v17 }
 0x400   : > { %v1641_v28 = vsel %vm1165_vm2, %v1640_v32, %v1541_v19  ;;  %v1547_v18 = vpack.c.bf16 %v1138_v47, %v1138_v47  ;;  %v1667_v25 = vshrl.u32 %v1597_v61, 16  ;;  %v1573_v42 = vperm.slane %v1565_v58, %v5061_v37 }
 0x401   : > { %v1563_v63 = vsel %vm1165_vm2, %v1562_v56, %v1555_v29  ;;  %v1645_v33 = vperm.slane %v1641_v28, %v5052_v59  ;;  %v1603_v36 = vsel %vm1165_vm2, 0, %v1602_v39  ;;  %v1691_v34 = vshrl.u32 %v1605_v51, 16 }
 0x402   : > { %v1569_v49 = vperm.slane %v1563_v63, %v5061_v37  ;;  %v1612_v48 = vrot.slane %v1547_v18, 4  ;;  %v1576_v22 = vrot.slane %v1573_v42, 4  ;;  %v1680_v35 = vpack.i.b16 %v1601_v46, %v1573_v42 }
 0x403   : > { %v1682_v23 = vshrl.u32 %v1573_v42, 16  ;;  %v1646_v52 = vrot.slane %v1645_v33, 4  ;;  %v1649_v50 = vsel %vm1165_vm2, %v1645_v33, %v1648_v44  ;;  %v1675_v56 = vshrl.u32 %v1603_v36, 16 }
 0x404   : > { %v1574_v45 = vrot.slane %v1569_v49, 4  ;;  %v1664_v24 = vpack.i.b16 %v1597_v61, %v1569_v49  ;;  %v1666_v21 = vshrl.u32 %v1569_v49, 16  ;;  %v1577_v29 = vsel %vm1165_vm2, 0, %v1576_v22 }
 0x405   : > { %v1684_v57 = vpack.i.b16 %v1683_v16, %v1682_v23  ;;  %v1730_v60 = vunpack.c.l.bf16 %v1680_v35  ;;  %v1647_v20 = vsel %vm1165_vm2, %v1646_v52, %v1639_v38  ;;  %v1688_v32 = vpack.i.b16 %v1605_v51, %v1577_v29 }
 0x406   : > { %v1575_v19 = vsel %vm1165_vm2, 0, %v1574_v45  ;;  %v1668_v17 = vpack.i.b16 %v1667_v25, %v1666_v21  ;;  %v1690_v39 = vshrl.u32 %v1577_v29, 16  ;;  %v1726_v58 = vunpack.c.l.bf16 %v1664_v24 }
 0x407   : > { %v1672_v46 = vpack.i.b16 %v1603_v36, %v1575_v19  ;;  %v1674_v47 = vshrl.u32 %v1575_v19, 16  ;;  %1746 = vst.msk [vmem:[#allocation5 + $0x20] sm:$0xff] %vm398_vm0, %v1730_v60  ;;  %v1731_v44 = vunpack.c.l.bf16 %v1684_v57  ;;  %v1653_v18 = vperm.slane %v1647_v20, %v5061_v37 }
 0x408   : > { %v1692_v61 = vpack.i.b16 %v1691_v34, %v1690_v39  ;;  %v1727_v28 = vunpack.c.l.bf16 %v1668_v17  ;;  %1742 = vst.msk [vmem:[#allocation5] sm:$0xff] %vm398_vm0, %v1726_v58  ;;  %v1657_v38 = vperm.slane %v1649_v50, %v5061_v37  ;;  %v1613_v51 = vsel %vm1165_vm2, %v1612_v48, %v1539_v43 }
 0x409   : > { %v1676_v16 = vpack.i.b16 %v1675_v56, %v1674_v47  ;;  %v1728_v63 = vunpack.c.l.bf16 %v1672_v46  ;;  %v1620_v25 = vrot.slane %v5333_v62, 4  ;;  %v1732_v42 = vunpack.c.l.bf16 %v1688_v32  ;;  %1747 = vst.msk [vmem:[#allocation5 + $0x28] sm:$0xff] %vm398_vm0, %v1731_v44 }
 0x40a   : > { %1743 = vst.msk [vmem:[#allocation5 + $0x8] sm:$0xff] %vm398_vm0, %v1727_v28  ;;  %v1617_v33 = vperm.slane %v1613_v51, %v5052_v59  ;;  %v1733_v34 = vunpack.c.l.bf16 %v1692_v61  ;;  %v1660_v49 = vrot.slane %v1657_v38, 4  ;;  %v1658_v22 = vrot.slane %v1653_v18, 4 }
 0x40b   : > { %v1729_v36 = vunpack.c.l.bf16 %v1676_v16  ;;  %1744 = vst.msk [vmem:[#allocation5 + $0x10] sm:$0xff] %vm398_vm0, %v1728_v63  ;;  %v1699_v29 = vshrl.u32 %v1653_v18, 16  ;;  %v1715_v57 = vshrl.u32 %v1657_v38, 16 }
 0x40c   : > { %v1618_v35 = vrot.slane %v1617_v33, 4  ;;  %v1621_v23 = vsel %vm1165_vm2, %v1617_v33, %v1620_v25  ;;  %v1661_v43 = vsel %vm1165_vm2, 0, %v1660_v49  ;;  %1748 = vst.msk [vmem:[#allocation5 + $0x30] sm:$0xff] %vm398_vm0, %v1732_v42  ;;  %v1659_v50 = vsel %vm1165_vm2, 0, %v1658_v22 }
 0x40d   : > { %1745 = vst.msk [vmem:[#allocation5 + $0x18] sm:$0xff] %vm398_vm0, %v1729_v36  ;;  %v1629_v48 = vperm.slane %v1621_v23, %v5061_v37  ;;  %v1723_v60 = vshrl.u32 %v1661_v43, 16  ;;  %v1707_v47 = vshrl.u32 %v1659_v50, 16 }
 0x40e   : > { %v1619_v59 = vsel %vm1165_vm2, %v1618_v35, %v5333_v62  ;;  %1749 = vst.msk [vmem:[#allocation5 + $0x38] sm:$0xff] %vm398_vm0, %v1733_v34 }
 0x40f   : > { %v1625_v52 = vperm.slane %v1619_v59, %v5061_v37  ;;  %v1632_v45 = vrot.slane %v1629_v48, 4  ;;  %v1712_v24 = vpack.i.b16 %v1657_v38, %v1629_v48  ;;  %v1714_v21 = vshrl.u32 %v1629_v48, 16 }
 0x411   : > { %v1630_v20 = vrot.slane %v1625_v52, 4  ;;  %v1633_v19 = vsel %vm1165_vm2, 0, %v1632_v45  ;;  %v1696_v17 = vpack.i.b16 %v1653_v18, %v1625_v52  ;;  %v1698_v32 = vshrl.u32 %v1625_v52, 16 }
 0x412   : > { %v1716_v39 = vpack.i.b16 %v1715_v57, %v1714_v21  ;;  %v1720_v56 = vpack.i.b16 %v1661_v43, %v1633_v19  ;;  %v1722_v62 = vshrl.u32 %v1633_v19, 16  ;;  %v1738_v46 = vunpack.c.l.bf16 %v1712_v24 }
 0x413   : > { %v1631_v37 = vsel %vm1165_vm2, 0, %v1630_v20  ;;  %v1700_v58 = vpack.i.b16 %v1699_v29, %v1698_v32  ;;  %v1734_v61 = vunpack.c.l.bf16 %v1696_v17 }
 0x414   : > { %v1704_v28 = vpack.i.b16 %v1659_v50, %v1631_v37  ;;  %v1706_v44 = vshrl.u32 %v1631_v37, 16  ;;  %v1724_v16 = vpack.i.b16 %v1723_v60, %v1722_v62  ;;  %v1739_v63 = vunpack.c.l.bf16 %v1716_v39  ;;  %1754 = vst.msk [vmem:[#allocation5 + $0x60] sm:$0xff] %vm398_vm0, %v1738_v46 }
 0x415   : > { %v1735_v38 = vunpack.c.l.bf16 %v1700_v58  ;;  %v1740_v51 = vunpack.c.l.bf16 %v1720_v56  ;;  %1750 = vst.msk [vmem:[#allocation5 + $0x40] sm:$0xff] %vm398_vm0, %v1734_v61 }
 0x416   : > { %v1708_v18 = vpack.i.b16 %v1707_v47, %v1706_v44  ;;  %v1736_v25 = vunpack.c.l.bf16 %v1704_v28  ;;  %1755 = vst.msk [vmem:[#allocation5 + $0x68] sm:$0xff] %vm398_vm0, %v1739_v63  ;;  %v1741_v42 = vunpack.c.l.bf16 %v1724_v16 }
 0x417   : > { %1751 = vst.msk [vmem:[#allocation5 + $0x48] sm:$0xff] %vm398_vm0, %v1735_v38 }
 0x418   : > { %v1737_v33 = vunpack.c.l.bf16 %v1708_v18  ;;  %1752 = vst.msk [vmem:[#allocation5 + $0x50] sm:$0xff] %vm398_vm0, %v1736_v25 }
 0x419   : > { %1756 = vst.msk [vmem:[#allocation5 + $0x70] sm:$0xff] %vm398_vm0, %v1740_v51 }
 0x41a   : > { %1753 = vst.msk [vmem:[#allocation5 + $0x58] sm:$0xff] %vm398_vm0, %v1737_v33 }
 0x41b   : > { %1757 = vst.msk [vmem:[#allocation5 + $0x78] sm:$0xff] %vm398_vm0, %v1741_v42 }
 0x431   : > { %v1433_v36 = vpop.trf.xlu2 }
 0x432   : > { %1450 = vst.msk [vmem:[#allocation3] sm:$0xff] %vm1449_vm12, %v1433_v36 }
 0x439   : > { %v1434_v34 = vpop.trf.xlu2 }
 0x43a   : > { %1451 = vst.msk [vmem:[#allocation3 + $0x8] sm:$0xff] %vm1449_vm12, %v1434_v34 }
 0x48c   : > { %v1516_v0 = vpop.trf.xlu0 }
 0x48d   : > { %1532 = vst.msk [vmem:[#allocation4] sm:$0xff] %vm1449_vm12, %v1516_v0 }
 0x494   : > { %v1517_v1 = vpop.trf.xlu0 }
 0x495   : > { %1533 = vst.msk [vmem:[#allocation4 + $0x8] sm:$0xff] %vm1449_vm12, %v1517_v1 }
 0x496 PF: > { %s4579_s23 = smov 112   ;;  %v6176_v3 = vld [vmem:[#allocation27_spill] sm:$0xff]  ;;  %v6177_v4 = vld [vmem:[#allocation30_spill] sm:$0xff]  ;;  %v6178_v5 = vld [vmem:[#allocation28_spill] sm:$0xff]  ;;  %v4580_v13 = vmov 1983009808  }
 0x497   : > { %1799 = vrot.lane.b32.xlu1 %v4901_v31, %s4579_s23  ;;  %1815 = vrot.lane.b32.xlu0 %v4905_v41, %s4579_s23  ;;  %v6180_v7 = vld [vmem:[#allocation26_spill] sm:$0xff]  ;;  %v6181_v8 = vld [vmem:[#allocation29_spill] sm:$0xff]  ;;  %v1843_v14 = vunpack.c.l.s4 %v4580_v13  ;;  %vm1840_vm14 = vcmask 1047556   ;;  %v4581_v45 = vmov 1934713408   ;;  %vm2176_vm15 = vcmask 15360  }
 0x498   : > { %1807 = vrot.lane.b32.xlu2 %v4903_v40, %s4579_s23  ;;  %v1857_v24 = vunpack.c.l.s4 %v4581_v45  ;;  %s4068_s10 = sshll.u32 %s4550_s3, 3  ;;  %s4069_s1 = sshll.u32 %s6222_s11, 3  ;;  %vm2512_vm2 = vcmask 64512   ;;  %vm2593_vm3 = vcmask 1041409   ;;  %vm2595_vm4 = vcmask 1042434  }
 0x499   : > { %v5445_v23 = vunpack.c.0.s8 %v1843_v14  ;;  %vm2597_vm5 = vcmask 1043459   ;;  %vm2599_vm6 = vcmask 1044484   ;;  %vm2601_vm7 = vcmask 1045509   ;;  %s6184_s16 = sld [smem:[#allocation17_spill]] }
 0x49a   : > { %v5453_v17 = vunpack.c.0.s8 %v1857_v24  ;;  %vm2603_vm8 = vcmask 1046534   ;;  %vm2605_vm9 = vcmask 1047559   ;;  %vm3051_vm10 = vcmask 1043456  }
 0x49b   : > { %v6179_v6 = vld [vmem:[#allocation31_spill] sm:$0xff] }
 0x49c   : > { %v6175_v2 = vld [vmem:[#allocation32_spill] sm:$0xff] }
 0x49f   : > { %1803 = vrot.lane.b32.xlu1 %v4917_v55, %s4579_s23  ;;  %1819 = vrot.lane.b32.xlu0 %v4921_v27, %s4579_s23  ;;  %p4086_p3 = scmp.ne.s32.totalorder %s6184_s16, 1 }
 0x4a0   : > { %1811 = vrot.lane.b32.xlu2 %v4919_v26, %s4579_s23  ;;  %s3391_s25 = sld [smem:[#allocation6]] (!%p4086_p3) }
 0x4a7   : > { %1795 = vrot.lane.b32.xlu1 %v4915_v54, %s4579_s23  ;;  %1791 = vrot.lane.b32.xlu0 %v4899_v30, %s4579_s23 }
 0x4a8   : > { %1817 = vrot.lane.b32.xlu2 %v4913_v53, %s4579_s23 }
 0x4af   : > { %1821 = vrot.lane.b32.xlu0 %v6175_v2, %s4579_s23  ;;  %1801 = vrot.lane.b32.xlu1 %v6176_v3, %s4579_s23 }
 0x4b0   : > { %1805 = vrot.lane.b32.xlu2 %v6177_v4, %s4579_s23 }
 0x4b7   : > { %1809 = vrot.lane.b32.xlu0 %v6178_v5, %s4579_s23  ;;  %1813 = vrot.lane.b32.xlu1 %v6179_v6, %s4579_s23 }
 0x4b8   : > { %1793 = vrot.lane.b32.xlu2 %v6180_v7, %s4579_s23 }
 0x4bf   : > { %1797 = vrot.lane.b32.xlu0 %v6181_v8, %s4579_s23 }
 0x4f2   : > { %v1808_v9 = vpop.permute.xlu2 %1807 }
 0x4f3   : > { %v1839_v29 = vrot.slane %v1808_v9, 4 }
 0x4fa   : > { %v1812_v12 = vpop.permute.xlu2 %1811 }
 0x4fb   : > { %v1868_v52 = vrot.slane %v1812_v12, 4 }
 0x502   : > { %v1818_v59 = vpop.permute.xlu2 %1817 }
 0x503   : > { %v1902_v44 = vrot.slane %v1818_v59, 4 }
 0x509   : > { %v1800_v10 = vpop.permute.xlu1 %1799  ;;  %v1816_v11 = vpop.permute.xlu0 %1815 }
 0x50a   : > { %v1846_v15 = vrot.slane %v1816_v11, 4  ;;  %v1806_v16 = vpop.permute.xlu2 %1805 }
 0x50c   : > { %v1847_v43 = vsel %vm1840_vm14, %v1846_v15, %v1800_v10 }
 0x50d   : > { %v1851_v21 = vperm.slane %v1847_v43, %v5445_v23 }
 0x50f   : > { %v1852_v32 = vrot.slane %v1851_v21, 4 }
 0x511   : > { %v1804_v49 = vpop.permute.xlu1 %1803  ;;  %v1820_v22 = vpop.permute.xlu0 %1819 }
 0x512   : > { %v1874_v35 = vrot.slane %v1820_v22, 4 }
 0x514   : > { %v1875_v48 = vsel %vm1840_vm14, %v1874_v35, %v1804_v49 }
 0x515   : > { %v1879_v50 = vperm.slane %v1875_v48, %v5445_v23 }
 0x517   : > { %v1880_v39 = vrot.slane %v1879_v50, 4 }
 0x519   : > { %v1796_v57 = vpop.permute.xlu1 %1795  ;;  %v1792_v60 = vpop.permute.xlu0 %1791 }
 0x51a   : > { %v1869_v20 = vsel %vm1840_vm14, %v1868_v52, %v1796_v57  ;;  %v1841_v19 = vsel %vm1840_vm14, %v1839_v29, %v1792_v60  ;;  %v2160_v57 = vld [vmem:[#allocation2] sm:$0xf] }
 0x51b   : > { %v1873_v56 = vperm.slane %v1869_v20, %v5445_v23  ;;  %v1845_v62 = vperm.slane %v1841_v19, %v5445_v23 }
 0x51d   : > { %v1882_v46 = vrot.slane %v1873_v56, 4  ;;  %v1854_v47 = vrot.slane %v1845_v62, 4  ;;  %v1853_v37 = vsel %vm1840_vm14, %v1852_v32, %v1845_v62  ;;  %v1881_v58 = vsel %vm1840_vm14, %v1880_v39, %v1873_v56 }
 0x51e   : > { %v1859_v61 = vperm.slane %v1853_v37, %v5453_v17  ;;  %v1887_v28 = vperm.slane %v1881_v58, %v5453_v17 }
 0x51f   : > { %v1855_v63 = vsel %vm1840_vm14, %v1851_v21, %v1854_v47  ;;  %v1883_v38 = vsel %vm1840_vm14, %v1879_v50, %v1882_v46  ;;  %v1794_v46 = vpop.permute.xlu2 %1793  ;;  %v2161_v47 = vld [vmem:[#allocation2 + $0x4] sm:$0xf] }
 0x520   : > { %v1954_v51 = vpack.i.b16 %v1887_v28, %v1859_v61  ;;  %v1955_v18 = vshrl.u32 %v1859_v61, 16  ;;  %v1956_v25 = vshrl.u32 %v1887_v28, 16  ;;  %v1863_v42 = vperm.slane %v1855_v63, %v5453_v17  ;;  %v2162_v63 = vld [vmem:[#allocation2 + $0x8] sm:$0xf] }
 0x521   : > { %v1822_v33 = vpop.permute.xlu0 %1821  ;;  %v1891_v36 = vperm.slane %v1883_v38, %v5453_v17  ;;  %v1864_v34 = vrot.slane %v1859_v61, 4  ;;  %v1892_v0 = vrot.slane %v1887_v28, 4  ;;  %v1802_v1 = vpop.permute.xlu1 %1801 }
 0x522   : > { %v2181_v9 = vsel %vm2176_vm15, %v1954_v51, 0  ;;  %v1957_v10 = vpack.i.b16 %v1956_v25, %v1955_v18  ;;  %v1903_v49 = vsel %vm1840_vm14, %v1902_v44, %v1802_v1  ;;  %v1967_v22 = vshrl.u32 %v1863_v42, 16  ;;  %v2163_v1 = vld [vmem:[#allocation2 + $0xc] sm:$0xf] }
 0x523   : > { %2190 = vmatpush.bf16.xpose.msra.mxu0 %v2181_v9  ;;  %v1966_v11 = vpack.i.b16 %v1891_v36, %v1863_v42  ;;  %v1865_v12 = vsel %vm1840_vm14, 0, %v1864_v34  ;;  %v1893_v13 = vsel %vm1840_vm14, 0, %v1892_v0  ;;  %v1930_v35 = vrot.slane %v1822_v33, 4 }
 0x524   : > { %v2200_v14 = vsel %vm2176_vm15, %v1957_v10, 0  ;;  %v1960_v15 = vpack.i.b16 %v1893_v13, %v1865_v12  ;;  %v1968_v48 = vshrl.u32 %v1891_v36, 16  ;;  %v1961_v52 = vshrl.u32 %v1865_v12, 16 }
 0x525   : > { %2209 = vmatpush.bf16.xpose.msra.mxu1 %v2200_v14  ;;  %v2257_v43 = vsel %vm2176_vm15, %v1966_v11, 0  ;;  %v1962_v45 = vshrl.u32 %v1893_v13, 16  ;;  %v1866_v24 = vrot.slane %v1863_v42, 4  ;;  %v1907_v21 = vperm.slane %v1903_v49, %v5445_v23 }
 0x526   : > { %v2219_v59 = vsel %vm2176_vm15, %v1960_v15, 0  ;;  %v1969_v50 = vpack.i.b16 %v1968_v48, %v1967_v22  ;;  %v1894_v29 = vrot.slane %v1891_v36, 4  ;;  %v1931_v19 = vsel %vm1840_vm14, %v1930_v35, %v1806_v16 }
 0x527   : > { %2228 = vmatpush.bf16.xpose.msra.mxu2 %v2219_v59  ;;  %v1963_v60 = vpack.i.b16 %v1962_v45, %v1961_v52  ;;  %v1867_v20 = vsel %vm1840_vm14, 0, %v1866_v24  ;;  %v1908_v44 = vrot.slane %v1907_v21, 4  ;;  %v1935_v25 = vperm.slane %v1931_v19, %v5445_v23  ;;  %v2164_v24 = vld [vmem:[#allocation2 + $0x10] sm:$0xf] }
 0x528   : > { %v2276_v32 = vsel %vm2176_vm15, %v1969_v50, 0  ;;  %v1895_v39 = vsel %vm1840_vm14, 0, %v1894_v29  ;;  %v1973_v62 = vshrl.u32 %v1867_v20, 16 }
 0x529   : > { %v1810_v56 = vpop.permute.xlu0 %1809  ;;  %v2238_v37 = vsel %vm2176_vm15, %v1963_v60, 0  ;;  %v1972_v58 = vpack.i.b16 %v1895_v39, %v1867_v20  ;;  %v1974_v28 = vshrl.u32 %v1895_v39, 16  ;;  %v1814_v16 = vpop.permute.xlu1 %1813  ;;  %v1936_v10 = vrot.slane %v1935_v25, 4  ;;  %v2165_v60 = vld [vmem:[#allocation2 + $0x14] sm:$0xf] }
 0x52a   : > { %v1896_v61 = vrot.slane %v1810_v56, 4  ;;  %4052 = vmatmul.msk.bf16.vlgmr.msra.gmra.mxu0 %vm2176_vm15, %v2160_v57  ;;  %2247 = vmatpush.bf16.xpose.msra.mxu3 %v2238_v37  ;;  %v1924_v36 = vrot.slane %v1814_v16, 4 }
 0x52b   : > { %2266 = vmatpush.bf16.xpose.msrb.mxu0 %v2257_v43  ;;  %v2295_v38 = vsel %vm2176_vm15, %v1972_v58, 0  ;;  %v1975_v51 = vpack.i.b16 %v1974_v28, %v1973_v62 }
 0x52c   : > { %v1897_v18 = vsel %vm1840_vm14, %v1896_v61, %v1794_v46  ;;  %4053 = vmatmul.msk.bf16.vlgmr.msra.gmra.mxu1 %vm2176_vm15, %v2161_v47  ;;  %v2166_v47 = vld [vmem:[#allocation2 + $0x18] sm:$0xf] }
 0x52d   : > { %2285 = vmatpush.bf16.xpose.msrb.mxu1 %v2276_v32  ;;  %v1901_v42 = vperm.slane %v1897_v18, %v5445_v23  ;;  %v2314_v33 = vsel %vm2176_vm15, %v1975_v51, 0 }
 0x52e   : > { %4054 = vmatmul.msk.bf16.vlgmr.msra.gmra.mxu2 %vm2176_vm15, %v2162_v63 }
 0x52f   : > { %2304 = vmatpush.bf16.xpose.msrb.mxu2 %v2295_v38  ;;  %v1909_v34 = vsel %vm1840_vm14, %v1908_v44, %v1901_v42  ;;  %v1910_v0 = vrot.slane %v1901_v42, 4 }
 0x530   : > { %v1915_v9 = vperm.slane %v1909_v34, %v5453_v17 }
 0x531   : > { %v1911_v11 = vsel %vm1840_vm14, %v1907_v21, %v1910_v0  ;;  %v1798_v12 = vpop.permute.xlu0 %1797  ;;  %4055 = vmatmul.msk.bf16.vlgmr.msra.gmra.mxu3 %vm2176_vm15, %v2163_v1 }
 0x532   : > { %2323 = vmatpush.bf16.xpose.msrb.mxu3 %v2314_v33  ;;  %v1925_v13 = vsel %vm1840_vm14, %v1924_v36, %v1798_v12  ;;  %v1919_v14 = vperm.slane %v1911_v11, %v5453_v17  ;;  %v1920_v15 = vrot.slane %v1915_v9, 4  ;;  %v1979_v59 = vshrl.u32 %v1915_v9, 16  ;;  %v2167_v36 = vld [vmem:[#allocation2 + $0x1c] sm:$0xf]  ;;  %v2168_v11 = vld [vmem:[#allocation2 + $0x20] sm:$0xf] }
 0x533   : > { %v1929_v49 = vperm.slane %v1925_v13, %v5445_v23  ;;  %v2169_v12 = vld [vmem:[#allocation2 + $0x24] sm:$0xf]  ;;  %v2170_v13 = vld [vmem:[#allocation2 + $0x28] sm:$0xf] }
 0x534   : > { %v1922_v43 = vrot.slane %v1919_v14, 4  ;;  %v1921_v52 = vsel %vm1840_vm14, 0, %v1920_v15  ;;  %v1991_v20 = vshrl.u32 %v1919_v14, 16  ;;  %v2172_v15 = vld [vmem:[#allocation2 + $0x30] sm:$0xf] }
 0x535   : > { %v1937_v22 = vsel %vm1840_vm14, %v1936_v10, %v1929_v49  ;;  %v1938_v35 = vrot.slane %v1929_v49, 4  ;;  %v1985_v19 = vshrl.u32 %v1921_v52, 16  ;;  %v2173_v49 = vld [vmem:[#allocation2 + $0x34] sm:$0xf] }
 0x536   : > { %v1943_v48 = vperm.slane %v1937_v22, %v5453_v17  ;;  %v1923_v32 = vsel %vm1840_vm14, 0, %v1922_v43  ;;  %v2174_v22 = vld [vmem:[#allocation2 + $0x38] sm:$0xf]  ;;  %v2481_v43 = vlaneseq }
 0x537   : > { %v1939_v45 = vsel %vm1840_vm14, %v1935_v25, %v1938_v35  ;;  %v1997_v16 = vshrl.u32 %v1923_v32, 16  ;;  %v2175_v35 = vld [vmem:[#allocation2 + $0x3c] sm:$0xf] }
 0x538   : > { %v1978_v21 = vpack.i.b16 %v1943_v48, %v1915_v9  ;;  %v1980_v50 = vshrl.u32 %v1943_v48, 16  ;;  %v1947_v29 = vperm.slane %v1939_v45, %v5453_v17  ;;  %v1948_v57 = vrot.slane %v1943_v48, 4 }
 0x539   : > { %v5521_v48 = vshrl.u32 %v2481_v43, 7  ;;  %v2489_v45 = vstv %s4069_s1 }
 0x53a   : > { %4056 = vmatmul.msk.bf16.vlgmr.msrb.gmra.mxu0 %vm2176_vm15, %v2164_v24  ;;  %v2333_v39 = vsel %vm2176_vm15, %v1978_v21, 0  ;;  %v1981_v56 = vpack.i.b16 %v1980_v50, %v1979_v59  ;;  %v1990_v62 = vpack.i.b16 %v1947_v29, %v1919_v14  ;;  %v1949_v46 = vsel %vm1840_vm14, 0, %v1948_v57  ;;  %v2171_v14 = vld [vmem:[#allocation2 + $0x2c] sm:$0xf] }
 0x53b   : > { %2342 = vmatpush.bf16.xpose.msra.mxu0 %v2333_v39  ;;  %v1984_v37 = vpack.i.b16 %v1949_v46, %v1921_v52  ;;  %v1992_v58 = vshrl.u32 %v1947_v29, 16  ;;  %v1986_v61 = vshrl.u32 %v1949_v46, 16  ;;  %v1950_v28 = vrot.slane %v1947_v29, 4  ;;  %4324 = vset.pattern.permute.xlu0 %v5521_v48 }
 0x53c   : > { %4057 = vmatmul.msk.bf16.vlgmr.msrb.gmra.mxu1 %vm2176_vm15, %v2165_v60  ;;  %v2352_v44 = vsel %vm2176_vm15, %v1981_v56, 0  ;;  %v2409_v63 = vsel %vm2176_vm15, %v1990_v62, 0  ;;  %4323 = vset.pattern.permute.xlu2 %v5521_v48  ;;  %v5528_v59 = vand.u32 127, %v2481_v43  ;;  %v2484_v52 = vstv %s4068_s10 }
 0x53d   : > { %2361 = vmatpush.bf16.xpose.msra.mxu1 %v2352_v44  ;;  %v2371_v38 = vsel %vm2176_vm15, %v1984_v37, 0  ;;  %v1993_v51 = vpack.i.b16 %v1992_v58, %v1991_v20  ;;  %v1987_v18 = vpack.i.b16 %v1986_v61, %v1985_v19  ;;  %v1951_v25 = vsel %vm1840_vm14, 0, %v1950_v28  ;;  %4322 = vset.pattern.permute.xlu1 %v5521_v48 }
 0x53e   : > { %4058 = vmatmul.msk.bf16.vlgmr.msrb.gmra.mxu2 %vm2176_vm15, %v2166_v47  ;;  %v1996_v42 = vpack.i.b16 %v1951_v25, %v1923_v32  ;;  %v1998_v33 = vshrl.u32 %v1951_v25, 16  ;;  %v2485_v24 = vadd.s32 %v2484_v52, %v5521_v48  ;;  %v2490_v21 = vadd.s32 %v2489_v45, %v5528_v59 }
 0x53f   : > { %2380 = vmatpush.bf16.xpose.msra.mxu2 %v2371_v38  ;;  %v2428_v34 = vsel %vm2176_vm15, %v1993_v51, 0  ;;  %v2390_v0 = vsel %vm2176_vm15, %v1987_v18, 0 }
 0x540   : > { %2399 = vmatpush.bf16.xpose.msra.mxu3 %v2390_v0  ;;  %v2447_v1 = vsel %vm2176_vm15, %v1996_v42, 0  ;;  %v1999_v9 = vpack.i.b16 %v1998_v33, %v1997_v16  ;;  %vm5532_vm1 = vcmp.eq.s32.totalorder %v2485_v24, %v2490_v21 }
 0x541   : > { %4059 = vmatmul.msk.bf16.vlgmr.msrb.gmra.mxu3 %vm2176_vm15, %v2167_v36 }
 0x542   : > { %v2466_v10 = vsel %vm2176_vm15, %v1999_v9, 0 }
 0x543   : > { %2418 = vmatpush.bf16.xpose.msrb.mxu0 %v2409_v63 }
 0x545   : > { %2437 = vmatpush.bf16.xpose.msrb.mxu1 %v2428_v34 }
 0x547   : > { %2456 = vmatpush.bf16.xpose.msrb.mxu2 %v2447_v1 }
 0x548   : > { %2475 = vmatpush.bf16.xpose.msrb.mxu3 %v2466_v10 }
 0x54a   : > { %4060 = vmatmul.msk.bf16.vlgmr.msra.gmra.mxu0 %vm2176_vm15, %v2168_v11 }
 0x54c   : > { %4061 = vmatmul.msk.bf16.vlgmr.msra.gmra.mxu1 %vm2176_vm15, %v2169_v12 }
 0x54e   : > { %4062 = vmatmul.msk.bf16.vlgmr.msra.gmra.mxu2 %vm2176_vm15, %v2170_v13 }
 0x551   : > { %4063 = vmatmul.msk.bf16.vlgmr.msra.gmra.mxu3 %vm2176_vm15, %v2171_v14 }
 0x55a   : > { %4064 = vmatmul.msk.bf16.vlgmr.msrb.gmra.mxu0 %vm2176_vm15, %v2172_v15 }
 0x55c   : > { %4065 = vmatmul.msk.bf16.vlgmr.msrb.gmra.mxu1 %vm2176_vm15, %v2173_v49 }
 0x55e   : > { %4066 = vmatmul.msk.bf16.vlgmr.msrb.gmra.mxu2 %vm2176_vm15, %v2174_v22 }
 0x561   : > { %4067 = vmatmul.msk.bf16.vlgmr.msrb.gmra.mxu3 %vm2176_vm15, %v2175_v35 }
 0x5a7   : > { %v2192_v29 = vpop.f32.mrf.mxu0 }
 0x5a8   : > { %v5538_v57 = vsel %vm5532_vm1, -inf, %v2192_v29 }
 0x5a9   : > { %v2211_v60 = vpop.f32.mrf.mxu1  ;;  %v2513_v20 = vsel %vm2512_vm2, %v5538_v57, -inf }
 0x5aa   : > { %v5544_v19 = vsel %vm5532_vm1, -inf, %v2211_v60  ;;  %2514 = vmax.xlane.f32.xlu1 %v2513_v20 }
 0x5ab   : > { %v2516_v32 = vsel %vm2512_vm2, %v5544_v19, -inf }
 0x5ac   : > { %2517 = vmax.xlane.f32.xlu2 %v2516_v32 }
 0x5af   : > { %v2194_v39 = vpop.f32.mrf.mxu0 }
 0x5b1   : > { %v2230_v56 = vpop.f32.mrf.mxu2  ;;  %v2213_v62 = vpop.f32.mrf.mxu1 }
 0x5b2   : > { %v5550_v46 = vsel %vm5532_vm1, -inf, %v2230_v56 }
 0x5b3   : > { %v2519_v47 = vsel %vm2512_vm2, %v5550_v46, -inf }
 0x5b4   : > { %2520 = vmax.xlane.f32.xlu0 %v2519_v47  ;;  %v2249_v37 = vpop.f32.mrf.mxu3 }
 0x5b5   : > { %v5556_v58 = vsel %vm5532_vm1, -inf, %v2249_v37 }
 0x5b6   : > { %v2522_v61 = vsel %vm2512_vm2, %v5556_v58, -inf }
 0x5b7   : > { %v2268_v28 = vpop.f32.mrf.mxu0  ;;  %2523 = vmax.xlane.f32.xlu2 %v2522_v61 }
 0x5b8   : > { %v5562_v44 = vsel %vm5532_vm1, -inf, %v2268_v28 }
 0x5b9   : > { %v2232_v63 = vpop.f32.mrf.mxu2  ;;  %v2287_v16 = vpop.f32.mrf.mxu1  ;;  %v2525_v38 = vsel %vm2512_vm2, %v5562_v44, -inf }
 0x5ba   : > { %v5568_v51 = vsel %vm5532_vm1, -inf, %v2287_v16  ;;  %2526 = vmax.xlane.f32.xlu1 %v2525_v38 }
 0x5bb   : > { %v2528_v25 = vsel %vm2512_vm2, %v5568_v51, -inf }
 0x5bc   : > { %v2251_v18 = vpop.f32.mrf.mxu3 }
 0x5bf   : > { %v2270_v42 = vpop.f32.mrf.mxu0  ;;  %2529 = vmax.xlane.f32.xlu2 %v2528_v25 }
 0x5c1   : > { %v2306_v33 = vpop.f32.mrf.mxu2  ;;  %v2289_v36 = vpop.f32.mrf.mxu1 }
 0x5c2   : > { %v5574_v34 = vsel %vm5532_vm1, -inf, %v2306_v33 }
 0x5c3   : > { %v2531_v0 = vsel %vm2512_vm2, %v5574_v34, -inf }
 0x5c4   : > { %2532 = vmax.xlane.f32.xlu0 %v2531_v0  ;;  %v2325_v1 = vpop.f32.mrf.mxu3 }
 0x5c5   : > { %v5580_v9 = vsel %vm5532_vm1, -inf, %v2325_v1 }
 0x5c6   : > { %v2534_v10 = vsel %vm2512_vm2, %v5580_v9, -inf }
 0x5c7   : > { %v2344_v11 = vpop.f32.mrf.mxu0  ;;  %2535 = vmax.xlane.f32.xlu1 %v2534_v10 }
 0x5c8   : > { %v5586_v12 = vsel %vm5532_vm1, -inf, %v2344_v11 }
 0x5c9   : > { %v2308_v13 = vpop.f32.mrf.mxu2  ;;  %v2363_v14 = vpop.f32.mrf.mxu1  ;;  %v2537_v15 = vsel %vm2512_vm2, %v5586_v12, -inf }
 0x5ca   : > { %v5592_v49 = vsel %vm5532_vm1, -inf, %v2363_v14  ;;  %2538 = vmax.xlane.f32.xlu2 %v2537_v15 }
 0x5cb   : > { %v2540_v22 = vsel %vm2512_vm2, %v5592_v49, -inf }
 0x5cc   : > { %2541 = vmax.xlane.f32.xlu0 %v2540_v22  ;;  %v2327_v35 = vpop.f32.mrf.mxu3 }
 0x5cf   : > { %v2346_v43 = vpop.f32.mrf.mxu0 }
 0x5d1   : > { %v2382_v52 = vpop.f32.mrf.mxu2  ;;  %v2365_v45 = vpop.f32.mrf.mxu1 }
 0x5d2   : > { %v5598_v24 = vsel %vm5532_vm1, -inf, %v2382_v52 }
 0x5d3   : > { %v2543_v21 = vsel %vm2512_vm2, %v5598_v24, -inf }
 0x5d4   : > { %2544 = vmax.xlane.f32.xlu1 %v2543_v21  ;;  %v2401_v29 = vpop.f32.mrf.mxu3 }
 0x5d5   : > { %v5604_v60 = vsel %vm5532_vm1, -inf, %v2401_v29 }
 0x5d6   : > { %v2546_v32 = vsel %vm2512_vm2, %v5604_v60, -inf }
 0x5d7   : > { %v2420_v20 = vpop.f32.mrf.mxu0  ;;  %2547 = vmax.xlane.f32.xlu2 %v2546_v32 }
 0x5d8   : > { %v5610_v39 = vsel %vm5532_vm1, -inf, %v2420_v20 }
 0x5d9   : > { %v2384_v56 = vpop.f32.mrf.mxu2  ;;  %v2439_v62 = vpop.f32.mrf.mxu1  ;;  %v2549_v47 = vsel %vm2512_vm2, %v5610_v39, -inf }
 0x5da   : > { %v5616_v37 = vsel %vm5532_vm1, -inf, %v2439_v62  ;;  %2550 = vmax.xlane.f32.xlu0 %v2549_v47 }
 0x5db   : > { %v2552_v61 = vsel %vm2512_vm2, %v5616_v37, -inf }
 0x5dc   : > { %2553 = vmax.xlane.f32.xlu1 %v2552_v61  ;;  %v2403_v28 = vpop.f32.mrf.mxu3 }
 0x5df   : > { %v2422_v63 = vpop.f32.mrf.mxu0 }
 0x5e1   : > { %v2458_v16 = vpop.f32.mrf.mxu2  ;;  %v2441_v38 = vpop.f32.mrf.mxu1 }
 0x5e2   : > { %v5622_v18 = vsel %vm5532_vm1, -inf, %v2458_v16  ;;  %v2510_v16 = vld [vmem:[#allocation3] sm:$0xff] }
 0x5e3   : > { %v2555_v25 = vsel %vm2512_vm2, %v5622_v18, -inf }
 0x5e4   : > { %2556 = vmax.xlane.f32.xlu2 %v2555_v25  ;;  %v2477_v42 = vpop.f32.mrf.mxu3 }
 0x5e5   : > { %v5628_v33 = vsel %vm5532_vm1, -inf, %v2477_v42 }
 0x5e6   : > { %v2558_v36 = vsel %vm2512_vm2, %v5628_v33, -inf }
 0x5e7   : > { %2559 = vmax.xlane.f32.xlu0 %v2558_v36 }
 0x5e9   : > { %v2460_v0 = vpop.f32.mrf.mxu2 }
 0x5ec   : > { %v2479_v1 = vpop.f32.mrf.mxu3 }
 0x61d   : > { %v2515_v11 = vpop.xlane.xlu1 %2514 }
 0x61e   : > { %v2577_v22 = vperm.slane %v2515_v11, %v5528_v59 }
 0x61f   : > { %v2518_v10 = vpop.xlane.xlu2 %2517 }
 0x620   : > { %v2578_v15 = vperm.slane %v2518_v10, %v5528_v59 }
 0x622   : > { %v2594_v52 = vsel %vm2593_vm3, %v2578_v15, %v2577_v22 }
 0x627   : > { %v2521_v14 = vpop.xlane.xlu0 %2520 }
 0x628   : > { %v2579_v35 = vperm.slane %v2521_v14, %v5528_v59 }
 0x62a   : > { %v2524_v13 = vpop.xlane.xlu2 %2523  ;;  %v2596_v21 = vsel %vm2595_vm4, %v2579_v35, %v2594_v52 }
 0x62b   : > { %v2580_v45 = vperm.slane %v2524_v13, %v5528_v59 }
 0x62d   : > { %v2527_v50 = vpop.xlane.xlu1 %2526  ;;  %v2598_v56 = vsel %vm2597_vm5, %v2580_v45, %v2596_v21 }
 0x62e   : > { %v2581_v29 = vperm.slane %v2527_v50, %v5528_v59 }
 0x630   : > { %v2600_v47 = vsel %vm2599_vm6, %v2581_v29, %v2598_v56 }
 0x632   : > { %v2530_v43 = vpop.xlane.xlu2 %2529 }
 0x633   : > { %v2582_v20 = vperm.slane %v2530_v43, %v5528_v59 }
 0x635   : > { %v2602_v61 = vsel %vm2601_vm7, %v2582_v20, %v2600_v47 }
 0x637   : > { %v2533_v32 = vpop.xlane.xlu0 %2532 }
 0x638   : > { %v2583_v62 = vperm.slane %v2533_v32, %v5528_v59 }
 0x63a   : > { %v2604_v28 = vsel %vm2603_vm8, %v2583_v62, %v2602_v61  ;;  %v2536_v63 = vpop.xlane.xlu1 %2535 }
 0x63b   : > { %v2584_v38 = vperm.slane %v2536_v63, %v5528_v59 }
 0x63d   : > { %v2606_v25 = vsel %vm2605_vm9, %v2584_v38, %v2604_v28  ;;  %v2539_v10 = vpop.xlane.xlu2 %2538 }
 0x63e   : > { %v2616_v42 = vmax.f32 %v2510_v16, %v2606_v25  ;;  %v2585_v22 = vperm.slane %v2539_v10, %v5528_v59  ;;  %v2511_v10 = vld [vmem:[#allocation3 + $0x8] sm:$0xff] }
 0x63f   : > { %v2542_v11 = vpop.xlane.xlu0 %2541 }
 0x640   : > { %3385 = vst.msk [vmem:[#allocation3] sm:$0xff] %vm2512_vm2, %v2616_v42  ;;  %v2638_v36 = vperm.slane %v2616_v42, 2  ;;  %v2631_v0 = vperm.slane %v2616_v42, 1  ;;  %v2624_v1 = vperm.slane %v2616_v42, 0  ;;  %v2652_v14 = vperm.slane %v2616_v42, 4 }
 0x641   : > { %v2645_v15 = vperm.slane %v2616_v42, 3  ;;  %v2586_v35 = vperm.slane %v2542_v11, %v5528_v59  ;;  %v2666_v21 = vperm.slane %v2616_v42, 6  ;;  %v2659_v20 = vperm.slane %v2616_v42, 5 }
 0x642   : > { %2643 = vperm.xlu0 %4324, %v2638_v36   ;;  %2636 = vperm.xlu2 %4323, %v2631_v0   ;;  %v2673_v36 = vperm.slane %v2616_v42, 7 }
 0x643   : > { %2629 = vperm.xlu1 %4322, %v2624_v1   ;;  %v2607_v52 = vsel %vm2593_vm3, %v2586_v35, %v2585_v22 }
 0x647   : > { %v2545_v13 = vpop.xlane.xlu1 %2544 }
 0x648   : > { %v2587_v50 = vperm.slane %v2545_v13, %v5528_v59 }
 0x64a   : > { %2657 = vperm.xlu2 %4323, %v2652_v14   ;;  %v2548_v43 = vpop.xlane.xlu2 %2547  ;;  %v2608_v32 = vsel %vm2595_vm4, %v2587_v50, %v2607_v52 }
 0x64b   : > { %2650 = vperm.xlu1 %4322, %v2645_v15   ;;  %v2588_v29 = vperm.slane %v2548_v43, %v5528_v59  ;;  %v2618_v15 = vsub.f32 %v2510_v16, %v2616_v42 }
 0x64d   : > { %v2551_v45 = vpop.xlane.xlu0 %2550  ;;  %v2609_v47 = vsel %vm2597_vm5, %v2588_v29, %v2608_v32  ;;  %v2620_v43 = vmul.f32 1.442695, %v2618_v15 }
 0x64e   : > { %v2589_v56 = vperm.slane %v2551_v45, %v5528_v59 }
 0x64f   : > { %v2554_v62 = vpop.xlane.xlu1 %2553  ;;  %4325 = vpow2.f32 %v2620_v43 }
 0x650   : > { %v2590_v61 = vperm.slane %v2554_v62, %v5528_v59  ;;  %v2610_v28 = vsel %vm2599_vm6, %v2589_v56, %v2609_v47 }
 0x652   : > { %2671 = vperm.xlu2 %4323, %v2666_v21   ;;  %v2611_v25 = vsel %vm2601_vm7, %v2590_v61, %v2610_v28  ;;  %v2006_v28 = vrot.slane %v4905_v41, 4 }
 0x653   : > { %2664 = vperm.xlu1 %4322, %v2659_v20  }
 0x655   : > { %v5664_v29 = vpop.eup %4325 }
 0x656   : > { %v2902_v32 = vperm.slane %v5664_v29, 2  ;;  %v2895_v62 = vperm.slane %v5664_v29, 1  ;;  %v2888_v47 = vperm.slane %v5664_v29, 0  ;;  %v2923_v61 = vperm.slane %v5664_v29, 5 }
 0x657   : > { %v2557_v63 = vpop.xlane.xlu2 %2556 }
 0x658   : > { %v2591_v38 = vperm.slane %v2557_v63, %v5528_v59  ;;  %v2034_v63 = vrot.slane %v4921_v27, 4 }
 0x65a   : > { %v2612_v0 = vsel %vm2603_vm8, %v2591_v38, %v2611_v25  ;;  %v2560_v1 = vpop.xlane.xlu0 %2559  ;;  %v2000_v38 = vrot.slane %v4903_v40, 4  ;;  %v2007_v25 = vsel %vm1840_vm14, %v2006_v28, %v4901_v31 }
 0x65b   : > { %2678 = vperm.xlu1 %4322, %v2673_v36   ;;  %v2592_v11 = vperm.slane %v2560_v1, %v5528_v59  ;;  %v2028_v36 = vrot.slane %v4919_v26, 4  ;;  %v2011_v1 = vperm.slane %v2007_v25, %v5445_v23 }
 0x65c   : > { %v2001_v41 = vsel %vm1840_vm14, %v2000_v38, %v4899_v30 }
 0x65d   : > { %v2613_v13 = vsel %vm2605_vm9, %v2592_v11, %v2612_v0  ;;  %v2035_v0 = vsel %vm1840_vm14, %v2034_v63, %v4917_v55  ;;  %v2029_v40 = vsel %vm1840_vm14, %v2028_v36, %v4915_v54  ;;  %v2005_v27 = vperm.slane %v2001_v41, %v5445_v23 }
 0x65e   : > { %v2617_v14 = vmax.f32 %v2511_v10, %v2613_v13  ;;  %v2012_v31 = vrot.slane %v2011_v1, 4  ;;  %v2033_v26 = vperm.slane %v2029_v40, %v5445_v23  ;;  %v2909_v55 = vperm.slane %v5664_v29, 3 }
 0x660   : > { %3386 = vst.msk [vmem:[#allocation3 + $0x8] sm:$0xff] %vm2512_vm2, %v2617_v14  ;;  %v2701_v22 = vperm.slane %v2617_v14, 3  ;;  %v2694_v35 = vperm.slane %v2617_v14, 2  ;;  %v2680_v50 = vperm.slane %v2617_v14, 0  ;;  %v2722_v52 = vperm.slane %v2617_v14, 6 }
 0x661   : > { %v2687_v45 = vperm.slane %v2617_v14, 1  ;;  %v2729_v21 = vperm.slane %v2617_v14, 7  ;;  %v2619_v20 = vsub.f32 %v2511_v10, %v2617_v14  ;;  %v2715_v16 = vperm.slane %v2617_v14, 5 }
 0x662   : > { %2699 = vperm.xlu0 %4324, %v2694_v35   ;;  %2685 = vperm.xlu2 %4323, %v2680_v50   ;;  %v2708_v42 = vperm.slane %v2617_v14, 4  ;;  %v2039_v10 = vperm.slane %v2035_v0, %v5445_v23  ;;  %v2916_v14 = vperm.slane %v5664_v29, 4 }
 0x663   : > { %2706 = vperm.xlu1 %4322, %v2701_v22   ;;  %v2622_v56 = vmul.f32 1.442695, %v2619_v20  ;;  %v2013_v22 = vsel %vm1840_vm14, %v2012_v31, %v2005_v27 }
 0x664   : > { %v2040_v13 = vrot.slane %v2039_v10, 4  ;;  %v2019_v30 = vperm.slane %v2013_v22, %v5453_v17 }
 0x665   : > { %4327 = vpow2.f32 %v2622_v56 }
 0x666   : > { %v2041_v35 = vsel %vm1840_vm14, %v2040_v13, %v2033_v26  ;;  %v2115_v50 = vshrl.u32 %v2019_v30, 16 }
 0x667   : > { %v2047_v54 = vperm.slane %v2041_v35, %v5453_v17 }
 0x669   : > { %v2116_v43 = vshrl.u32 %v2047_v54, 16  ;;  %v2114_v36 = vpack.i.b16 %v2047_v54, %v2019_v30 }
 0x66a   : > { %2727 = vperm.xlu0 %4324, %v2722_v52   ;;  %2692 = vperm.xlu2 %4323, %v2687_v45   ;;  %v2930_v45 = vperm.slane %v5664_v29, 6 }
 0x66b   : > { %2734 = vperm.xlu1 %4322, %v2729_v21   ;;  %v5680_v11 = vpop.eup %4327  ;;  %v2117_v52 = vpack.i.b16 %v2116_v43, %v2115_v50  ;;  %v2937_v21 = vperm.slane %v5664_v29, 7  ;;  %v3053_v40 = vsel %vm3051_vm10, %v2114_v36, 0  ;;  %v2056_v36 = vrot.slane %v6178_v5, 4 }
 0x66c   : > { %v2944_v15 = vperm.slane %v5680_v11, 0  ;;  %v2972_v56 = vperm.slane %v5680_v11, 4  ;;  %3062 = vmatpush.bf16.msra.mxu0 %v3053_v40 }
 0x66d   : > { %v3072_v20 = vsel %vm3051_vm10, %v2117_v52, 0 }
 0x66e   : > { %3081 = vmatpush.bf16.msra.mxu1 %v3072_v20 }
 0x672   : > { %2720 = vperm.xlu0 %4324, %v2715_v16   ;;  %2713 = vperm.xlu2 %4323, %v2708_v42   ;;  %v2965_v16 = vperm.slane %v5680_v11, 3  ;;  %v2958_v42 = vperm.slane %v5680_v11, 2 }
 0x673   : > { %2907 = vperm.xlu1 %4322, %v2902_v32   ;;  %v2951_v32 = vperm.slane %v5680_v11, 1 }
 0x67a   : > { %2900 = vperm.xlu0 %4324, %v2895_v62   ;;  %2893 = vperm.xlu2 %4323, %v2888_v47   ;;  %v2024_v62 = vrot.slane %v2019_v30, 4  ;;  %v2052_v47 = vrot.slane %v2047_v54, 4 }
 0x67b   : > { %2928 = vperm.xlu1 %4322, %v2923_v61  }
 0x67c   : > { %v2025_v63 = vsel %vm1840_vm14, 0, %v2024_v62  ;;  %v2053_v38 = vsel %vm1840_vm14, 0, %v2052_v47 }
 0x67d   : > { %v2120_v25 = vpack.i.b16 %v2053_v38, %v2025_v63  ;;  %v2121_v31 = vshrl.u32 %v2025_v63, 16  ;;  %v2122_v13 = vshrl.u32 %v2053_v38, 16  ;;  %v2062_v63 = vrot.slane %v4913_v53, 4 }
 0x67e   : > { %v2090_v38 = vrot.slane %v6175_v2, 4  ;;  %v2057_v2 = vsel %vm1840_vm14, %v2056_v36, %v6180_v7 }
 0x67f   : > { %v3091_v41 = vsel %vm3051_vm10, %v2120_v25, 0 }
 0x680   : > { %3100 = vmatpush.bf16.msra.mxu2 %v3091_v41 }
 0x682   : > { %2914 = vperm.xlu0 %4324, %v2909_v55   ;;  %2921 = vperm.xlu2 %4323, %v2916_v14   ;;  %v2123_v55 = vpack.i.b16 %v2122_v13, %v2121_v31  ;;  %v2063_v31 = vsel %vm1840_vm14, %v2062_v63, %v6176_v3  ;;  %v2091_v13 = vsel %vm1840_vm14, %v2090_v38, %v6177_v4 }
 0x683   : > { %2949 = vperm.xlu1 %4322, %v2944_v15   ;;  %v2042_v15 = vrot.slane %v2033_v26, 4  ;;  %v5732_v5 = vperm.slane %v2063_v31, %v5445_v23  ;;  %v5741_v4 = vperm.slane %v2091_v13, %v5445_v23 }
 0x684   : > { %v3110_v14 = vsel %vm3051_vm10, %v2123_v55, 0 }
 0x685   : > { %3119 = vmatpush.bf16.msra.mxu3 %v3110_v14  ;;  %v2043_v54 = vsel %vm1840_vm14, %v2039_v10, %v2042_v15  ;;  %v2068_v15 = vrot.slane %v5732_v5, 4 }
 0x686   : > { %v2051_v43 = vperm.slane %v2043_v54, %v5453_v17 }
 0x68a   : > { %2935 = vperm.xlu0 %4324, %v2930_v45   ;;  %2942 = vperm.xlu2 %4323, %v2937_v21   ;;  %v2054_v21 = vrot.slane %v2051_v43, 4 }
 0x68b   : > { %2970 = vperm.xlu1 %4322, %v2965_v16   ;;  %v2128_v16 = vshrl.u32 %v2051_v43, 16 }
 0x68c   : > { %v2055_v26 = vsel %vm1840_vm14, 0, %v2054_v21 }
 0x692   : > { %2963 = vperm.xlu2 %4323, %v2958_v42   ;;  %2956 = vperm.xlu0 %4324, %v2951_v32  }
 0x69a   : > { %2977 = vperm.xlu0 %4324, %v2972_v56  }
 0x69c   : > { %v2637_v61 = vpop.permute.xlu2 %2636 }
 0x69d   : > { %v2737_v28 = vsub.f32 %v5544_v19, %v2637_v61  ;;  %v2014_v19 = vrot.slane %v2005_v27, 4  ;;  %v2134_v61 = vshrl.u32 %v2055_v26, 16 }
 0x69f   : > { %v2754_v0 = vmul.f32 1.442695, %v2737_v28  ;;  %v2015_v30 = vsel %vm1840_vm14, %v2011_v1, %v2014_v19  ;;  %v5736_v19 = vperm.slane %v2057_v2, %v5445_v23 }
 0x6a0   : > { %v2023_v50 = vperm.slane %v2015_v30, %v5453_v17 }
 0x6a1   : > { %4329 = vpow2.f32 %v2754_v0  ;;  %v2069_v30 = vsel %vm1840_vm14, %v2068_v15, %v5736_v19  ;;  %v2070_v2 = vrot.slane %v5736_v19, 4 }
 0x6a2   : > { %v2026_v45 = vrot.slane %v2023_v50, 4  ;;  %v2127_v20 = vshrl.u32 %v2023_v50, 16  ;;  %v2126_v32 = vpack.i.b16 %v2051_v43, %v2023_v50  ;;  %v2075_v54 = vperm.slane %v2069_v30, %v5453_v17 }
 0x6a4   : > { %v2658_v52 = vpop.permute.xlu2 %2657  ;;  %v2027_v27 = vsel %vm1840_vm14, 0, %v2026_v45  ;;  %v2129_v1 = vpack.i.b16 %v2128_v16, %v2127_v20  ;;  %v3129_v62 = vsel %vm3051_vm10, %v2126_v32, 0  ;;  %v2080_v21 = vrot.slane %v2075_v54, 4 }
 0x6a5   : > { %v2132_v42 = vpack.i.b16 %v2055_v26, %v2027_v27  ;;  %v2740_v10 = vsub.f32 %v5562_v44, %v2658_v52  ;;  %v2133_v47 = vshrl.u32 %v2027_v27, 16  ;;  %3138 = vmatpush.bf16.msrb.mxu0 %v3129_v62  ;;  %v2084_v44 = vrot.slane %v6179_v6, 4 }
 0x6a6   : > { %v3148_v28 = vsel %vm3051_vm10, %v2129_v1, 0  ;;  %v2139_v20 = vshrl.u32 %v2075_v54, 16  ;;  %v2081_v32 = vsel %vm1840_vm14, 0, %v2080_v21 }
 0x6a7   : > { %v4330_v22 = vpop.eup %4329  ;;  %v3167_v56 = vsel %vm3051_vm10, %v2132_v42, 0  ;;  %3157 = vmatpush.bf16.msrb.mxu1 %v3148_v28  ;;  %v2135_v25 = vpack.i.b16 %v2134_v61, %v2133_v47  ;;  %v2760_v0 = vmul.f32 1.442695, %v2740_v10  ;;  %v2085_v3 = vsel %vm1840_vm14, %v2084_v44, %v6181_v8 }
 0x6a8   : > { %v3033_v35 = vpack.c.bf16 %v4330_v22, %v4330_v22  ;;  %3176 = vmatpush.bf16.msrb.mxu2 %v3167_v56  ;;  %v5745_v7 = vperm.slane %v2085_v3, %v5445_v23  ;;  %v2791_v8 = vsel %vm2512_vm2, %v4330_v22, 0.0  ;;  %v2145_v44 = vshrl.u32 %v2081_v32, 16 }
 0x6a9   : > { %v3186_v53 = vsel %vm3051_vm10, %v2135_v25, 0  ;;  %4331 = vpow2.f32 %v2760_v0 }
 0x6aa   : > { %4071 = vmatmul.msk.bf16.vlgmr.msra.gmra.mxu1 %vm2512_vm2, %v3033_v35  ;;  %3195 = vmatpush.bf16.msrb.mxu3 %v3186_v53 }
 0x6ac   : > { %v2672_v41 = vpop.permute.xlu2 %2671 }
 0x6ad   : > { %v2742_v52 = vsub.f32 %v5574_v34, %v2672_v41 }
 0x6af   : > { %v5756_v42 = vpop.eup %4331  ;;  %v2764_v61 = vmul.f32 1.442695, %v2742_v52 }
 0x6b0   : > { %v2800_v36 = vsel %vm2512_vm2, %v5756_v42, 0.0 }
 0x6b4   : > { %v2644_v40 = vpop.permute.xlu0 %2643 }
 0x6b5   : > { %v2630_v55 = vpop.permute.xlu1 %2629  ;;  %v2738_v14 = vsub.f32 %v5550_v46, %v2644_v40 }
 0x6b6   : > { %v2736_v6 = vsub.f32 %v5538_v57, %v2630_v55  ;;  %v2096_v57 = vrot.slane %v5741_v4, 4 }
 0x6b7   : > { %v2756_v46 = vmul.f32 1.442695, %v2738_v14 }
 0x6b8   : > { %v2752_v35 = vmul.f32 1.442695, %v2736_v6  ;;  %v2097_v50 = vsel %vm1840_vm14, %v2096_v57, %v5745_v7  ;;  %v2098_v6 = vrot.slane %v5745_v7, 4  ;;  %v2071_v57 = vsel %vm1840_vm14, %v5732_v5, %v2070_v2 }
 0x6b9   : > { %4333 = vpow2.f32 %v2756_v46  ;;  %v2103_v43 = vperm.slane %v2097_v50, %v5453_v17 }
 0x6ba   : > { %4335 = vpow2.f32 %v2752_v35  ;;  %v2099_v19 = vsel %vm1840_vm14, %v5741_v4, %v2098_v6 }
 0x6bb   : > { %2792 = vadd.xlane.f32.xlu2 %v2791_v8  ;;  %v2108_v27 = vrot.slane %v2103_v43, 4  ;;  %v2140_v26 = vshrl.u32 %v2103_v43, 16  ;;  %v2138_v1 = vpack.i.b16 %v2103_v43, %v2075_v54  ;;  %v2107_v7 = vperm.slane %v2099_v19, %v5453_v17 }
 0x6bc   : > { %v2686_v45 = vpop.permute.xlu2 %2685 }
 0x6bd   : > { %v2651_v16 = vpop.permute.xlu1 %2650  ;;  %v2109_v56 = vsel %vm1840_vm14, 0, %v2108_v27  ;;  %v2141_v62 = vpack.i.b16 %v2140_v26, %v2139_v20  ;;  %v3205_v41 = vsel %vm3051_vm10, %v2138_v1, 0  ;;  %v2744_v15 = vsub.f32 %v5586_v12, %v2686_v45 }
 0x6be   : > { %v2739_v22 = vsub.f32 %v5556_v58, %v2651_v16  ;;  %v2144_v63 = vpack.i.b16 %v2109_v56, %v2081_v32  ;;  %v2146_v0 = vshrl.u32 %v2109_v56, 16  ;;  %v2110_v20 = vrot.slane %v2107_v7, 4 }
 0x6bf   : > { %v4334_v10 = vpop.eup %4333  ;;  %v3224_v31 = vsel %vm3051_vm10, %v2141_v62, 0  ;;  %v2768_v43 = vmul.f32 1.442695, %v2744_v15  ;;  %v2152_v16 = vshrl.u32 %v2107_v7, 16  ;;  %v3036_v27 = vpack.c.bf16 %v5756_v42, %v5756_v42 }
 0x6c0   : > { %v4336_v47 = vpop.eup %4335  ;;  %v3034_v34 = vpack.c.bf16 %v4334_v10, %v4334_v10  ;;  %v2758_v28 = vmul.f32 1.442695, %v2739_v22  ;;  %v3243_v58 = vsel %vm3051_vm10, %v2144_v63, 0  ;;  %v2794_v40 = vsel %vm2512_vm2, %v4334_v10, 0.0  ;;  %3233 = vmatpush.bf16.msra.mxu1 %v3224_v31 }
 0x6c1   : > { %v3032_v38 = vpack.c.bf16 %v4336_v47, %v4336_v47  ;;  %v2788_v25 = vsel %vm2512_vm2, %v4336_v47, 0.0  ;;  %v2147_v14 = vpack.i.b16 %v2146_v0, %v2145_v44  ;;  %v2111_v32 = vsel %vm1840_vm14, 0, %v2110_v20 }
 0x6c2   : > { %4337 = vpow2.f32 %v2758_v28  ;;  %2789 = vadd.xlane.f32.xlu1 %v2788_v25  ;;  %4072 = vmatmul.msk.bf16.vlgmr.msra.gmra.mxu2 %vm2512_vm2, %v3034_v34  ;;  %v2158_v63 = vshrl.u32 %v2111_v32, 16 }
 0x6c3   : > { %4070 = vmatmul.msk.bf16.vlgmr.msra.gmra.mxu0 %vm2512_vm2, %v3032_v38  ;;  %2801 = vadd.xlane.f32.xlu2 %v2800_v36  ;;  %4339 = vpow2.f32 %v2764_v61  ;;  %v3262_v54 = vsel %vm3051_vm10, %v2147_v14, 0 }
 0x6c4   : > { %v2693_v13 = vpop.permute.xlu2 %2692  ;;  %2795 = vadd.xlane.f32.xlu0 %v2794_v40  ;;  %3252 = vmatpush.bf16.msra.mxu2 %v3243_v58 }
 0x6c5   : > { %v2665_v55 = vpop.permute.xlu1 %2664  ;;  %3214 = vmatpush.bf16.msra.mxu0 %v3205_v41  ;;  %v2745_v3 = vsub.f32 %v5592_v49, %v2693_v13 }
 0x6c6   : > { %v2741_v53 = vsub.f32 %v5568_v51, %v2665_v55  ;;  %v2079_v51 = vperm.slane %v2071_v57, %v5453_v17 }
 0x6c7   : > { %v2770_v49 = vmul.f32 1.442695, %v2745_v3 }
 0x6c8   : > { %v4338_v46 = vpop.eup %4337  ;;  %v2762_v35 = vmul.f32 1.442695, %v2741_v53  ;;  %v2082_v12 = vrot.slane %v2079_v51, 4  ;;  %v2151_v5 = vshrl.u32 %v2079_v51, 16  ;;  %v2150_v26 = vpack.i.b16 %v2107_v7, %v2079_v51 }
 0x6c9   : > { %v3035_v30 = vpack.c.bf16 %v4338_v46, %v4338_v46  ;;  %v2797_v8 = vsel %vm2512_vm2, %v4338_v46, 0.0  ;;  %v4340_v50 = vpop.eup %4339 }
 0x6ca   : > { %4341 = vpow2.f32 %v2762_v35  ;;  %2798 = vadd.xlane.f32.xlu1 %v2797_v8  ;;  %v2083_v21 = vsel %vm1840_vm14, 0, %v2082_v12  ;;  %v3038_v22 = vpack.c.bf16 %v4340_v50, %v4340_v50  ;;  %v2153_v1 = vpack.i.b16 %v2152_v16, %v2151_v5 }
 0x6cb   : > { %4073 = vmatmul.msk.bf16.vlgmr.msra.gmra.mxu3 %vm2512_vm2, %v3035_v30  ;;  %4343 = vpow2.f32 %v2770_v49  ;;  %v2806_v47 = vsel %vm2512_vm2, %v4340_v50, 0.0  ;;  %v2156_v61 = vpack.i.b16 %v2111_v32, %v2083_v21  ;;  %v2157_v42 = vshrl.u32 %v2083_v21, 16 }
 0x6cc   : > { %3271 = vmatpush.bf16.msra.mxu3 %v3262_v54  ;;  %v2714_v45 = vpop.permute.xlu2 %2713  ;;  %4345 = vpow2.f32 %v2768_v43  ;;  %v3281_v38 = vsel %vm3051_vm10, %v2150_v26, 0 }
 0x6cd   : > { %v2679_v52 = vpop.permute.xlu1 %2678  ;;  %v2748_v62 = vsub.f32 %v5610_v39, %v2714_v45  ;;  %v3300_v39 = vsel %vm3051_vm10, %v2153_v1, 0  ;;  %v2159_v41 = vpack.i.b16 %v2158_v63, %v2157_v42  ;;  %v2993_v1 = vperm.slane %v5680_v11, 7  ;;  %v3001_v63 = vld [vmem:[#allocation5 + $0x8] sm:$0xff] }
 0x6ce   : > { %v2743_v4 = vsub.f32 %v5580_v9, %v2679_v52  ;;  %v3319_v9 = vsel %vm3051_vm10, %v2156_v61, 0 }
 0x6cf   : > { %v2776_v25 = vmul.f32 1.442695, %v2748_v62  ;;  %v3338_v3 = vsel %vm3051_vm10, %v2159_v41, 0 }
 0x6d0   : > { %v4342_v10 = vpop.eup %4341  ;;  %v2766_v56 = vmul.f32 1.442695, %v2743_v4 }
 0x6d1   : > { %v3037_v34 = vpack.c.bf16 %v4342_v10, %v4342_v10  ;;  %v2803_v28 = vsel %vm2512_vm2, %v4342_v10, 0.0  ;;  %v4344_v44 = vpop.eup %4343  ;;  %v2986_v10 = vperm.slane %v5680_v11, 6 }
 0x6d2   : > { %4347 = vpow2.f32 %v2766_v56  ;;  %2807 = vadd.xlane.f32.xlu1 %v2806_v47  ;;  %2804 = vadd.xlane.f32.xlu0 %v2803_v28  ;;  %v4346_v31 = vpop.eup %4345  ;;  %v2815_v53 = vsel %vm2512_vm2, %v4344_v44, 0.0  ;;  %v3041_v5 = vpack.c.bf16 %v4344_v44, %v4344_v44  ;;  %v2979_v56 = vperm.slane %v5680_v11, 5 }
 0x6d3   : > { %4074 = vmatmul.msk.bf16.vlgmr.msrb.gmra.mxu0 %vm2512_vm2, %v3036_v27  ;;  %4075 = vmatmul.msk.bf16.vlgmr.msrb.gmra.mxu1 %vm2512_vm2, %v3037_v34  ;;  %4349 = vpow2.f32 %v2776_v25  ;;  %v3040_v12 = vpack.c.bf16 %v4346_v31, %v4346_v31 }
 0x6d4   : > { %4076 = vmatmul.msk.bf16.vlgmr.msrb.gmra.mxu2 %vm2512_vm2, %v3038_v22  ;;  %v2700_v36 = vpop.permute.xlu0 %2699  ;;  %3290 = vmatpush.bf16.msrb.mxu0 %v3281_v38  ;;  %v2894_v61 = vpop.permute.xlu2 %2893 }
 0x6d5   : > { %v2707_v58 = vpop.permute.xlu1 %2706  ;;  %v2746_v0 = vsub.f32 %v5598_v24, %v2700_v36  ;;  %3328 = vmatpush.bf16.msrb.mxu2 %v3319_v9  ;;  %3309 = vmatpush.bf16.msrb.mxu1 %v3300_v39  ;;  %v2812_v24 = vsel %vm2512_vm2, %v4346_v31, 0.0 }
 0x6d6   : > { %v2747_v40 = vsub.f32 %v5604_v60, %v2707_v58 }
 0x6d7   : > { %v2772_v13 = vmul.f32 1.442695, %v2746_v0 }
 0x6d8   : > { %v4348_v55 = vpop.eup %4347  ;;  %v2774_v14 = vmul.f32 1.442695, %v2747_v40 }
 0x6d9   : > { %v3039_v2 = vpack.c.bf16 %v4348_v55, %v4348_v55  ;;  %4351 = vpow2.f32 %v2772_v13  ;;  %v2809_v6 = vsel %vm2512_vm2, %v4348_v55, 0.0  ;;  %v4350_v35 = vpop.eup %4349 }
 0x6da   : > { %4353 = vpow2.f32 %v2774_v14  ;;  %2810 = vadd.xlane.f32.xlu2 %v2809_v6  ;;  %2816 = vadd.xlane.f32.xlu1 %v2815_v53  ;;  %v2824_v7 = vsel %vm2512_vm2, %v4350_v35, 0.0  ;;  %v3044_v22 = vpack.c.bf16 %v4350_v35, %v4350_v35  ;;  %v3000_v14 = vld [vmem:[#allocation5] sm:$0xff] }
 0x6db   : > { %2813 = vadd.xlane.f32.xlu0 %v2812_v24  ;;  %4077 = vmatmul.msk.bf16.vlgmr.msrb.gmra.mxu3 %vm2512_vm2, %v3039_v2  ;;  %v3016_v6 = vmul.f32 %v3000_v14, %v2894_v61 }
 0x6dc   : > { %v2728_v60 = vpop.permute.xlu0 %2727  ;;  %3347 = vmatpush.bf16.msrb.mxu3 %v3338_v3  ;;  %v2922_v42 = vpop.permute.xlu2 %2921 }
 0x6dd   : > { %v2735_v46 = vpop.permute.xlu1 %2734  ;;  %v2750_v15 = vsub.f32 %v5622_v18, %v2728_v60  ;;  %v3002_v60 = vld [vmem:[#allocation5 + $0x10] sm:$0xff] }
 0x6de   : > { %v2751_v57 = vsub.f32 %v5628_v33, %v2735_v46 }
 0x6df   : > { %v4352_v30 = vpop.eup %4351  ;;  %v2780_v8 = vmul.f32 1.442695, %v2750_v15 }
 0x6e0   : > { %v4354_v54 = vpop.eup %4353  ;;  %v3042_v51 = vpack.c.bf16 %v4352_v30, %v4352_v30  ;;  %v2782_v19 = vmul.f32 1.442695, %v2751_v57  ;;  %v2818_v49 = vsel %vm2512_vm2, %v4352_v30, 0.0 }
 0x6e1   : > { %4355 = vpow2.f32 %v2780_v8  ;;  %v2821_v50 = vsel %vm2512_vm2, %v4354_v54, 0.0  ;;  %v3043_v20 = vpack.c.bf16 %v4354_v54, %v4354_v54 }
 0x6e2   : > { %4357 = vpow2.f32 %v2782_v19  ;;  %2825 = vadd.xlane.f32.xlu1 %v2824_v7  ;;  %2819 = vadd.xlane.f32.xlu2 %v2818_v49 }
 0x6e3   : > { %2822 = vadd.xlane.f32.xlu0 %v2821_v50  ;;  %4078 = vmatmul.msk.bf16.vlgmr.msra.gmra.mxu0 %vm2512_vm2, %v3040_v12 }
 0x6e4   : > { %4079 = vmatmul.msk.bf16.vlgmr.msra.gmra.mxu1 %vm2512_vm2, %v3041_v5  ;;  %4080 = vmatmul.msk.bf16.vlgmr.msra.gmra.mxu2 %vm2512_vm2, %v3042_v51  ;;  %v2721_v18 = vpop.permute.xlu0 %2720  ;;  %v5829_v36 = vpop.permute.xlu2 %2942 }
 0x6e5   : > { %v2749_v33 = vsub.f32 %v5616_v37, %v2721_v18  ;;  %v2908_v47 = vpop.permute.xlu1 %2907 }
 0x6e6   : > { %v3018_v8 = vmul.f32 %v3002_v60, %v2908_v47  ;;  %v3007_v60 = vld [vmem:[#allocation5 + $0x38] sm:$0xff] }
 0x6e7   : > { %v4356_v43 = vpop.eup %4355  ;;  %v2778_v52 = vmul.f32 1.442695, %v2749_v33 }
 0x6e8   : > { %v4358_v45 = vpop.eup %4357  ;;  %v2830_v21 = vsel %vm2512_vm2, %v4356_v43, 0.0  ;;  %v3046_v37 = vpack.c.bf16 %v4356_v43, %v4356_v43  ;;  %v3003_v43 = vld [vmem:[#allocation5 + $0x18] sm:$0xff] }
 0x6e9   : > { %4359 = vpow2.f32 %v2778_v52  ;;  %v2833_v16 = vsel %vm2512_vm2, %v4358_v45, 0.0  ;;  %v3047_v32 = vpack.c.bf16 %v4358_v45, %v4358_v45 }
 0x6ea   : > { %2834 = vadd.xlane.f32.xlu1 %v2833_v16 }
 0x6eb   : > { %2831 = vadd.xlane.f32.xlu0 %v2830_v21  ;;  %4081 = vmatmul.msk.bf16.vlgmr.msra.gmra.mxu3 %vm2512_vm2, %v3043_v20  ;;  %v3004_v21 = vld [vmem:[#allocation5 + $0x20] sm:$0xff]  ;;  %v3005_v20 = vld [vmem:[#allocation5 + $0x28] sm:$0xff] }
 0x6ec   : > { %v2901_v62 = vpop.permute.xlu0 %2900  ;;  %v5836_v40 = vpop.permute.xlu2 %2963 }
 0x6ed   : > { %v2929_v28 = vpop.permute.xlu1 %2928  ;;  %v3017_v39 = vmul.f32 %v3001_v63, %v2901_v62 }
 0x6ef   : > { %v4360_v27 = vpop.eup %4359 }
 0x6f0   : > { %v3045_v4 = vpack.c.bf16 %v4360_v27, %v4360_v27  ;;  %v2827_v26 = vsel %vm2512_vm2, %v4360_v27, 0.0  ;;  %v2784_v27 = vld [vmem:[#allocation4] sm:$0xff] }
 0x6f1   : > { %2828 = vadd.xlane.f32.xlu2 %v2827_v26 }
 0x6f3   : > { %4082 = vmatmul.msk.bf16.vlgmr.msrb.gmra.mxu0 %vm2512_vm2, %v3044_v22 }
 0x6f4   : > { %4083 = vmatmul.msk.bf16.vlgmr.msrb.gmra.mxu1 %vm2512_vm2, %v3045_v4  ;;  %4084 = vmatmul.msk.bf16.vlgmr.msrb.gmra.mxu2 %vm2512_vm2, %v3046_v37  ;;  %v2915_v34 = vpop.permute.xlu0 %2914 }
 0x6f5   : > { %v5827_v38 = vpop.permute.xlu1 %2949  ;;  %v3019_v26 = vmul.f32 %v3003_v43, %v2915_v34 }
 0x6fb   : > { %4085 = vmatmul.msk.bf16.vlgmr.msrb.gmra.mxu3 %vm2512_vm2, %v3047_v32 }
 0x6fc   : > { %v5825_v9 = vpop.permute.xlu0 %2935 }
 0x6fd   : > { %v5834_v0 = vpop.permute.xlu1 %2970 }
 0x6ff   : > { %2998 = vperm.xlu0 %4324, %v2993_v1   ;;  %v3020_v1 = vmul.f32 %v3004_v21, %v2922_v42 }
 0x703   : > { %2991 = vperm.xlu1 %4322, %v2986_v10   ;;  %v3021_v10 = vmul.f32 %v3005_v20, %v2929_v28  ;;  %v2785_v20 = vld [vmem:[#allocation4 + $0x8] sm:$0xff] }
 0x704   : > { %v5832_v58 = vpop.permute.xlu0 %2956 }
 0x709   : > { %2984 = vperm.xlu2 %4323, %v2979_v56   ;;  %v2786_v56 = vmul.f32 %v5664_v29, %v2784_v27 }
 0x70c   : > { %v5838_v31 = vpop.permute.xlu0 %2977 }
 0x727   : > { %v3083_v25 = vpop.f32.mrf.mxu1 }
 0x728   : > { %v3354_v44 = vadd.f32 %v3083_v25, %v3017_v39 }
 0x72a   : > { %3370 = vst.msk [vmem:[#allocation5 + $0x8] sm:$0xff] %vm398_vm0, %v3354_v44 }
 0x72e   : > { %v2793_v55 = vpop.xlane.xlu2 %2792 }
 0x72f   : > { %v3085_v41 = vpop.f32.mrf.mxu1  ;;  %v2853_v35 = vperm.slane %v2793_v55, %v5528_v59  ;;  %v3006_v55 = vld [vmem:[#allocation5 + $0x30] sm:$0xff] }
 0x730   : > { %v3022_v29 = vmul.f32 %v3006_v55, %v5825_v9  ;;  %v3023_v9 = vmul.f32 %v3007_v60, %v5829_v36  ;;  %v3010_v36 = vld [vmem:[#allocation5 + $0x50] sm:$0xff] }
 0x731   : > { %v3026_v27 = vmul.f32 %v3010_v36, %v5836_v40 }
 0x735   : > { %v2790_v13 = vpop.xlane.xlu1 %2789 }
 0x736   : > { %v2852_v46 = vperm.slane %v2790_v13, %v5528_v59  ;;  %v2802_v57 = vpop.xlane.xlu2 %2801 }
 0x737   : > { %v2796_v53 = vpop.xlane.xlu0 %2795  ;;  %v2856_v33 = vperm.slane %v2802_v57, %v5528_v59 }
 0x738   : > { %v2854_v15 = vperm.slane %v2796_v53, %v5528_v59  ;;  %v2868_v19 = vsel %vm2593_vm3, %v2853_v35, %v2852_v46  ;;  %v3008_v35 = vld [vmem:[#allocation5 + $0x40] sm:$0xff] }
 0x73a   : > { %v2869_v12 = vsel %vm2595_vm4, %v2854_v15, %v2868_v19 }
 0x73d   : > { %v2799_v2 = vpop.xlane.xlu1 %2798 }
 0x73e   : > { %v2855_v30 = vperm.slane %v2799_v2, %v5528_v59 }
 0x740   : > { %v3064_v3 = vpop.f32.mrf.mxu0  ;;  %v2870_v50 = vsel %vm2597_vm5, %v2855_v30, %v2869_v12  ;;  %v3009_v30 = vld [vmem:[#allocation5 + $0x48] sm:$0xff] }
 0x741   : > { %v3353_v24 = vadd.f32 %v3064_v3, %v3016_v6  ;;  %v2871_v45 = vsel %vm2599_vm6, %v2856_v33, %v2870_v50  ;;  %v3025_v12 = vmul.f32 %v3009_v30, %v5832_v58 }
 0x743   : > { %3369 = vst.msk [vmem:[#allocation5] sm:$0xff] %vm398_vm0, %v3353_v24 }
 0x745   : > { %v2808_v54 = vpop.xlane.xlu1 %2807  ;;  %v2805_v51 = vpop.xlane.xlu0 %2804 }
 0x746   : > { %v3102_v49 = vpop.f32.mrf.mxu2  ;;  %v2857_v5 = vperm.slane %v2805_v51, %v5528_v59  ;;  %v2858_v52 = vperm.slane %v2808_v54, %v5528_v59 }
 0x747   : > { %v3355_v7 = vadd.f32 %v3102_v49, %v3018_v8  ;;  %v3024_v8 = vmul.f32 %v3008_v35, %v5827_v38 }
 0x748   : > { %v3066_v18 = vpop.f32.mrf.mxu0  ;;  %v2872_v16 = vsel %vm2601_vm7, %v2857_v5, %v2871_v45 }
 0x749   : > { %3371 = vst.msk [vmem:[#allocation5 + $0x10] sm:$0xff] %vm398_vm0, %v3355_v7  ;;  %v2873_v62 = vsel %vm2603_vm8, %v2858_v52, %v2872_v16 }
 0x74d   : > { %v2811_v4 = vpop.xlane.xlu2 %2810  ;;  %v2817_v37 = vpop.xlane.xlu1 %2816 }
 0x74e   : > { %v2859_v22 = vperm.slane %v2811_v4, %v5528_v59  ;;  %v3104_v32 = vpop.f32.mrf.mxu2  ;;  %v2814_v47 = vpop.xlane.xlu0 %2813  ;;  %v2861_v46 = vperm.slane %v2817_v37, %v5528_v59 }
 0x74f   : > { %v3121_v61 = vpop.f32.mrf.mxu3  ;;  %v2860_v15 = vperm.slane %v2814_v47, %v5528_v59 }
 0x750   : > { %v2874_v63 = vsel %vm2605_vm9, %v2859_v22, %v2873_v62  ;;  %v3356_v39 = vadd.f32 %v3121_v61, %v3019_v26  ;;  %v3140_v25 = vpop.f32.mrf.mxu0  ;;  %v3159_v44 = vpop.f32.mrf.mxu1 }
 0x751   : > { %v2884_v41 = vadd.f32 %v2874_v63, %v2786_v56  ;;  %v3357_v13 = vadd.f32 %v3140_v25, %v3020_v1  ;;  %v3358_v34 = vadd.f32 %v3159_v44, %v3021_v10  ;;  %v2875_v54 = vsel %vm2593_vm3, %v2861_v46, %v2860_v15  ;;  %v3013_v25 = vld [vmem:[#allocation5 + $0x68] sm:$0xff]  ;;  %v3012_v44 = vld [vmem:[#allocation5 + $0x60] sm:$0xff]  ;;  %v3015_v15 = vld [vmem:[#allocation5 + $0x78] sm:$0xff] }
 0x752   : > { %3372 = vst.msk [vmem:[#allocation5 + $0x18] sm:$0xff] %vm398_vm0, %v3356_v39  ;;  %v2787_v10 = vmul.f32 %v5680_v11, %v2785_v20  ;;  %v3011_v39 = vld [vmem:[#allocation5 + $0x58] sm:$0xff]  ;;  %v3028_v11 = vmul.f32 %v3012_v44, %v5838_v31 }
 0x753   : > { %2886 = vst.msk [vmem:[#allocation4] sm:$0xff] %vm2512_vm2, %v2884_v41  ;;  %v3027_v41 = vmul.f32 %v3011_v39, %v5834_v0 }
 0x754   : > { %3373 = vst.msk [vmem:[#allocation5 + $0x20] sm:$0xff] %vm398_vm0, %v3357_v13 }
 0x755   : > { %3374 = vst.msk [vmem:[#allocation5 + $0x28] sm:$0xff] %vm398_vm0, %v3358_v34  ;;  %v2820_v6 = vpop.xlane.xlu2 %2819  ;;  %v2826_v24 = vpop.xlane.xlu1 %2825 }
 0x756   : > { %v2823_v3 = vpop.xlane.xlu0 %2822  ;;  %v2862_v57 = vperm.slane %v2820_v6, %v5528_v59  ;;  %v2864_v45 = vperm.slane %v2826_v24, %v5528_v59 }
 0x757   : > { %v3123_v28 = vpop.f32.mrf.mxu3  ;;  %v3178_v42 = vpop.f32.mrf.mxu2  ;;  %v2863_v51 = vperm.slane %v2823_v3, %v5528_v59 }
 0x758   : > { %v3359_v14 = vadd.f32 %v3178_v42, %v3022_v29  ;;  %v3142_v53 = vpop.f32.mrf.mxu0  ;;  %v3161_v2 = vpop.f32.mrf.mxu1  ;;  %v2876_v7 = vsel %vm2595_vm4, %v2862_v57, %v2875_v54 }
 0x759   : > { %v2877_v38 = vsel %vm2597_vm5, %v2863_v51, %v2876_v7  ;;  %v3014_v2 = vld [vmem:[#allocation5 + $0x70] sm:$0xff] }
 0x75a   : > { %3375 = vst.msk [vmem:[#allocation5 + $0x30] sm:$0xff] %vm398_vm0, %v3359_v14  ;;  %v2878_v26 = vsel %vm2599_vm6, %v2864_v45, %v2877_v38 }
 0x75d   : > { %v2835_v21 = vpop.xlane.xlu1 %2834 }
 0x75e   : > { %v2832_v52 = vpop.xlane.xlu0 %2831  ;;  %v2867_v22 = vperm.slane %v2835_v21, %v5528_v59 }
 0x75f   : > { %v3180_v19 = vpop.f32.mrf.mxu2  ;;  %v3197_v49 = vpop.f32.mrf.mxu3  ;;  %v2866_v4 = vperm.slane %v2832_v52, %v5528_v59 }
 0x760   : > { %v3360_v50 = vadd.f32 %v3197_v49, %v3023_v9  ;;  %v3216_v5 = vpop.f32.mrf.mxu0 }
 0x761   : > { %v3361_v18 = vadd.f32 %v3216_v5, %v3024_v8  ;;  %v3235_v33 = vpop.f32.mrf.mxu1 }
 0x762   : > { %3376 = vst.msk [vmem:[#allocation5 + $0x38] sm:$0xff] %vm398_vm0, %v3360_v50  ;;  %v3362_v43 = vadd.f32 %v3235_v33, %v3025_v12 }
 0x763   : > { %3377 = vst.msk [vmem:[#allocation5 + $0x40] sm:$0xff] %vm398_vm0, %v3361_v18 }
 0x764   : > { %3378 = vst.msk [vmem:[#allocation5 + $0x48] sm:$0xff] %vm398_vm0, %v3362_v43  ;;  %v2829_v58 = vpop.xlane.xlu2 %2828 }
 0x765   : > { %v2865_v16 = vperm.slane %v2829_v58, %v5528_v59 }
 0x767   : > { %v2879_v37 = vsel %vm2601_vm7, %v2865_v16, %v2878_v26  ;;  %v3199_v32 = vpop.f32.mrf.mxu3  ;;  %v3254_v1 = vpop.f32.mrf.mxu2 }
 0x768   : > { %v2880_v56 = vsel %vm2603_vm8, %v2866_v4, %v2879_v37  ;;  %v3363_v62 = vadd.f32 %v3254_v1, %v3026_v27  ;;  %v3218_v47 = vpop.f32.mrf.mxu0 }
 0x769   : > { %v2881_v61 = vsel %vm2605_vm9, %v2867_v22, %v2880_v56  ;;  %v3237_v63 = vpop.f32.mrf.mxu1 }
 0x76a   : > { %v2885_v40 = vadd.f32 %v2881_v61, %v2787_v10  ;;  %3379 = vst.msk [vmem:[#allocation5 + $0x50] sm:$0xff] %vm398_vm0, %v3363_v62 }
 0x76c   : > { %2887 = vst.msk [vmem:[#allocation4 + $0x8] sm:$0xff] %vm2512_vm2, %v2885_v40  ;;  %v2985_v59 = vpop.permute.xlu2 %2984 }
 0x76d   : > { %v3029_v13 = vmul.f32 %v3013_v25, %v2985_v59 }
 0x76f   : > { %v3256_v34 = vpop.f32.mrf.mxu2  ;;  %v3273_v55 = vpop.f32.mrf.mxu3 }
 0x770   : > { %v3364_v29 = vadd.f32 %v3273_v55, %v3027_v41  ;;  %v3292_v28 = vpop.f32.mrf.mxu0 }
 0x771   : > { %v3365_v42 = vadd.f32 %v3292_v28, %v3028_v11  ;;  %v3311_v14 = vpop.f32.mrf.mxu1  ;;  %v2999_v35 = vpop.permute.xlu0 %2998 }
 0x772   : > { %3380 = vst.msk [vmem:[#allocation5 + $0x58] sm:$0xff] %vm398_vm0, %v3364_v29  ;;  %v3366_v53 = vadd.f32 %v3311_v14, %v3029_v13  ;;  %v3031_v57 = vmul.f32 %v3015_v15, %v2999_v35 }
 0x773   : > { %3381 = vst.msk [vmem:[#allocation5 + $0x60] sm:$0xff] %vm398_vm0, %v3365_v42 }
 0x774   : > { %3382 = vst.msk [vmem:[#allocation5 + $0x68] sm:$0xff] %vm398_vm0, %v3366_v53 }
 0x775   : > { %v2992_v6 = vpop.permute.xlu1 %2991 }
 0x776   : > { %v3030_v3 = vmul.f32 %v3014_v2, %v2992_v6 }
 0x777   : > { %v3275_v0 = vpop.f32.mrf.mxu3  ;;  %v3330_v24 = vpop.f32.mrf.mxu2 }
 0x778   : > { %v3367_v60 = vadd.f32 %v3330_v24, %v3030_v3  ;;  %v3294_v31 = vpop.f32.mrf.mxu0 }
 0x779   : > { %v3313_v46 = vpop.f32.mrf.mxu1 }
 0x77a   : > { %3383 = vst.msk [vmem:[#allocation5 + $0x70] sm:$0xff] %vm398_vm0, %v3367_v60 }
 0x77f   : > { %v3332_v30 = vpop.f32.mrf.mxu2  ;;  %v3349_v9 = vpop.f32.mrf.mxu3 }
 0x780   : > { %v3368_v8 = vadd.f32 %v3349_v9, %v3031_v57 }
 0x782   : > { %3384 = vst.msk [vmem:[#allocation5 + $0x78] sm:$0xff] %vm398_vm0, %v3368_v8 }
 0x783   : > { %3390 = sbr.rel (%p4086_p3) target bundleno = 2126 (0x84e), region = 52 }
 0x787   : > { %v3351_v54 = vpop.f32.mrf.mxu3 }
 0x788   : > { %4363 = vset.pattern.permute.xlu2 %v5521_v48  ;;  %4362 = vset.pattern.permute.xlu1 %v5521_v48  ;;  %v3392_v51 = vld [vmem:[#allocation4] sm:$0xff]  ;;  %v3396_v19 = vstv %s3391_s25  ;;  %v3393_v12 = vld [vmem:[#allocation4 + $0x8] sm:$0xff]  ;;  %v3404_v62 = vld [vmem:[#allocation5 + $0x28] sm:$0xff]  ;;  %vm3815_vm0 = vcmask 125952  }
 0x789   : > { %4361 = vset.pattern.permute.xlu0 %v5521_v48  ;;  %4364 = vrcp.f32 %v3392_v51  ;;  %v3403_v47 = vld [vmem:[#allocation5 + $0x20] sm:$0xff]  ;;  %v3400_v39 = vld [vmem:[#allocation5 + $0x8] sm:$0xff]  ;;  %v3402_v53 = vld [vmem:[#allocation5 + $0x18] sm:$0xff] }
 0x78a   : > { %4366 = vrcp.f32 %v3393_v12  ;;  %v3399_v40 = vld [vmem:[#allocation5] sm:$0xff]  ;;  %v3406_v2 = vld [vmem:[#allocation5 + $0x38] sm:$0xff]  ;;  %v3401_v6 = vld [vmem:[#allocation5 + $0x10] sm:$0xff] }
 0x78b   : > { %v3411_v29 = vld [vmem:[#allocation5 + $0x60] sm:$0xff]  ;;  %v3405_v3 = vld [vmem:[#allocation5 + $0x30] sm:$0xff]  ;;  %v5905_v30 = vld [vmem:[%s4932_s17 + $0x20] sm:$0xff]  }
 0x78c   : > { %v3414_v8 = vld [vmem:[#allocation5 + $0x78] sm:$0xff]  ;;  %v5908_v51 = vld [vmem:[%s4932_s17] sm:$0xff]   ;;  %v5914_v12 = vld [vmem:[%s4932_s17 + $0x8] sm:$0xff]  }
 0x78f   : > { %v4365_v49 = vpop.eup %4364 }
 0x790   : > { %v3397_v7 = vmul.f32 %v4365_v49, %v3396_v19  ;;  %v4367_v36 = vpop.eup %4366 }
 0x791   : > { %v3398_v52 = vmul.f32 %v4367_v36, %v3396_v19 }
 0x792   : > { %v3443_v50 = vperm.slane %v3397_v7, 4  ;;  %v3429_v5 = vperm.slane %v3397_v7, 2  ;;  %v3415_v18 = vperm.slane %v3397_v7, 0  ;;  %v3450_v33 = vperm.slane %v3397_v7, 5 }
 0x793   : > { %v3436_v43 = vperm.slane %v3397_v7, 3  ;;  %v3422_v38 = vperm.slane %v3397_v7, 1  ;;  %v3499_v48 = vperm.slane %v3398_v52, 4  ;;  %v3464_v45 = vperm.slane %v3397_v7, 7 }
 0x794   : > { %3448 = vperm.xlu2 %4363, %v3443_v50   ;;  %3434 = vperm.xlu1 %4362, %v3429_v5   ;;  %v3457_v21 = vperm.slane %v3397_v7, 6  ;;  %v3520_v58 = vperm.slane %v3398_v52, 7  ;;  %v3513_v20 = vperm.slane %v3398_v52, 6  ;;  %v3506_v16 = vperm.slane %v3398_v52, 5  ;;  %v5917_v7 = vld [vmem:[%s4932_s17 + $0x10] sm:$0xff]   ;;  %v5920_v50 = vld [vmem:[%s4932_s17 + $0x28] sm:$0xff]  }
 0x795   : > { %3420 = vperm.xlu0 %4361, %v3415_v18   ;;  %v3485_v27 = vperm.slane %v3398_v52, 2  ;;  %v3478_v4 = vperm.slane %v3398_v52, 1  ;;  %v3471_v26 = vperm.slane %v3398_v52, 0  ;;  %v3492_v22 = vperm.slane %v3398_v52, 3 }
 0x796   : > { %v4123_v52 = vunpack.c.l.bf16 %v5905_v30 }
 0x79c   : > { %3455 = vperm.xlu2 %4363, %v3450_v33   ;;  %3441 = vperm.xlu1 %4362, %v3436_v43   ;;  %v3409_v33 = vld [vmem:[#allocation5 + $0x50] sm:$0xff] }
 0x79d   : > { %3427 = vperm.xlu0 %4361, %v3422_v38  }
 0x7a4   : > { %3504 = vperm.xlu2 %4363, %v3499_v48   ;;  %3469 = vperm.xlu1 %4362, %v3464_v45  }
 0x7a5   : > { %3462 = vperm.xlu0 %4361, %v3457_v21   ;;  %v4107_v21 = vunpack.c.l.bf16 %v5908_v51 }
 0x7ac   : > { %3525 = vperm.xlu2 %4363, %v3520_v58   ;;  %3518 = vperm.xlu1 %4362, %v3513_v20   ;;  %v5928_v58 = vld [vmem:[%s4932_s17 + $0x18] sm:$0xff]  }
 0x7ad   : > { %3511 = vperm.xlu0 %4361, %v3506_v16   ;;  %v3413_v16 = vld [vmem:[#allocation5 + $0x70] sm:$0xff] }
 0x7b4   : > { %3490 = vperm.xlu2 %4363, %v3485_v27   ;;  %3483 = vperm.xlu1 %4362, %v3478_v4   ;;  %v4111_v4 = vunpack.c.l.bf16 %v5914_v12 }
 0x7b5   : > { %3476 = vperm.xlu0 %4361, %v3471_v26   ;;  %v4115_v26 = vunpack.c.l.bf16 %v5917_v7 }
 0x7bd   : > { %3497 = vperm.xlu0 %4361, %v3492_v22   ;;  %v4127_v22 = vunpack.c.l.bf16 %v5920_v50 }
 0x7ee   : > { %v3449_v37 = vpop.permute.xlu2 %3448 }
 0x7ef   : > { %v3531_v63 = vmul.f32 %v3449_v37, %v3403_v47  ;;  %v5935_v37 = vld [vmem:[%s4932_s17 + $0x30] sm:$0xff]  }
 0x7f1   : > { %v3547_v41 = vpack.c.bf16 %v3531_v63, %v3531_v63  ;;  %v4119_v63 = vunpack.c.l.bf16 %v5928_v58 }
 0x7f3   : > { %v3559_v42 = vrot.slane %v3547_v41, 4 }
 0x7f6   : > { %v3456_v32 = vpop.permute.xlu2 %3455 }
 0x7f7   : > { %v3532_v61 = vmul.f32 %v3456_v32, %v3404_v62  ;;  %v5938_v32 = vld [vmem:[%s4932_s17 + $0x38] sm:$0xff]  }
 0x7f9   : > { %v3548_v44 = vpack.c.bf16 %v3532_v61, %v3532_v61 }
 0x7fb   : > { %v3587_v55 = vrot.slane %v3548_v44, 4 }
 0x7fe   : > { %v3505_v10 = vpop.permute.xlu2 %3504 }
 0x7ff   : > { %v5900_v0 = vmul.f32 %v3505_v10, %v3411_v29 }
 0x801   : > { %v3555_v19 = vpack.c.bf16 %v5900_v0, %v5900_v0 }
 0x806   : > { %v3435_v1 = vpop.permute.xlu1 %3434  ;;  %v3526_v34 = vpop.permute.xlu2 %3525 }
 0x807   : > { %v3421_v56 = vpop.permute.xlu0 %3420  ;;  %v3529_v35 = vmul.f32 %v3435_v1, %v3401_v6  ;;  %v5924_v48 = vmul.f32 %v3526_v34, %v3414_v8 }
 0x808   : > { %v3527_v13 = vmul.f32 %v3421_v56, %v3399_v40 }
 0x809   : > { %v3545_v45 = vpack.c.bf16 %v3529_v35, %v3529_v35 }
 0x80a   : > { %v3543_v14 = vpack.c.bf16 %v3527_v13, %v3527_v13  ;;  %v4131_v13 = vunpack.c.l.bf16 %v5935_v37 }
 0x80c   : > { %v3560_v57 = vsel %vm1840_vm14, %v3559_v42, %v3543_v14 }
 0x80d   : > { %v3564_v18 = vperm.slane %v3560_v57, %v5445_v23 }
 0x80e   : > { %v3442_v25 = vpop.permute.xlu1 %3441  ;;  %v3491_v43 = vpop.permute.xlu2 %3490 }
 0x80f   : > { %v3428_v59 = vpop.permute.xlu0 %3427  ;;  %v3530_v60 = vmul.f32 %v3442_v25, %v3402_v53  ;;  %v5940_v1 = vmul.f32 %v3491_v43, %v3409_v33  ;;  %v3573_v61 = vrot.slane %v3564_v18, 4  ;;  %v3412_v25 = vld [vmem:[#allocation5 + $0x68] sm:$0xff] }
 0x810   : > { %v3528_v11 = vmul.f32 %v3428_v59, %v3400_v39 }
 0x811   : > { %v3546_v36 = vpack.c.bf16 %v3530_v60, %v3530_v60  ;;  %v3553_v42 = vpack.c.bf16 %v5940_v1, %v5940_v1 }
 0x812   : > { %v3544_v28 = vpack.c.bf16 %v3528_v11, %v3528_v11  ;;  %v4135_v11 = vunpack.c.l.bf16 %v5938_v32 }
 0x814   : > { %v3588_v31 = vsel %vm1840_vm14, %v3587_v55, %v3544_v28 }
 0x815   : > { %v3592_v49 = vperm.slane %v3588_v31, %v5445_v23 }
 0x816   : > { %v3470_v24 = vpop.permute.xlu1 %3469 }
 0x817   : > { %v3534_v46 = vmul.f32 %v3470_v24, %v3406_v2  ;;  %v3463_v15 = vpop.permute.xlu0 %3462  ;;  %v3601_v10 = vrot.slane %v3592_v49, 4 }
 0x818   : > { %v3533_v9 = vmul.f32 %v3463_v15, %v3405_v3 }
 0x819   : > { %v3550_v54 = vpack.c.bf16 %v3534_v46, %v3534_v46 }
 0x81a   : > { %v3549_v5 = vpack.c.bf16 %v3533_v9, %v3533_v9 }
 0x81b   : > { %v3593_v38 = vrot.slane %v3550_v54, 4 }
 0x81c   : > { %v3565_v20 = vrot.slane %v3549_v5, 4 }
 0x81d   : > { %v3594_v27 = vsel %vm1840_vm14, %v3593_v38, %v3546_v36 }
 0x81e   : > { %v3598_v56 = vperm.slane %v3594_v27, %v5445_v23  ;;  %v3566_v62 = vsel %vm1840_vm14, %v3565_v20, %v3545_v45  ;;  %v3519_v47 = vpop.permute.xlu1 %3518 }
 0x81f   : > { %v3570_v40 = vperm.slane %v3566_v62, %v5445_v23  ;;  %v3541_v39 = vmul.f32 %v3519_v47, %v3413_v16  ;;  %v3512_v44 = vpop.permute.xlu0 %3511 }
 0x820   : > { %v3599_v59 = vrot.slane %v3598_v56, 4  ;;  %v3602_v41 = vsel %vm1840_vm14, %v3598_v56, %v3601_v10  ;;  %v5955_v2 = vmul.f32 %v3512_v44, %v3412_v25 }
 0x821   : > { %v3610_v34 = vperm.slane %v3602_v41, %v5453_v17  ;;  %v3571_v55 = vrot.slane %v3570_v40, 4  ;;  %v3574_v29 = vsel %vm1840_vm14, %v3570_v40, %v3573_v61  ;;  %v3557_v28 = vpack.c.bf16 %v3541_v39, %v3541_v39 }
 0x822   : > { %v3600_v14 = vsel %vm1840_vm14, %v3599_v59, %v3592_v49  ;;  %v3582_v53 = vperm.slane %v3574_v29, %v5453_v17 }
 0x823   : > { %v3606_v6 = vperm.slane %v3600_v14, %v5453_v17  ;;  %v3613_v3 = vrot.slane %v3610_v34, 4  ;;  %v3692_v24 = vshrl.u32 %v3610_v34, 16  ;;  %v3572_v60 = vsel %vm1840_vm14, %v3571_v55, %v3564_v18 }
 0x824   : > { %v3578_v31 = vperm.slane %v3572_v60, %v5453_v17  ;;  %v3585_v46 = vrot.slane %v3582_v53, 4  ;;  %v3689_v15 = vpack.i.b16 %v3610_v34, %v3582_v53  ;;  %v3691_v35 = vshrl.u32 %v3582_v53, 16  ;;  %v3408_v60 = vld [vmem:[#allocation5 + $0x48] sm:$0xff] }
 0x825   : > { %v3611_v57 = vrot.slane %v3606_v6, 4  ;;  %v3614_v9 = vsel %vm1840_vm14, 0, %v3613_v3  ;;  %v3676_v8 = vshrl.u32 %v3606_v6, 16  ;;  %v3621_v54 = vrot.slane %v3557_v28, 4 }
 0x826   : > { %v3700_v49 = vshrl.u32 %v3614_v9, 16  ;;  %v3583_v5 = vrot.slane %v3578_v31, 4  ;;  %v3586_v33 = vsel %vm1840_vm14, 0, %v3585_v46  ;;  %v3673_v43 = vpack.i.b16 %v3606_v6, %v3578_v31  ;;  %v3407_v46 = vld [vmem:[#allocation5 + $0x40] sm:$0xff] }
 0x827   : > { %v3612_v36 = vsel %vm1840_vm14, 0, %v3611_v57  ;;  %v3675_v38 = vshrl.u32 %v3578_v31, 16  ;;  %v3693_v18 = vpack.i.b16 %v3692_v24, %v3691_v35  ;;  %v3697_v45 = vpack.i.b16 %v3614_v9, %v3586_v33  ;;  %v3477_v20 = vpop.permute.xlu0 %3476  ;;  %v3484_v31 = vpop.permute.xlu1 %3483 }
 0x828   : > { %v3684_v16 = vshrl.u32 %v3612_v36, 16  ;;  %v3584_v27 = vsel %vm1840_vm14, 0, %v3583_v5  ;;  %v3699_v1 = vshrl.u32 %v3586_v33, 16  ;;  %v3735_v10 = vunpack.c.l.bf16 %v3673_v43 }
 0x829   : > { %v3677_v56 = vpack.i.b16 %v3676_v8, %v3675_v38  ;;  %v3681_v62 = vpack.i.b16 %v3612_v36, %v3584_v27  ;;  %v3683_v47 = vshrl.u32 %v3584_v27, 16  ;;  %v3743_v61 = vunpack.c.l.bf16 %v3689_v15  ;;  %v3410_v8 = vld [vmem:[#allocation5 + $0x58] sm:$0xff] }
 0x82a   : > { %v3701_v40 = vpack.i.b16 %v3700_v49, %v3699_v1  ;;  %v3745_v39 = vunpack.c.l.bf16 %v3693_v18  ;;  %v3747_v25 = vunpack.c.l.bf16 %v3697_v45  ;;  %v3783_v44 = vadd.f32 %v4107_v21, %v3735_v10 }
 0x82b   : > { %v3685_v59 = vpack.i.b16 %v3684_v16, %v3683_v47  ;;  %v3737_v41 = vunpack.c.l.bf16 %v3677_v56  ;;  %v3739_v34 = vunpack.c.l.bf16 %v3681_v62  ;;  %v3791_v55 = vadd.f32 %v4123_v52, %v3743_v61 }
 0x82c   : > { %v3749_v29 = vunpack.c.l.bf16 %v3701_v40  ;;  %v3793_v28 = vadd.f32 %v4127_v22, %v3745_v39  ;;  %v3795_v14 = vadd.f32 %v4131_v13, %v3747_v25  ;;  %v3799_v53 = vpack.c.bf16 %v3783_v44, %v3783_v44 }
 0x82d   : > { %v3741_v6 = vunpack.c.l.bf16 %v3685_v59  ;;  %v3785_v3 = vadd.f32 %v4111_v4, %v3737_v41  ;;  %v3787_v21 = vadd.f32 %v4115_v26, %v3739_v34  ;;  %v3807_v24 = vpack.c.bf16 %v3791_v55, %v3791_v55 }
 0x82e   : > { %v3797_v52 = vadd.f32 %v4135_v11, %v3749_v29  ;;  %v3809_v15 = vpack.c.bf16 %v3793_v28, %v3793_v28  ;;  %3816 = vst.msk [vmem:[%s4932_s17] sm:$0xf] %vm3815_vm0, %v3799_v53  ;;  %v3622_v22 = vsel %vm1840_vm14, %v3621_v54, %v3553_v42  ;;  %v3556_v13 = vpack.c.bf16 %v5955_v2, %v5955_v2 }
 0x82f   : > { %v3789_v4 = vadd.f32 %v4119_v63, %v3741_v6  ;;  %v3801_v26 = vpack.c.bf16 %v3785_v3, %v3785_v3  ;;  %v3803_v35 = vpack.c.bf16 %v3787_v21, %v3787_v21  ;;  %3824 = vst.msk [vmem:[%s4932_s17 + $0x20] sm:$0xf] %vm3815_vm0, %v3807_v24  ;;  %v3558_v11 = vpack.c.bf16 %v5924_v48, %v5924_v48  ;;  %v3498_v2 = vpop.permute.xlu0 %3497 }
 0x830   : > { %v3811_v57 = vpack.c.bf16 %v3795_v14, %v3795_v14  ;;  %3826 = vst.msk [vmem:[%s4932_s17 + $0x28] sm:$0xf] %vm3815_vm0, %v3809_v15  ;;  %v3536_v9 = vmul.f32 %v3484_v31, %v3408_v60  ;;  %v3535_v42 = vmul.f32 %v3477_v20, %v3407_v46  ;;  %v3813_v63 = vpack.c.bf16 %v3797_v52, %v3797_v52 }
 0x831   : > { %v3805_v54 = vpack.c.bf16 %v3789_v4, %v3789_v4  ;;  %3818 = vst.msk [vmem:[%s4932_s17 + $0x8] sm:$0xf] %vm3815_vm0, %v3801_v26  ;;  %v3626_v49 = vperm.slane %v3622_v22, %v5445_v23  ;;  %v3615_v48 = vrot.slane %v3555_v19, 4  ;;  %v3643_v5 = vrot.slane %v3556_v13, 4 }
 0x832   : > { %3820 = vst.msk [vmem:[%s4932_s17 + $0x10] sm:$0xf] %vm3815_vm0, %v3803_v35  ;;  %v3552_v33 = vpack.c.bf16 %v3536_v9, %v3536_v9  ;;  %v3551_v43 = vpack.c.bf16 %v3535_v42, %v3535_v42  ;;  %v3538_v36 = vmul.f32 %v3498_v2, %v3410_v8  ;;  %v3649_v38 = vrot.slane %v3558_v11, 4 }
 0x833   : > { %3822 = vst.msk [vmem:[%s4932_s17 + $0x18] sm:$0xf] %vm3815_vm0, %v3805_v54  ;;  %v3627_v20 = vrot.slane %v3626_v49, 4  ;;  %v4108_v44 = vunpack.c.h.bf16 %v5908_v51  ;;  %v4112_v59 = vunpack.c.h.bf16 %v5914_v12  ;;  %v4116_v41 = vunpack.c.h.bf16 %v5917_v7 }
 0x834   : > { %3828 = vst.msk [vmem:[%s4932_s17 + $0x30] sm:$0xf] %vm3815_vm0, %v3811_v57  ;;  %v3644_v18 = vsel %vm1840_vm14, %v3643_v5, %v3552_v33  ;;  %v3616_v45 = vsel %vm1840_vm14, %v3615_v48, %v3551_v43  ;;  %v3554_v16 = vpack.c.bf16 %v3538_v36, %v3538_v36  ;;  %v4120_v29 = vunpack.c.h.bf16 %v5928_v58 }
 0x835   : > { %3830 = vst.msk [vmem:[%s4932_s17 + $0x38] sm:$0xf] %vm3815_vm0, %v3813_v63  ;;  %v3648_v0 = vperm.slane %v3644_v18, %v5445_v23  ;;  %v3620_v19 = vperm.slane %v3616_v45, %v5445_v23  ;;  %v4128_v53 = vunpack.c.h.bf16 %v5920_v50  ;;  %v4132_v3 = vunpack.c.h.bf16 %v5935_v37 }
 0x836   : > { %v3650_v10 = vsel %vm1840_vm14, %v3649_v38, %v3554_v16  ;;  %v4136_v21 = vunpack.c.h.bf16 %v5938_v32 }
 0x837   : > { %v3628_v27 = vsel %vm1840_vm14, %v3627_v20, %v3620_v19  ;;  %v3629_v1 = vrot.slane %v3620_v19, 4  ;;  %v3654_v62 = vperm.slane %v3650_v10, %v5445_v23  ;;  %v3657_v47 = vrot.slane %v3648_v0, 4 }
 0x838   : > { %v3634_v56 = vperm.slane %v3628_v27, %v5453_v17  ;;  %v4124_v23 = vunpack.c.h.bf16 %v5905_v30 }
 0x839   : > { %v3630_v61 = vsel %vm1840_vm14, %v3626_v49, %v3629_v1  ;;  %v3655_v25 = vrot.slane %v3654_v62, 4  ;;  %v3658_v34 = vsel %vm1840_vm14, %v3654_v62, %v3657_v47 }
 0x83a   : > { %v3638_v40 = vperm.slane %v3630_v61, %v5453_v17  ;;  %v3639_v39 = vrot.slane %v3634_v56, 4  ;;  %v3666_v51 = vperm.slane %v3658_v34, %v5453_v17  ;;  %v3707_v12 = vshrl.u32 %v3634_v56, 16 }
 0x83b   : > { %v3656_v28 = vsel %vm1840_vm14, %v3655_v25, %v3648_v0 }
 0x83c   : > { %v3641_v55 = vrot.slane %v3638_v40, 4  ;;  %v3640_v14 = vsel %vm1840_vm14, 0, %v3639_v39  ;;  %v3662_v6 = vperm.slane %v3656_v28, %v5453_v17  ;;  %v3723_v58 = vshrl.u32 %v3638_v40, 16 }
 0x83d   : > { %v3669_v30 = vrot.slane %v3666_v51, 4  ;;  %v3715_v31 = vshrl.u32 %v3640_v14, 16  ;;  %v3721_v52 = vpack.i.b16 %v3666_v51, %v3638_v40  ;;  %v3724_v15 = vshrl.u32 %v3666_v51, 16 }
 0x83e   : > { %v3642_v7 = vsel %vm1840_vm14, 0, %v3641_v55  ;;  %v3667_v24 = vrot.slane %v3662_v6, 4  ;;  %v3705_v60 = vpack.i.b16 %v3662_v6, %v3634_v56  ;;  %v3708_v46 = vshrl.u32 %v3662_v6, 16 }
 0x83f   : > { %v3731_v50 = vshrl.u32 %v3642_v7, 16  ;;  %v3670_v17 = vsel %vm1840_vm14, 0, %v3669_v30  ;;  %v3725_v37 = vpack.i.b16 %v3724_v15, %v3723_v58  ;;  %v3744_v57 = vunpack.c.l.bf16 %v3721_v52 }
 0x840   : > { %v3668_v22 = vsel %vm1840_vm14, 0, %v3667_v24  ;;  %v3736_v13 = vunpack.c.l.bf16 %v3705_v60  ;;  %v3709_v4 = vpack.i.b16 %v3708_v46, %v3707_v12  ;;  %v3729_v11 = vpack.i.b16 %v3670_v17, %v3642_v7 }
 0x841   : > { %v3713_v26 = vpack.i.b16 %v3668_v22, %v3640_v14  ;;  %v3716_v35 = vshrl.u32 %v3668_v22, 16  ;;  %v3732_v32 = vshrl.u32 %v3670_v17, 16  ;;  %v3746_v54 = vunpack.c.l.bf16 %v3725_v37 }
 0x842   : > { %v3784_v9 = vadd.f32 %v4108_v44, %v3736_v13  ;;  %v3738_v8 = vunpack.c.l.bf16 %v3709_v4  ;;  %v3748_v49 = vunpack.c.l.bf16 %v3729_v11  ;;  %v3792_v48 = vadd.f32 %v4124_v23, %v3744_v57 }
 0x843   : > { %v3717_v42 = vpack.i.b16 %v3716_v35, %v3715_v31  ;;  %v3740_v2 = vunpack.c.l.bf16 %v3713_v26  ;;  %v3733_v63 = vpack.i.b16 %v3732_v32, %v3731_v50  ;;  %v3794_v38 = vadd.f32 %v4128_v53, %v3746_v54 }
 0x844   : > { %v3800_v5 = vpack.c.bf16 %v3784_v9, %v3784_v9  ;;  %v3786_v43 = vadd.f32 %v4112_v59, %v3738_v8  ;;  %v3796_v45 = vadd.f32 %v4132_v3, %v3748_v49  ;;  %v3808_v20 = vpack.c.bf16 %v3792_v48, %v3792_v48 }
 0x845   : > { %v3742_v33 = vunpack.c.l.bf16 %v3717_v42  ;;  %v3788_v36 = vadd.f32 %v4116_v41, %v3740_v2  ;;  %v3750_v18 = vunpack.c.l.bf16 %v3733_v63  ;;  %v3810_v1 = vpack.c.bf16 %v3794_v38, %v3794_v38 }
 0x846   : > { %3817 = vst.msk [vmem:[%s4932_s17 + $0x4] sm:$0xf] %vm3815_vm0, %v3800_v5  ;;  %v3802_v19 = vpack.c.bf16 %v3786_v43, %v3786_v43  ;;  %v3812_v56 = vpack.c.bf16 %v3796_v45, %v3796_v45 }
 0x847   : > { %v3790_v0 = vadd.f32 %v4120_v29, %v3742_v33  ;;  %v3804_v16 = vpack.c.bf16 %v3788_v36, %v3788_v36  ;;  %v3798_v27 = vadd.f32 %v4136_v21, %v3750_v18  ;;  %3825 = vst.msk [vmem:[%s4932_s17 + $0x24] sm:$0xf] %vm3815_vm0, %v3808_v20 }
 0x848   : > { %3819 = vst.msk [vmem:[%s4932_s17 + $0xc] sm:$0xf] %vm3815_vm0, %v3802_v19 }
 0x849   : > { %v3806_v10 = vpack.c.bf16 %v3790_v0, %v3790_v0  ;;  %v3814_v62 = vpack.c.bf16 %v3798_v27, %v3798_v27  ;;  %3821 = vst.msk [vmem:[%s4932_s17 + $0x14] sm:$0xf] %vm3815_vm0, %v3804_v16 }
 0x84a   : > { %3827 = vst.msk [vmem:[%s4932_s17 + $0x2c] sm:$0xf] %vm3815_vm0, %v3810_v1 }
 0x84b   : > { %3823 = vst.msk [vmem:[%s4932_s17 + $0x1c] sm:$0xf] %vm3815_vm0, %v3806_v10 }
 0x84c   : > { %3829 = vst.msk [vmem:[%s4932_s17 + $0x34] sm:$0xf] %vm3815_vm0, %v3812_v56 }
 0x84d   : > { %3831 = vst.msk [vmem:[%s4932_s17 + $0x3c] sm:$0xf] %vm3815_vm0, %v3814_v62 }
 0x84e PF: > { %s6185_s20 = sld [smem:[#allocation18_spill]]  ;;  %s4104_s6 = sshll.u32 %s4550_s3, 4 }
 0x84f   : > { %s3848_s5 = sshll.u32 %s4932_s17, 4  ;;  %s6187_s12 = sld [smem:[#allocation35_spill]]  ;;  %s3849_s5 = int_to_ptr.vmem [resolvable:$true] %s3848_s5 }
 0x850   : > { %s3833_s7 = scalar_lea.sflag [#allocation9], %s298_s9 }
 0x854   : > { %s4090_s15 = sshll.u32 %s6185_s20, 5 }
 0x855   : > { %s3845_s13 = sadd.s32 %s4104_s6, %s4090_s15  ;;  %s4448_s10 = scalar_lea.hbm %s6187_s12, 256 }
 0x856   : > { %s4091_s14 = sshll.u32 %s3845_s13, 2 }
 0x857   : > { %s3847_s2 = scalar_lea.hbm %s6187_s12, %s4091_s14 }
 0x858   : > { %s3850_s4 = sshll.u32 %s3847_s2, 4  ;;  %s3851_s4 = int_to_ptr.hbm [resolvable:$true] %s3850_s4 }
 0x859   : > { %s4442_s30 = sshra.s32 %s3851_s4, 4  ;;  %s4443_s30 = int_to_ptr.hbm [resolvable:$true] %s4442_s30 }
 0x85a   : > { %s4444_s23 = scalar_lea.hbm %s4443_s30, 64  ;;  %p4449_p9 = scmp.lt.s32.totalorder %s4443_s30, %s6187_s12 }
 0x85b   : > { %p4445_p5 = scmp.ne.s32.totalorder %s4443_s30, %s4444_s23  ;;  %p4450_p12 = scmp.lt.s32.totalorder %s4448_s10, %s4444_s23 }
 0x85d   : > { %p4446_p7 = pnand %p4445_p5, %p4692_p6  ;;  %p4451_p13 = por %p4450_p12, %p4449_p9 }
 0x85f   : > { %p4447_p8 = pneg %p4446_p7 }
 0x861   : > { %p4452_p0 = pnand %p4451_p13, %p4447_p8 }
 0x863   : > { %4455 = shalt.err (!%p4452_p0)
}
 0x864   : > { %s4582_s9 = smov 64   ;;  %s4583_s25 = smov 4  }
 0x865   : > { %4154 = dma.vmem_to_hbm [thread:$0]  (%p4692_p6), %s3849_s5, 1024, %s3851_s4, %s3833_s7, %s4582_s9, %s4582_s9, %s4583_s25  }
 0x866 PF: > { %s6188_s20 = sld [smem:[#allocation16_spill]]  ;;  %p4171_p2 = scmp.ge.s32.totalorder %s4570_s28, 2 }
 0x868   : > { %p4165_p1 = pnand %p4171_p2, %p4698_p10 }
 0x86a   : > { %p4166_p4 = pneg %p4165_p1 }
 0x86c   : > { %s3865_s15 = sand.u32 1, %s6188_s20  }
 0x86d   : > { %s3866_s13 = scalar_lea.sflag [#allocation9], %s3865_s15 }
 0x86e   : > { %4517 = dma.done.wait (%p4166_p4), %s3866_s13, 1024  }
 0x86f   : > { %4519 = vsyncadd (%p4166_p4), %s3866_s13, 4294966272  ;;  %s22_s28 = sadd.s32 1, %s4570_s28   ;;  %s6191_s23 = sld [smem:[#allocation19_spill]] }
 0x870   : > { %p6066_p11 = scmp.ge.s32.totalorder %s22_s28, 10   ;;  %s6192_s3 = sld [smem:[#allocation20_spill]] }
 0x871   : > { %s6193_s25 = sld [smem:[#allocation23_spill]]  ;;  %s6196_s17 = smov %s4526_s18 }
 0x872   : > { %s6194_s5 = sld [smem:[#allocation24_spill]]  ;;  %s6197_s18 = smov %s4530_s19 }
 0x873   : > { %s6195_s29 = sld [smem:[#allocation25_spill]]  ;;  %s6198_s19 = smov %s4748_s8 }
 0x874   : > { %s6199_s20 = smov %s4538_s21  ;;  %s6200_s21 = smov %s4542_s22 }
 0x875   : > { %s6201_s22 = smov %s4755_s26  ;;  %s6202_s24 = smov %s4566_s27 }
 0x876   :  { %21 = sbr.rel (!%p6066_p11) target bundleno = 16 (0x10), region = 93 }
 0x878   : > { %s6203_s26 = smov %s6194_s5 }
 0x879   : > { %s6204_s27 = smov %s6195_s29 }
 0x87b   :  { %3872 = vsyncpa [#allocation8], 1 }
 0x87c   :  { %3874 = vsyncpa [#allocation8 + $0x1], 1 }
 0x87d   :  { %3875 = vsyncpa [#allocation11], 1 }
 0x87e   :  { %3876 = vsyncpa [#allocation9], 1 }
 0x87f   :  { %3878 = vsyncpa [#allocation9 + $0x1], 1 }

</bundles_post_ra>
